<compile_context>
chip_gen: v6e
topology: v6e:2x2x1
jax: 0.10.0
libtpu: 0.0.40
codegen_flags: <defaults>
</compile_context>

<pallas_src>
import functools

import jax
import jax.numpy as jnp
from jax import lax
from jax.experimental import pallas as pl
from jax.experimental.pallas import tpu as pltpu

CHANNELS = 62   # fixed in the module
NPAD = 64       # sublane-aligned channel padding used inside the kernel


def gnn_kernel(x_ref, wbn_ref, bbn_ref, wg_ref, bg_ref, xout_ref, adjout_ref,
               *, topk, n_valid):
    tb, n, fin = x_ref.shape          # n == NPAD (64)
    fbn = wbn_ref.shape[1]
    fout = wg_ref.shape[1]

    # ---- shared-weight linears: batch folded into M (one MXU pass each) ----
    x2 = x_ref[...].reshape(tb * n, fin)                      # free reshape
    xa = jnp.tanh(jnp.dot(x2, wbn_ref[...],
                          preferred_element_type=jnp.float32) + bbn_ref[...])
    xw = jnp.dot(x2, wg_ref[...], preferred_element_type=jnp.float32)

    # ---- adj = softmax(xa @ xa^T) per batch element -------------------------
    xa3 = xa.reshape(tb, n, fbn)
    logits = jnp.einsum('bnk,bmk->bnm', xa3, xa3,
                        preferred_element_type=jnp.float32)   # (tb, n, n)
    lg = logits.reshape(tb * n, n)

    col = lax.broadcasted_iota(jnp.int32, (tb * n, n), 1)
    valid = col < n_valid                                     # mask padded cols
    if fbn > 64:
        # |xa| <= 1 => |logits| <= fbn; only needed if exp could overflow f32.
        lg = lg - jnp.max(lg, axis=-1, keepdims=True)
    e = jnp.where(valid, jnp.exp(lg), 0.0)
    inv = pl.reciprocal(jnp.sum(e, axis=-1, keepdims=True), approx=False)
    adj = e * inv                                             # (tb*n, n)

    # ---- per-row top-k mask (static unroll; 2 XLU reduces / iter, no MXU) ---
    work = adj
    amask = jnp.zeros_like(adj)
    for _ in range(topk):
        m = jnp.max(work, axis=-1, keepdims=True)
        is_max = work == m
        first = jnp.min(jnp.where(is_max, col, n), axis=-1, keepdims=True)
        onehot = jnp.logical_and(is_max, col == first)        # first occurrence
        amask = jnp.where(onehot, 1.0, amask)
        work = jnp.where(onehot, -1.0, work)                  # softmax vals > 0

    adj_m = adj * amask
    adj_m3 = adj_m.reshape(tb, n, n)
    adjout_ref[...] = adj_m3[:, :n_valid, :n_valid]

    # ---- DenseGCNConv: self loops + symmetric norm folded into propagate ----
    row2 = lax.broadcasted_iota(jnp.int32, (n, n), 0)
    col2 = lax.broadcasted_iota(jnp.int32, (n, n), 1)
    adj_g = jnp.where(row2 == col2, 1.0, adj_m3)              # diag := 1
    deg = jnp.maximum(jnp.sum(adj_g, axis=-1, keepdims=True), 1.0)
    dinv = lax.rsqrt(deg)                                     # (tb, n, 1)
    xw3 = xw.reshape(tb, n, fout)
    prop = jnp.einsum('bnm,bmf->bnf', adj_g, dinv * xw3,
                      preferred_element_type=jnp.float32)     # (tb, n, fout)
    out = dinv * prop + bg_ref[...]
    xout_ref[...] = jnp.maximum(out, 0.0)[:, :n_valid, :]     # relu + unpad


def gnn_forward(x, wbn, bbn, wg, bg, topk, tb=None):
    if topk > CHANNELS:
        raise ValueError("topk must be <= 62")
    fin, fbn = wbn.shape
    fout = wg.shape[1]
    x = x.reshape(-1, CHANNELS, fin).astype(jnp.float32)
    b = x.shape[0]

    # Up to 64 batch elements per grid step (~10-14 MB live in VMEM); the
    # batch grid axis is "parallel" so multi-TC chips shard it.
    if tb is None:
        tb = max(1, min(64, b))
    bp = pl.cdiv(b, tb) * tb

    # Pad batch to bp and channels 62 -> 64 so in-kernel reshapes are free.
    x = jnp.pad(x, ((0, bp - b), (0, NPAD - CHANNELS), (0, 0)))

    wbn = wbn.astype(jnp.float32)
    wg = wg.astype(jnp.float32)
    bbn = bbn.reshape(1, fbn).astype(jnp.float32)
    bg = bg.reshape(1, fout).astype(jnp.float32)

    kernel = functools.partial(gnn_kernel, topk=topk, n_valid=CHANNELS)
    out, adj_out = pl.pallas_call(
        kernel,
        out_shape=(
            jax.ShapeDtypeStruct((bp, CHANNELS, fout), jnp.float32),
            jax.ShapeDtypeStruct((bp, CHANNELS, CHANNELS), jnp.float32),
        ),
        grid=(bp // tb,),
        in_specs=[
            pl.BlockSpec((tb, NPAD, fin), lambda i: (i, 0, 0)),
            pl.BlockSpec((fin, fbn), lambda i: (0, 0)),
            pl.BlockSpec((1, fbn), lambda i: (0, 0)),
            pl.BlockSpec((fin, fout), lambda i: (0, 0)),
            pl.BlockSpec((1, fout), lambda i: (0, 0)),
        ],
        out_specs=(
            pl.BlockSpec((tb, CHANNELS, fout), lambda i: (i, 0, 0)),
            pl.BlockSpec((tb, CHANNELS, CHANNELS), lambda i: (i, 0, 0)),
        ),
        compiler_params=pltpu.CompilerParams(
            dimension_semantics=("parallel",),
            vmem_limit_bytes=32 << 20),
    )(x, wbn, bbn, wg, bg)

    if bp != b:
        out = out[:b]
        adj_out = adj_out[:b]
    return out, adj_out


def gnn_reference(x, wbn, bbn, wg, bg, topk):
    """Pure-JAX reference mirroring the PyTorch forward."""
    fin = wbn.shape[0]
    x = x.reshape(-1, CHANNELS, fin).astype(jnp.float32)
    xa = jnp.tanh(jnp.einsum('bnf,fk->bnk', x, wbn) + bbn)
    adj = jax.nn.softmax(jnp.einsum('bnk,bmk->bnm', xa, xa), axis=2)
    _, t = lax.top_k(adj, topk)
    onehot = jax.nn.one_hot(t, CHANNELS, dtype=jnp.float32).sum(axis=2)
    amask = jnp.minimum(onehot, 1.0)
    adj_out = adj * amask
    # DenseGCNConv
    eye = jnp.eye(CHANNELS, dtype=jnp.float32)
    adj_g = adj_out * (1.0 - eye) + eye
    deg = jnp.clip(adj_g.sum(-1), 1.0, None)
    dinv = deg ** -0.5
    adj_n = dinv[:, :, None] * adj_g * dinv[:, None, :]
    out = jnp.einsum('bnm,bmf->bnf', adj_n,
                     jnp.einsum('bnf,fo->bno', x, wg)) + bg
    return jnp.maximum(out, 0.0), adj_out


if __name__ == "__main__":
    # small, module-consistent shapes
    B = 2
    in_features = 16
    bn_features = 32
    out_features = 8
    topk = 3

    key = jax.random.PRNGKey(0)
    kx, k1, k2, k3, k4 = jax.random.split(key, 5)

    x = jax.random.normal(kx, (B, CHANNELS, in_features), dtype=jnp.float32)

    # deterministic parameter init (PyTorch-Linear-style uniform bounds)
    bound = 1.0 / (in_features ** 0.5)
    wbn = jax.random.uniform(k1, (in_features, bn_features),
                             minval=-bound, maxval=bound, dtype=jnp.float32)
    bbn = jax.random.uniform(k2, (1, bn_features),
                             minval=-bound, maxval=bound, dtype=jnp.float32)
    wg = jax.random.uniform(k3, (in_features, out_features),
                            minval=-bound, maxval=bound, dtype=jnp.float32)
    bg = jax.random.uniform(k4, (1, out_features),
                            minval=-bound, maxval=bound, dtype=jnp.float32)

    out, adj_out = gnn_forward(x, wbn, bbn, wg, bg, topk)
    out = jax.block_until_ready(out)
    adj_out = jax.block_until_ready(adj_out)

    ref_out, ref_adj = gnn_reference(x, wbn, bbn, wg, bg, topk)
    assert out.shape == (B, CHANNELS, out_features)
    assert adj_out.shape == (B, CHANNELS, CHANNELS)
    assert jnp.allclose(out, ref_out, rtol=1e-4, atol=1e-4)
    assert jnp.allclose(adj_out, ref_adj, rtol=1e-4, atol=1e-4)

    print("KERNEL_OK")
</pallas_src>

<mosaic_0001>
module attributes {stable_mosaic.version = 11 : i64} {
  func.func @gnn_kernel(%arg0: i32, %arg1: memref<2x64x16xf32, #tpu.memory_space<vmem>>, %arg2: memref<16x32xf32, #tpu.memory_space<vmem>>, %arg3: memref<1x32xf32, #tpu.memory_space<vmem>>, %arg4: memref<16x8xf32, #tpu.memory_space<vmem>>, %arg5: memref<1x8xf32, #tpu.memory_space<vmem>>, %arg6: memref<2x62x8xf32, #tpu.memory_space<vmem>>, %arg7: memref<2x62x62xf32, #tpu.memory_space<vmem>>) attributes {dimension_semantics = [#tpu.dimension_semantics<parallel>], iteration_bounds = array<i64: 1>, scalar_prefetch = 0 : i64, scratch_operands = 0 : i64, tpu.core_type = #tpu.core_type<tc>, window_params = [{transform_indices = @transform_0, window_bounds = array<i64: 2, 64, 16>}, {pipeline_mode = #tpu.pipeline_mode<synchronous>, transform_indices = @transform_1, window_bounds = array<i64: 16, 32>}, {pipeline_mode = #tpu.pipeline_mode<synchronous>, transform_indices = @transform_2, window_bounds = array<i64: 1, 32>}, {pipeline_mode = #tpu.pipeline_mode<synchronous>, transform_indices = @transform_3, window_bounds = array<i64: 16, 8>}, {pipeline_mode = #tpu.pipeline_mode<synchronous>, transform_indices = @transform_4, window_bounds = array<i64: 1, 8>}, {transform_indices = @transform_5, window_bounds = array<i64: 2, 62, 8>}, {transform_indices = @transform_6, window_bounds = array<i64: 2, 62, 62>}]} {
    %c0 = arith.constant 0 : index
    %c0_0 = arith.constant 0 : index
    %c0_1 = arith.constant 0 : index
    %0 = vector.load %arg1[%c0, %c0_0, %c0_1] : memref<2x64x16xf32, #tpu.memory_space<vmem>>, vector<2x64x16xf32>
    %1 = vector.shape_cast %0 : vector<2x64x16xf32> to vector<128x16xf32>
    %c0_2 = arith.constant 0 : index
    %c0_3 = arith.constant 0 : index
    %2 = vector.load %arg2[%c0_2, %c0_3] : memref<16x32xf32, #tpu.memory_space<vmem>>, vector<16x32xf32>
    %cst = arith.constant dense<0.000000e+00> : vector<128x32xf32>
    %3 = tpu.matmul %1, %2, %cst {dimension_numbers = #tpu.dot_dimension_numbers<[1], [0], [0], [1], [0, 0, 1, 1], [], []>} : vector<128x16xf32>, vector<16x32xf32>, vector<128x32xf32> -> vector<128x32xf32>
    %c0_4 = arith.constant 0 : index
    %c0_5 = arith.constant 0 : index
    %4 = vector.load %arg3[%c0_4, %c0_5] : memref<1x32xf32, #tpu.memory_space<vmem>>, vector<1x32xf32>
    %5 = vector.broadcast %4 : vector<1x32xf32> to vector<128x32xf32>
    %6 = arith.addf %3, %5 : vector<128x32xf32>
    %7 = math.tanh %6 : vector<128x32xf32>
    %c0_6 = arith.constant 0 : index
    %c0_7 = arith.constant 0 : index
    %8 = vector.load %arg4[%c0_6, %c0_7] : memref<16x8xf32, #tpu.memory_space<vmem>>, vector<16x8xf32>
    %cst_8 = arith.constant dense<0.000000e+00> : vector<128x8xf32>
    %9 = tpu.matmul %1, %8, %cst_8 {dimension_numbers = #tpu.dot_dimension_numbers<[1], [0], [0], [1], [0, 0, 1, 1], [], []>} : vector<128x16xf32>, vector<16x8xf32>, vector<128x8xf32> -> vector<128x8xf32>
    %10 = vector.shape_cast %7 : vector<128x32xf32> to vector<2x64x32xf32>
    "tpu.trace_start"() <{level = 10 : i32, message = "bnk,bmk->bnm"}> : () -> ()
    %cst_9 = arith.constant dense<0.000000e+00> : vector<2x64x64xf32>
    %11 = tpu.matmul %10, %10, %cst_9 {dimension_numbers = #tpu.dot_dimension_numbers<[2], [2], [1], [1], [0, 0, 0, 1, 1, 1], [0], [0]>} : vector<2x64x32xf32>, vector<2x64x32xf32>, vector<2x64x64xf32> -> vector<2x64x64xf32>
    "tpu.trace_stop"() : () -> ()
    %12 = vector.shape_cast %11 : vector<2x64x64xf32> to vector<128x64xf32>
    %13 = tpu.iota {dimensions = array<i32: 1>} : vector<128x64xi32>
    %c62_i32 = arith.constant 62 : i32
    %14 = vector.broadcast %c62_i32 : i32 to vector<128x64xi32>
    %15 = arith.cmpi slt, %13, %14 : vector<128x64xi32>
    %16 = math.exp %12 : vector<128x64xf32>
    %cst_10 = arith.constant 0.000000e+00 : f32
    %17 = vector.broadcast %cst_10 : f32 to vector<128x64xf32>
    %18 = arith.select %15, %16, %17 : vector<128x64xi1>, vector<128x64xf32>
    %cst_11 = arith.constant dense<0.000000e+00> : vector<128xf32>
    %19 = vector.multi_reduction <add>, %18, %cst_11 [1] : vector<128x64xf32> to vector<128xf32>
    %20 = vector.shape_cast %19 : vector<128xf32> to vector<128x1xf32>
    %21 = tpu.reciprocal %20 : vector<128x1xf32> -> vector<128x1xf32>
    %22 = vector.broadcast %21 : vector<128x1xf32> to vector<128x64xf32>
    %23 = arith.mulf %18, %22 : vector<128x64xf32>
    %cst_12 = arith.constant 0.000000e+00 : f32
    %24 = vector.broadcast %cst_12 : f32 to vector<128x64xf32>
    %cst_13 = arith.constant dense<0xFF800000> : vector<128xf32>
    %25 = vector.multi_reduction <maximumf>, %23, %cst_13 [1] : vector<128x64xf32> to vector<128xf32>
    %26 = vector.shape_cast %25 : vector<128xf32> to vector<128x1xf32>
    %27 = vector.broadcast %26 : vector<128x1xf32> to vector<128x64xf32>
    %28 = arith.cmpf oeq, %23, %27 : vector<128x64xf32>
    %c64_i32 = arith.constant 64 : i32
    %29 = vector.broadcast %c64_i32 : i32 to vector<128x64xi32>
    %30 = arith.select %28, %13, %29 : vector<128x64xi1>, vector<128x64xi32>
    %cst_14 = arith.constant dense<2147483647> : vector<128xi32>
    %31 = vector.multi_reduction <minsi>, %30, %cst_14 [1] : vector<128x64xi32> to vector<128xi32>
    %32 = vector.shape_cast %31 : vector<128xi32> to vector<128x1xi32>
    %33 = vector.broadcast %32 : vector<128x1xi32> to vector<128x64xi32>
    %34 = arith.cmpi eq, %13, %33 : vector<128x64xi32>
    %35 = arith.andi %28, %34 : vector<128x64xi1>
    %cst_15 = arith.constant 1.000000e+00 : f32
    %36 = vector.broadcast %cst_15 : f32 to vector<128x64xf32>
    %37 = arith.select %35, %36, %24 : vector<128x64xi1>, vector<128x64xf32>
    %cst_16 = arith.constant -1.000000e+00 : f32
    %38 = vector.broadcast %cst_16 : f32 to vector<128x64xf32>
    %39 = arith.select %35, %38, %23 : vector<128x64xi1>, vector<128x64xf32>
    %cst_17 = arith.constant dense<0xFF800000> : vector<128xf32>
    %40 = vector.multi_reduction <maximumf>, %39, %cst_17 [1] : vector<128x64xf32> to vector<128xf32>
    %41 = vector.shape_cast %40 : vector<128xf32> to vector<128x1xf32>
    %42 = vector.broadcast %41 : vector<128x1xf32> to vector<128x64xf32>
    %43 = arith.cmpf oeq, %39, %42 : vector<128x64xf32>
    %c64_i32_18 = arith.constant 64 : i32
    %44 = vector.broadcast %c64_i32_18 : i32 to vector<128x64xi32>
    %45 = arith.select %43, %13, %44 : vector<128x64xi1>, vector<128x64xi32>
    %cst_19 = arith.constant dense<2147483647> : vector<128xi32>
    %46 = vector.multi_reduction <minsi>, %45, %cst_19 [1] : vector<128x64xi32> to vector<128xi32>
    %47 = vector.shape_cast %46 : vector<128xi32> to vector<128x1xi32>
    %48 = vector.broadcast %47 : vector<128x1xi32> to vector<128x64xi32>
    %49 = arith.cmpi eq, %13, %48 : vector<128x64xi32>
    %50 = arith.andi %43, %49 : vector<128x64xi1>
    %cst_20 = arith.constant 1.000000e+00 : f32
    %51 = vector.broadcast %cst_20 : f32 to vector<128x64xf32>
    %52 = arith.select %50, %51, %37 : vector<128x64xi1>, vector<128x64xf32>
    %cst_21 = arith.constant -1.000000e+00 : f32
    %53 = vector.broadcast %cst_21 : f32 to vector<128x64xf32>
    %54 = arith.select %50, %53, %39 : vector<128x64xi1>, vector<128x64xf32>
    %cst_22 = arith.constant dense<0xFF800000> : vector<128xf32>
    %55 = vector.multi_reduction <maximumf>, %54, %cst_22 [1] : vector<128x64xf32> to vector<128xf32>
    %56 = vector.shape_cast %55 : vector<128xf32> to vector<128x1xf32>
    %57 = vector.broadcast %56 : vector<128x1xf32> to vector<128x64xf32>
    %58 = arith.cmpf oeq, %54, %57 : vector<128x64xf32>
    %c64_i32_23 = arith.constant 64 : i32
    %59 = vector.broadcast %c64_i32_23 : i32 to vector<128x64xi32>
    %60 = arith.select %58, %13, %59 : vector<128x64xi1>, vector<128x64xi32>
    %cst_24 = arith.constant dense<2147483647> : vector<128xi32>
    %61 = vector.multi_reduction <minsi>, %60, %cst_24 [1] : vector<128x64xi32> to vector<128xi32>
    %62 = vector.shape_cast %61 : vector<128xi32> to vector<128x1xi32>
    %63 = vector.broadcast %62 : vector<128x1xi32> to vector<128x64xi32>
    %64 = arith.cmpi eq, %13, %63 : vector<128x64xi32>
    %65 = arith.andi %58, %64 : vector<128x64xi1>
    %cst_25 = arith.constant 1.000000e+00 : f32
    %66 = vector.broadcast %cst_25 : f32 to vector<128x64xf32>
    %67 = arith.select %65, %66, %52 : vector<128x64xi1>, vector<128x64xf32>
    %68 = arith.mulf %23, %67 : vector<128x64xf32>
    %69 = vector.shape_cast %68 : vector<128x64xf32> to vector<2x64x64xf32>
    %70 = vector.extract_strided_slice %69 {offsets = [0, 0, 0], sizes = [2, 62, 62], strides = [1, 1, 1]} : vector<2x64x64xf32> to vector<2x62x62xf32>
    %c0_26 = arith.constant 0 : index
    %c0_27 = arith.constant 0 : index
    %c0_28 = arith.constant 0 : index
    %71 = vector.load %arg7[%c0_26, %c0_27, %c0_28] : memref<2x62x62xf32, #tpu.memory_space<vmem>>, vector<2x62x62xf32>
    tpu.vector_store %arg7[%c0_26, %c0_27, %c0_28], %70 {strides = array<i32>} : memref<2x62x62xf32, #tpu.memory_space<vmem>>, vector<2x62x62xf32>,
    %72 = tpu.iota {dimensions = array<i32: 0>} : vector<64x64xi32>
    %73 = tpu.iota {dimensions = array<i32: 1>} : vector<64x64xi32>
    %74 = arith.cmpi eq, %72, %73 : vector<64x64xi32>
    %cst_29 = arith.constant 1.000000e+00 : f32
    %75 = vector.shape_cast %74 : vector<64x64xi1> to vector<1x64x64xi1>
    %76 = vector.broadcast %75 : vector<1x64x64xi1> to vector<2x64x64xi1>
    %77 = vector.broadcast %cst_29 : f32 to vector<2x64x64xf32>
    %78 = arith.select %76, %77, %69 : vector<2x64x64xi1>, vector<2x64x64xf32>
    %cst_30 = arith.constant dense<0.000000e+00> : vector<2x64xf32>
    %79 = vector.multi_reduction <add>, %78, %cst_30 [2] : vector<2x64x64xf32> to vector<2x64xf32>
    %80 = vector.shape_cast %79 : vector<2x64xf32> to vector<2x64x1xf32>
    %cst_31 = arith.constant 1.000000e+00 : f32
    %81 = vector.broadcast %cst_31 : f32 to vector<2x64x1xf32>
    %82 = arith.maximumf %80, %81 : vector<2x64x1xf32>
    %83 = math.rsqrt %82 : vector<2x64x1xf32>
    %84 = vector.shape_cast %9 : vector<128x8xf32> to vector<2x64x8xf32>
    %85 = vector.broadcast %83 : vector<2x64x1xf32> to vector<2x64x8xf32>
    %86 = arith.mulf %85, %84 : vector<2x64x8xf32>
    "tpu.trace_start"() <{level = 10 : i32, message = "bnm,bmf->bnf"}> : () -> ()
    %cst_32 = arith.constant dense<0.000000e+00> : vector<2x64x8xf32>
    %87 = tpu.matmul %78, %86, %cst_32 {dimension_numbers = #tpu.dot_dimension_numbers<[2], [1], [1], [2], [0, 0, 0, 1, 1, 2], [0], [0]>} : vector<2x64x64xf32>, vector<2x64x8xf32>, vector<2x64x8xf32> -> vector<2x64x8xf32>
    "tpu.trace_stop"() : () -> ()
    %88 = vector.broadcast %83 : vector<2x64x1xf32> to vector<2x64x8xf32>
    %89 = arith.mulf %88, %87 : vector<2x64x8xf32>
    %c0_33 = arith.constant 0 : index
    %c0_34 = arith.constant 0 : index
    %90 = vector.load %arg5[%c0_33, %c0_34] : memref<1x8xf32, #tpu.memory_space<vmem>>, vector<1x8xf32>
    %91 = vector.shape_cast %90 : vector<1x8xf32> to vector<1x1x8xf32>
    %92 = vector.broadcast %91 : vector<1x1x8xf32> to vector<2x64x8xf32>
    %93 = arith.addf %89, %92 : vector<2x64x8xf32>
    %cst_35 = arith.constant 0.000000e+00 : f32
    %94 = vector.broadcast %cst_35 : f32 to vector<2x64x8xf32>
    %95 = arith.maximumf %93, %94 : vector<2x64x8xf32>
    %96 = vector.extract_strided_slice %95 {offsets = [0, 0, 0], sizes = [2, 62, 8], strides = [1, 1, 1]} : vector<2x64x8xf32> to vector<2x62x8xf32>
    %c0_36 = arith.constant 0 : index
    %c0_37 = arith.constant 0 : index
    %c0_38 = arith.constant 0 : index
    %97 = vector.load %arg6[%c0_36, %c0_37, %c0_38] : memref<2x62x8xf32, #tpu.memory_space<vmem>>, vector<2x62x8xf32>
    tpu.vector_store %arg6[%c0_36, %c0_37, %c0_38], %96 {strides = array<i32>} : memref<2x62x8xf32, #tpu.memory_space<vmem>>, vector<2x62x8xf32>,
    return
  }
  func.func @transform_0(%arg0: i32) -> (i32, i32, i32) {
    %c0_i32 = arith.constant 0 : i32
    %c0_i32_0 = arith.constant 0 : i32
    %c0_i32_1 = arith.constant 0 : i32
    return %arg0, %c0_i32, %c0_i32_0 : i32, i32, i32
  }
  func.func @transform_1(%arg0: i32) -> (i32, i32) {
    %c0_i32 = arith.constant 0 : i32
    %c0_i32_0 = arith.constant 0 : i32
    %c0_i32_1 = arith.constant 0 : i32
    return %c0_i32, %c0_i32_0 : i32, i32
  }
  func.func @transform_2(%arg0: i32) -> (i32, i32) {
    %c0_i32 = arith.constant 0 : i32
    %c0_i32_0 = arith.constant 0 : i32
    %c0_i32_1 = arith.constant 0 : i32
    return %c0_i32, %c0_i32_0 : i32, i32
  }
  func.func @transform_3(%arg0: i32) -> (i32, i32) {
    %c0_i32 = arith.constant 0 : i32
    %c0_i32_0 = arith.constant 0 : i32
    %c0_i32_1 = arith.constant 0 : i32
    return %c0_i32, %c0_i32_0 : i32, i32
  }
  func.func @transform_4(%arg0: i32) -> (i32, i32) {
    %c0_i32 = arith.constant 0 : i32
    %c0_i32_0 = arith.constant 0 : i32
    %c0_i32_1 = arith.constant 0 : i32
    return %c0_i32, %c0_i32_0 : i32, i32
  }
  func.func @transform_5(%arg0: i32) -> (i32, i32, i32) {
    %c0_i32 = arith.constant 0 : i32
    %c0_i32_0 = arith.constant 0 : i32
    %c0_i32_1 = arith.constant 0 : i32
    return %arg0, %c0_i32, %c0_i32_0 : i32, i32, i32
  }
  func.func @transform_6(%arg0: i32) -> (i32, i32, i32) {
    %c0_i32 = arith.constant 0 : i32
    %c0_i32_0 = arith.constant 0 : i32
    %c0_i32_1 = arith.constant 0 : i32
    return %arg0, %c0_i32, %c0_i32_0 : i32, i32, i32
  }
}

</mosaic_0001>

<bundles_post_ra>
// kernel: tpu_custom_call.1
= control target key start
LH: loop header
LB: loop body
LE: loop exit
PB: predicated region body
PF: predicated region fallthrough
CT: control target
= control target key end

     0   :  { %vm47_vm0 = vcmask 130048   ;;  %vm404_vm1 = vcmask 261120   ;;  %vm5521_vm3 = vcmask 523264   ;;  %s5492_s1 = inlined_call_operand.vmem [shape: f32[16,32], index: 1, kind: input, shape index: {}]   ;;  %s5493_s0 = inlined_call_operand.vmem [shape: f32[2,64,16], index: 0, kind: input, shape index: {}]   ;;  %s5494_s3 = inlined_call_operand.vmem [shape: f32[16,8], index: 3, kind: input, shape index: {}]   ;;  %s5495_s2 = inlined_call_operand.vmem [shape: f32[1,32], index: 2, kind: input, shape index: {}]   ;;  %s5496_s6 = inlined_call_operand.vmem [shape: f32[2,62,62], index: 6, kind: output, shape index: {1}]   ;;  %s5497_s4 = inlined_call_operand.vmem [shape: f32[1,8], index: 4, kind: input, shape index: {}]   ;;  %s5498_s5 = inlined_call_operand.vmem [shape: f32[2,62,8], index: 5, kind: output, shape index: {0}]  }
   0x1   :  { %v39_v0 = vld [vmem:[%s5492_s1 + $0x8] sm:$0xff]  ;;  %v38_v1 = vld [vmem:[%s5492_s1] sm:$0xff]  ;;  %v24_v4 = vld [vmem:[%s5493_s0 + $0x10] sm:$0xff] }
   0x2   :  { %v22_v2 = vld [vmem:[%s5493_s0] sm:$0xff]  ;;  %2631 = vmatprep.subr.mxu0 %v39_v0  ;;  %v23_v3 = vld [vmem:[%s5493_s0 + $0x8] sm:$0xff]  ;;  %v25_v5 = vld [vmem:[%s5493_s0 + $0x18] sm:$0xff] }
   0x3   :  { %2635 = vmatprep.mubr.msk.f32.mxu0 %vm47_vm0, %v22_v2  ;;  %2632 = vmatpush3.msra.mxu0 %v39_v0  ;;  %v26_v6 = vld [vmem:[%s5493_s0 + $0x20] sm:$0xff]  ;;  %v27_v7 = vld [vmem:[%s5493_s0 + $0x28] sm:$0xff]  ;;  %v28_v8 = vld [vmem:[%s5493_s0 + $0x30] sm:$0xff] }
   0x4   :  { %2663 = vmatprep.mubr.msk.f32.mxu1 %vm47_vm0, %v22_v2  ;;  %2633 = vmatprep.subr.mxu0 %v38_v1  ;;  %v29_v9 = vld [vmem:[%s5493_s0 + $0x38] sm:$0xff]  ;;  %v30_v10 = vld [vmem:[%s5493_s0 + $0x40] sm:$0xff]  ;;  %v31_v11 = vld [vmem:[%s5493_s0 + $0x48] sm:$0xff] }
   0x5   :  { %2634 = vmatpush3.msra.mxu0 %v38_v1  ;;  %v32_v12 = vld [vmem:[%s5493_s0 + $0x50] sm:$0xff]  ;;  %v33_v13 = vld [vmem:[%s5493_s0 + $0x58] sm:$0xff]  ;;  %v34_v14 = vld [vmem:[%s5493_s0 + $0x60] sm:$0xff] }
   0x6   :  { %2636 = vmatmul.mubr.msk.f32.vlgmr.msra.gmra.mxu0 %vm47_vm0, %v23_v3  ;;  %v35_v15 = vld [vmem:[%s5493_s0 + $0x68] sm:$0xff]  ;;  %v36_v16 = vld [vmem:[%s5493_s0 + $0x70] sm:$0xff]  ;;  %v37_v17 = vld [vmem:[%s5493_s0 + $0x78] sm:$0xff] }
   0x7   :  { %2638 = vmatprep.mubr.msk.f32.mxu0 %vm47_vm0, %v24_v4  ;;  %v258_v18 = vld [vmem:[%s5494_s3 + $0x8] sm:$0xff]  ;;  %v257_v19 = vld [vmem:[%s5494_s3] sm:$0xff] }
   0x8   :  { %2659 = vmatprep.subr.mxu1 %v258_v18  ;;  %v3059_v21 = vld [vmem:[%s5495_s2] ss:$0 sm:$0xff] }
   0x9   :  { %2660 = vmatpush3.msra.mxu1 %v258_v18 }
   0xa   :  { %2639 = vmatmul.mubr.msk.f32.gmra.mxu0 %vm47_vm0, %v25_v5  ;;  %2661 = vmatprep.subr.mxu1 %v257_v19 }
   0xb   :  { %2641 = vmatprep.mubr.msk.f32.mxu0 %vm47_vm0, %v26_v6  ;;  %2662 = vmatpush3.msra.mxu1 %v257_v19 }
   0xc   :  { %2664 = vmatmul.mubr.msk.f32.vlgmr.msra.gmra.mxu1 %vm47_vm0, %v23_v3 }
   0xd   :  { %2666 = vmatprep.mubr.msk.f32.mxu1 %vm47_vm0, %v24_v4 }
   0xe   :  { %2642 = vmatmul.mubr.msk.f32.gmra.mxu0 %vm47_vm0, %v27_v7 }
   0xf   :  { %2644 = vmatprep.mubr.msk.f32.mxu0 %vm47_vm0, %v28_v8 }
  0x10   :  { %2667 = vmatmul.mubr.msk.f32.gmra.mxu1 %vm47_vm0, %v25_v5 }
  0x11   :  { %2669 = vmatprep.mubr.msk.f32.mxu1 %vm47_vm0, %v26_v6 }
  0x12   :  { %2645 = vmatmul.mubr.msk.f32.gmra.mxu0 %vm47_vm0, %v29_v9 }
  0x13   :  { %2647 = vmatprep.mubr.msk.f32.mxu0 %vm47_vm0, %v30_v10 }
  0x14   :  { %2670 = vmatmul.mubr.msk.f32.gmra.mxu1 %vm47_vm0, %v27_v7 }
  0x15   :  { %2672 = vmatprep.mubr.msk.f32.mxu1 %vm47_vm0, %v28_v8 }
  0x16   :  { %2648 = vmatmul.mubr.msk.f32.gmra.mxu0 %vm47_vm0, %v31_v11 }
  0x17   :  { %2650 = vmatprep.mubr.msk.f32.mxu0 %vm47_vm0, %v32_v12 }
  0x18   :  { %2673 = vmatmul.mubr.msk.f32.gmra.mxu1 %vm47_vm0, %v29_v9 }
  0x19   :  { %2675 = vmatprep.mubr.msk.f32.mxu1 %vm47_vm0, %v30_v10 }
  0x1a   :  { %2651 = vmatmul.mubr.msk.f32.gmra.mxu0 %vm47_vm0, %v33_v13 }
  0x1b   :  { %2653 = vmatprep.mubr.msk.f32.mxu0 %vm47_vm0, %v34_v14 }
  0x1c   :  { %2676 = vmatmul.mubr.msk.f32.gmra.mxu1 %vm47_vm0, %v31_v11 }
  0x1d   :  { %2678 = vmatprep.mubr.msk.f32.mxu1 %vm47_vm0, %v32_v12 }
  0x1e   :  { %2654 = vmatmul.mubr.msk.f32.gmra.mxu0 %vm47_vm0, %v35_v15 }
  0x1f   :  { %2656 = vmatprep.mubr.msk.f32.mxu0 %vm47_vm0, %v36_v16 }
  0x20   :  { %2679 = vmatmul.mubr.msk.f32.gmra.mxu1 %vm47_vm0, %v33_v13 }
  0x21   :  { %2681 = vmatprep.mubr.msk.f32.mxu1 %vm47_vm0, %v34_v14 }
  0x22   :  { %2657 = vmatmul.mubr.msk.f32.gmra.mxu0 %vm47_vm0, %v37_v17 }
  0x24   :  { %2682 = vmatmul.mubr.msk.f32.gmra.mxu1 %vm47_vm0, %v35_v15 }
  0x25   :  { %2684 = vmatprep.mubr.msk.f32.mxu1 %vm47_vm0, %v36_v16 }
  0x28   :  { %2685 = vmatmul.mubr.msk.f32.gmra.mxu1 %vm47_vm0, %v37_v17 }
  0xc6   :  { %v2637_v20 = vpop.f32.mrf.mxu0 }
  0xc7   :  { %v168_v50 = vadd.f32 %v2637_v20, %v3059_v21 }
  0xc8   :  { %v162_v22 = vpop.f32.mrf.mxu0 }
  0xc9   :  { %v163_v23 = vadd.f32 %v3059_v21, %v162_v22 }
  0xca   :  { %v2640_v24 = vpop.f32.mrf.mxu0 }
  0xcb   :  { %2800 = vtanh.f32 %v163_v23  ;;  %v178_v41 = vadd.f32 %v2640_v24, %v3059_v21 }
  0xcc   :  { %v172_v25 = vpop.f32.mrf.mxu0  ;;  %v3140_v5 = vpop.f32.mrf.mxu1 }
  0xcd   :  { %v173_v44 = vadd.f32 %v3059_v21, %v172_v25  ;;  %5660 = vst [vmem:[#allocation2_spill] sm:$0xff] %v3140_v5 }
  0xce   :  { %v2643_v26 = vpop.f32.mrf.mxu0  ;;  %v3142_v6 = vpop.f32.mrf.mxu1 }
  0xcf   :  { %v188_v32 = vadd.f32 %v2643_v26, %v3059_v21  ;;  %5661 = vst [vmem:[#allocation3_spill] sm:$0xff] %v3142_v6 }
  0xd0   :  { %v182_v27 = vpop.f32.mrf.mxu0  ;;  %v3144_v7 = vpop.f32.mrf.mxu1 }
  0xd1   :  { %v183_v38 = vadd.f32 %v3059_v21, %v182_v27  ;;  %5662 = vst [vmem:[#allocation4_spill] sm:$0xff] %v3144_v7 }
  0xd2   :  { %v2646_v28 = vpop.f32.mrf.mxu0  ;;  %v3146_v8 = vpop.f32.mrf.mxu1 }
  0xd3   :  { %v198_v29 = vadd.f32 %v2646_v28, %v3059_v21  ;;  %5663 = vst [vmem:[#allocation5_spill] sm:$0xff] %v3146_v8 }
  0xd4   :  { %v192_v30 = vpop.f32.mrf.mxu0  ;;  %v3148_v9 = vpop.f32.mrf.mxu1 }
  0xd5   :  { %2802 = vtanh.f32 %v198_v29  ;;  %v193_v31 = vadd.f32 %v3059_v21, %v192_v30  ;;  %5664 = vst [vmem:[#allocation6_spill] sm:$0xff] %v3148_v9 }
  0xd6   :  { %v2649_v33 = vpop.f32.mrf.mxu0  ;;  %v3150_v10 = vpop.f32.mrf.mxu1 }
  0xd7   :  { %2804 = vtanh.f32 %v193_v31  ;;  %v208_v63 = vadd.f32 %v2649_v33, %v3059_v21  ;;  %5665 = vst [vmem:[#allocation7_spill] sm:$0xff] %v3150_v10 }
  0xd8   :  { %v3065_v34 = vpop.eup %2800  ;;  %v202_v35 = vpop.f32.mrf.mxu0  ;;  %2806 = vtanh.f32 %v188_v32 }
  0xd9   :  { %v203_v36 = vadd.f32 %v3059_v21, %v202_v35  ;;  %2703 = vmatprep.mubr.msk.f32.mxu0 %vm404_vm1, %v3065_v34  ;;  %v3152_v11 = vpop.f32.mrf.mxu1 }
  0xda   :  { %v2652_v37 = vpop.f32.mrf.mxu0  ;;  %5666 = vst [vmem:[#allocation8_spill] sm:$0xff] %v3152_v11 }
  0xdb   :  { %2808 = vtanh.f32 %v203_v36  ;;  %v218_v56 = vadd.f32 %v2652_v37, %v3059_v21  ;;  %v3154_v12 = vpop.f32.mrf.mxu1 }
  0xdc   :  { %v212_v39 = vpop.f32.mrf.mxu0  ;;  %2810 = vtanh.f32 %v183_v38  ;;  %5667 = vst [vmem:[#allocation9_spill] sm:$0xff] %v3154_v12 }
  0xdd   :  { %2812 = vtanh.f32 %v178_v41  ;;  %v213_v60 = vadd.f32 %v3059_v21, %v212_v39  ;;  %v3156_v13 = vpop.f32.mrf.mxu1 }
  0xde   :  { %v2655_v40 = vpop.f32.mrf.mxu0  ;;  %5668 = vst [vmem:[#allocation10_spill] sm:$0xff] %v3156_v13 }
  0xdf   :  { %v228_v52 = vadd.f32 %v2655_v40, %v3059_v21  ;;  %v3158_v14 = vpop.f32.mrf.mxu1 }
  0xe0   :  { %v222_v42 = vpop.f32.mrf.mxu0  ;;  %5669 = vst [vmem:[#allocation11_spill] sm:$0xff] %v3158_v14 }
  0xe1   :  { %v223_v54 = vadd.f32 %v3059_v21, %v222_v42  ;;  %v3160_v15 = vpop.f32.mrf.mxu1 }
  0xe2   :  { %v3072_v43 = vpop.eup %2802  ;;  %v2658_v45 = vpop.f32.mrf.mxu0  ;;  %5670 = vst [vmem:[#allocation12_spill] sm:$0xff] %v3160_v15 }
  0xe3   :  { %v238_v46 = vadd.f32 %v2658_v45, %v3059_v21  ;;  %2687 = vmatprep.subr.msk.mxu0 %vm404_vm1, %v3072_v43  ;;  %v3162_v16 = vpop.f32.mrf.mxu1 }
  0xe4   :  { %v3078_v47 = vpop.eup %2804  ;;  %v232_v48 = vpop.f32.mrf.mxu0  ;;  %2688 = vmatpush3.xpose.msk.msra.mxu0 %vm404_vm1, %v3072_v43  ;;  %5671 = vst [vmem:[#allocation13_spill] sm:$0xff] %v3162_v16 }
  0xe5   :  { %2814 = vtanh.f32 %v238_v46  ;;  %v233_v49 = vadd.f32 %v3059_v21, %v232_v48  ;;  %2689 = vmatprep.subr.msk.mxu0 %vm404_vm1, %v3078_v47  ;;  %v2807_v51 = vpop.eup %2806  ;;  %v3166_v19 = vpop.f32.mrf.mxu1 }
  0xe6   :  { %2816 = vtanh.f32 %v173_v44  ;;  %5672 = vst [vmem:[#allocation14_spill] sm:$0xff] %v3166_v19 }
  0xe7   :  { %2818 = vtanh.f32 %v233_v49  ;;  %v3168_v22 = vpop.f32.mrf.mxu1 }
  0xe8   :  { %v2809_v53 = vpop.eup %2808  ;;  %2690 = vmatpush3.xpose.msk.msra.mxu0 %vm404_vm1, %v3078_v47  ;;  %2820 = vtanh.f32 %v168_v50  ;;  %5673 = vst [vmem:[#allocation15_spill] sm:$0xff] %v3168_v22 }
  0xe9   :  { %2691 = vmatprep.subr.msk.mxu0 %vm404_vm1, %v2807_v51  ;;  %2731 = vmatprep.mubr.msk.f32.mxu1 %vm404_vm1, %v2809_v53  ;;  %2822 = vtanh.f32 %v228_v52  ;;  %v2811_v55 = vpop.eup %2810  ;;  %v3170_v25 = vpop.f32.mrf.mxu1 }
  0xea   :  { %2824 = vtanh.f32 %v223_v54  ;;  %v2813_v57 = vpop.eup %2812  ;;  %5674 = vst [vmem:[#allocation16_spill] sm:$0xff] %v3170_v25 }
  0xeb   :  { %2826 = vtanh.f32 %v218_v56  ;;  %v3172_v30 = vpop.f32.mrf.mxu1 }
  0xec   :  { %2692 = vmatpush3.xpose.msk.msra.mxu0 %vm404_vm1, %v2807_v51  ;;  %2828 = vtanh.f32 %v213_v60  ;;  %5675 = vst [vmem:[#allocation17_spill] sm:$0xff] %v3172_v30 }
  0xed   :  { %2693 = vmatprep.subr.msk.mxu0 %vm404_vm1, %v2811_v55  ;;  %2830 = vtanh.f32 %v208_v63 }
  0xf0   :  { %2694 = vmatpush3.xpose.msk.msra.mxu0 %vm404_vm1, %v2811_v55 }
  0xf1   :  { %2695 = vmatprep.subr.msk.mxu0 %vm404_vm1, %v2813_v57 }
  0xf2   :  { %v2815_v58 = vpop.eup %2814 }
  0xf3   :  { %v2817_v59 = vpop.eup %2816  ;;  %2715 = vmatprep.subr.msk.mxu1 %vm404_vm1, %v2815_v58 }
  0xf4   :  { %v2819_v61 = vpop.eup %2818  ;;  %2696 = vmatpush3.xpose.msk.msra.mxu0 %vm404_vm1, %v2813_v57  ;;  %2716 = vmatpush3.xpose.msk.msra.mxu1 %vm404_vm1, %v2815_v58 }
  0xf5   :  { %2697 = vmatprep.subr.msk.mxu0 %vm404_vm1, %v2817_v59  ;;  %2717 = vmatprep.subr.msk.mxu1 %vm404_vm1, %v2819_v61  ;;  %v2821_v62 = vpop.eup %2820 }
  0xf6   :  { %v2823_v0 = vpop.eup %2822 }
  0xf7   :  { %v2825_v1 = vpop.eup %2824 }
  0xf8   :  { %2698 = vmatpush3.xpose.msk.msra.mxu0 %vm404_vm1, %v2817_v59  ;;  %2718 = vmatpush3.xpose.msk.msra.mxu1 %vm404_vm1, %v2819_v61  ;;  %v2827_v2 = vpop.eup %2826 }
  0xf9   :  { %2699 = vmatprep.subr.msk.mxu0 %vm404_vm1, %v2821_v62  ;;  %2719 = vmatprep.subr.msk.mxu1 %vm404_vm1, %v2823_v0  ;;  %v2829_v3 = vpop.eup %2828 }
  0xfa   :  { %v2831_v4 = vpop.eup %2830 }
  0xfc   :  { %2700 = vmatpush3.xpose.msk.msra.mxu0 %vm404_vm1, %v2821_v62  ;;  %2720 = vmatpush3.xpose.msk.msra.mxu1 %vm404_vm1, %v2823_v0 }
  0xfd   :  { %2701 = vmatprep.subr.msk.mxu0 %vm404_vm1, %v3065_v34  ;;  %2721 = vmatprep.subr.msk.mxu1 %vm404_vm1, %v2825_v1 }
 0x100   :  { %2702 = vmatpush3.xpose.msk.msra.mxu0 %vm404_vm1, %v3065_v34  ;;  %2722 = vmatpush3.xpose.msk.msra.mxu1 %vm404_vm1, %v2825_v1  ;;  %v5499_v34 = vlaneseq }
 0x101   :  { %2723 = vmatprep.subr.msk.mxu1 %vm404_vm1, %v2827_v2 }
 0x102   :  { %v3175_v37 = vand.u32 127, %v5499_v34 }
 0x103   :  { %2704 = vmatmul.mubr.msk.f32.vlgmr.msra.gmra.mxu0 %vm404_vm1, %v2821_v62 }
 0x104   :  { %2706 = vmatprep.mubr.msk.f32.mxu0 %vm404_vm1, %v2817_v59  ;;  %2724 = vmatpush3.xpose.msk.msra.mxu1 %vm404_vm1, %v2827_v2  ;;  %vm665_vm2 = vcmp.lt.s32.totalorder %v3175_v37, 62 }
 0x105   :  { %2725 = vmatprep.subr.msk.mxu1 %vm404_vm1, %v2829_v3 }
 0x107   :  { %2707 = vmatmul.mubr.msk.f32.gmra.mxu0 %vm404_vm1, %v2813_v57 }
 0x108   :  { %2709 = vmatprep.mubr.msk.f32.mxu0 %vm404_vm1, %v2811_v55  ;;  %2726 = vmatpush3.xpose.msk.msra.mxu1 %vm404_vm1, %v2829_v3 }
 0x109   :  { %2727 = vmatprep.subr.msk.mxu1 %vm404_vm1, %v2831_v4 }
 0x10b   :  { %2710 = vmatmul.mubr.msk.f32.gmra.mxu0 %vm404_vm1, %v2807_v51 }
 0x10c   :  { %2712 = vmatprep.mubr.msk.f32.mxu0 %vm404_vm1, %v3078_v47  ;;  %2728 = vmatpush3.xpose.msk.msra.mxu1 %vm404_vm1, %v2831_v4 }
 0x10d   :  { %2729 = vmatprep.subr.msk.mxu1 %vm404_vm1, %v2809_v53 }
 0x10f   :  { %2713 = vmatmul.mubr.msk.f32.gmra.mxu0 %vm404_vm1, %v3072_v43 }
 0x110   :  { %2730 = vmatpush3.xpose.msk.msra.mxu1 %vm404_vm1, %v2809_v53 }
 0x113   :  { %2732 = vmatmul.mubr.msk.f32.vlgmr.msra.gmra.mxu1 %vm404_vm1, %v2831_v4 }
 0x114   :  { %2734 = vmatprep.mubr.msk.f32.mxu1 %vm404_vm1, %v2829_v3 }
 0x117   :  { %2735 = vmatmul.mubr.msk.f32.gmra.mxu1 %vm404_vm1, %v2827_v2 }
 0x118   :  { %2737 = vmatprep.mubr.msk.f32.mxu1 %vm404_vm1, %v2825_v1 }
 0x11b   :  { %2738 = vmatmul.mubr.msk.f32.gmra.mxu1 %vm404_vm1, %v2823_v0 }
 0x11c   :  { %2740 = vmatprep.mubr.msk.f32.mxu1 %vm404_vm1, %v2819_v61 }
 0x11f   :  { %2741 = vmatmul.mubr.msk.f32.gmra.mxu1 %vm404_vm1, %v2815_v58 }
 0x1c3   :  { %v2705_v17 = vpop.f32.mrf.mxu0 }
 0x1c4   :  { %v668_v61 = vmul.f32 1.442695, %v2705_v17 }
 0x1c5   :  { %v3164_v18 = vpop.f32.mrf.mxu0 }
 0x1c6   :  { %v666_v0 = vmul.f32 1.442695, %v3164_v18 }
 0x1c7   :  { %v2708_v20 = vpop.f32.mrf.mxu0 }
 0x1c8   :  { %v672_v40 = vmul.f32 1.442695, %v2708_v20 }
 0x1c9   :  { %v505_v21 = vpop.f32.mrf.mxu0 }
 0x1ca   :  { %v670_v54 = vmul.f32 1.442695, %v505_v21 }
 0x1cb   :  { %v2711_v23 = vpop.f32.mrf.mxu0 }
 0x1cc   :  { %v676_v24 = vmul.f32 1.442695, %v2711_v23 }
 0x1cd   :  { %v515_v26 = vpop.f32.mrf.mxu0 }
 0x1ce   :  { %2832 = vpow2.f32 %v676_v24  ;;  %v674_v27 = vmul.f32 1.442695, %v515_v26 }
 0x1cf   :  { %v2714_v28 = vpop.f32.mrf.mxu0 }
 0x1d0   :  { %2834 = vpow2.f32 %v674_v27  ;;  %v680_v29 = vmul.f32 1.442695, %v2714_v28 }
 0x1d1   :  { %v525_v31 = vpop.f32.mrf.mxu0 }
 0x1d2   :  { %2836 = vpow2.f32 %v680_v29  ;;  %v678_v32 = vmul.f32 1.442695, %v525_v31 }
 0x1d3   :  { %v2733_v33 = vpop.f32.mrf.mxu1 }
 0x1d4   :  { %2838 = vpow2.f32 %v678_v32  ;;  %v684_v1 = vmul.f32 1.442695, %v2733_v33 }
 0x1d5   :  { %v624_v35 = vpop.f32.mrf.mxu1 }
 0x1d6   :  { %v682_v23 = vmul.f32 1.442695, %v624_v35 }
 0x1d7   :  { %v2736_v36 = vpop.f32.mrf.mxu1 }
 0x1d8   :  { %v688_v45 = vmul.f32 1.442695, %v2736_v36 }
 0x1d9   :  { %v634_v38 = vpop.f32.mrf.mxu1 }
 0x1da   :  { %v686_v63 = vmul.f32 1.442695, %v634_v38 }
 0x1db   :  { %v2833_v39 = vpop.eup %2832  ;;  %v2739_v41 = vpop.f32.mrf.mxu1 }
 0x1dc   :  { %v692_v42 = vmul.f32 1.442695, %v2739_v41  ;;  %v3180_v43 = vsel %vm665_vm2, %v2833_v39, 0.0 }
 0x1dd   :  { %v2835_v44 = vpop.eup %2834  ;;  %v644_v46 = vpop.f32.mrf.mxu1  ;;  %v730_v47 = vsel %vm5521_vm3, %v3180_v43, 0.0 }
 0x1de   :  { %2840 = vpow2.f32 %v692_v42  ;;  %v690_v48 = vmul.f32 1.442695, %v644_v46  ;;  %731 = vadd.xlane.f32.xlu0 %v730_v47  ;;  %v3186_v49 = vsel %vm665_vm2, %v2835_v44, 0.0 }
 0x1df   :  { %v2837_v50 = vpop.eup %2836  ;;  %2842 = vpow2.f32 %v672_v40  ;;  %v2742_v51 = vpop.f32.mrf.mxu1  ;;  %v727_v56 = vsel %vm5521_vm3, %v3186_v49, 0.0 }
 0x1e0   :  { %2844 = vpow2.f32 %v690_v48  ;;  %v696_v52 = vmul.f32 1.442695, %v2742_v51  ;;  %v3196_v59 = vsel %vm665_vm2, %v2837_v50, 0.0 }
 0x1e1   :  { %v2839_v53 = vpop.eup %2838  ;;  %2846 = vpow2.f32 %v688_v45  ;;  %v654_v55 = vpop.f32.mrf.mxu1  ;;  %v736_v62 = vsel %vm5521_vm3, %v3196_v59, 0.0 }
 0x1e2   :  { %2848 = vpow2.f32 %v696_v52  ;;  %v694_v57 = vmul.f32 1.442695, %v654_v55  ;;  %728 = vadd.xlane.f32.xlu0 %v727_v56  ;;  %v3192_v58 = vsel %vm665_vm2, %v2839_v53, 0.0 }
 0x1e3   :  { %v733_v60 = vsel %vm5521_vm3, %v3192_v58, 0.0  ;;  %2850 = vpow2.f32 %v670_v54 }
 0x1e4   :  { %734 = vadd.xlane.f32.xlu1 %v733_v60  ;;  %2852 = vpow2.f32 %v694_v57 }
 0x1e5   :  { %2854 = vpow2.f32 %v668_v61 }
 0x1e6   :  { %737 = vadd.xlane.f32.xlu0 %v736_v62  ;;  %2856 = vpow2.f32 %v686_v63 }
 0x1e7   :  { %2858 = vpow2.f32 %v666_v0 }
 0x1e8   :  { %2860 = vpow2.f32 %v684_v1 }
 0x1e9   :  { %2862 = vpow2.f32 %v682_v23 }
 0x1eb   :  { %v2841_v2 = vpop.eup %2840 }
 0x1ec   :  { %v2843_v3 = vpop.eup %2842  ;;  %v3205_v4 = vsel %vm665_vm2, %v2841_v2, 0.0 }
 0x1ed   :  { %v2845_v20 = vpop.eup %2844  ;;  %v754_v17 = vsel %vm5521_vm3, %v3205_v4, 0.0  ;;  %v701_v31 = vsel %vm665_vm2, %v2843_v3, 0.0 }
 0x1ee   :  { %v2847_v21 = vpop.eup %2846  ;;  %755 = vadd.xlane.f32.xlu1 %v754_v17  ;;  %v3211_v18 = vsel %vm665_vm2, %v2845_v20, 0.0  ;;  %v724_v35 = vsel %vm5521_vm3, %v701_v31, 0.0 }
 0x1ef   :  { %v2849_v24 = vpop.eup %2848  ;;  %v751_v28 = vsel %vm5521_vm3, %v3211_v18, 0.0  ;;  %v709_v32 = vsel %vm665_vm2, %v2847_v21, 0.0 }
 0x1f0   :  { %v3215_v26 = vsel %vm665_vm2, %v2849_v24, 0.0  ;;  %v2851_v29 = vpop.eup %2850  ;;  %v748_v36 = vsel %vm5521_vm3, %v709_v32, 0.0 }
 0x1f1   :  { %v760_v27 = vsel %vm5521_vm3, %v3215_v26, 0.0  ;;  %v2853_v33 = vpop.eup %2852  ;;  %v3229_v39 = vsel %vm665_vm2, %v2851_v29, 0.0 }
 0x1f2   :  { %761 = vadd.xlane.f32.xlu0 %v760_v27  ;;  %752 = vadd.xlane.f32.xlu1 %v751_v28  ;;  %v2855_v38 = vpop.eup %2854  ;;  %v3233_v40 = vsel %vm665_vm2, %v2853_v33, 0.0  ;;  %v721_v42 = vsel %vm5521_vm3, %v3229_v39, 0.0 }
 0x1f3   :  { %v2857_v41 = vpop.eup %2856  ;;  %v757_v44 = vsel %vm5521_vm3, %v3233_v40, 0.0  ;;  %v3241_v46 = vsel %vm665_vm2, %v2855_v38, 0.0 }
 0x1f4   :  { %v2859_v45 = vpop.eup %2858  ;;  %v3245_v47 = vsel %vm665_vm2, %v2857_v41, 0.0  ;;  %v718_v50 = vsel %vm5521_vm3, %v3241_v46, 0.0 }
 0x1f5   :  { %v2861_v48 = vpop.eup %2860  ;;  %v745_v51 = vsel %vm5521_vm3, %v3245_v47, 0.0  ;;  %v3253_v52 = vsel %vm665_vm2, %v2859_v45, 0.0 }
 0x1f6   :  { %725 = vadd.xlane.f32.xlu0 %v724_v35  ;;  %749 = vadd.xlane.f32.xlu1 %v748_v36  ;;  %v3257_v53 = vsel %vm665_vm2, %v2861_v48, 0.0  ;;  %v2863_v54 = vpop.eup %2862  ;;  %v715_v55 = vsel %vm5521_vm3, %v3253_v52, 0.0 }
 0x1f7   :  { %v742_v56 = vsel %vm5521_vm3, %v3257_v53, 0.0  ;;  %v3265_v57 = vsel %vm665_vm2, %v2863_v54, 0.0 }
 0x1f8   :  { %v739_v60 = vsel %vm5521_vm3, %v3265_v57, 0.0 }
 0x1fa   :  { %722 = vadd.xlane.f32.xlu0 %v721_v42  ;;  %758 = vadd.xlane.f32.xlu1 %v757_v44 }
 0x1fe   :  { %719 = vadd.xlane.f32.xlu0 %v718_v50  ;;  %746 = vadd.xlane.f32.xlu1 %v745_v51 }
 0x202   :  { %716 = vadd.xlane.f32.xlu0 %v715_v55  ;;  %743 = vadd.xlane.f32.xlu1 %v742_v56 }
 0x206   :  { %740 = vadd.xlane.f32.xlu1 %v739_v60 }
 0x267   :  { %v732_v61 = vpop.xlane.xlu0 %731 }
 0x268   :  { %2864 = vrcp.f32 %v732_v61 }
 0x26b   :  { %v729_v62 = vpop.xlane.xlu0 %728 }
 0x26d   :  { %v735_v63 = vpop.xlane.xlu1 %734 }
 0x26f   :  { %v738_v0 = vpop.xlane.xlu0 %737 }
 0x275   :  { %v2865_v27 = vpop.eup %2864 }
 0x276   :  { %v3276_v44 = vmul.f32 %v2865_v27, %v3180_v43 }
 0x277   :  { %v756_v1 = vpop.xlane.xlu1 %755 }
 0x278   :  { %2866 = vrcp.f32 %v756_v1  ;;  %5678 = vst [vmem:[#allocation20_spill] sm:$0xff] %v3276_v44 }
 0x27b   :  { %v762_v2 = vpop.xlane.xlu0 %761  ;;  %v753_v3 = vpop.xlane.xlu1 %752 }
 0x27f   :  { %v726_v20 = vpop.xlane.xlu0 %725  ;;  %v750_v17 = vpop.xlane.xlu1 %749 }
 0x280   :  { %2868 = vrcp.f32 %v726_v20 }
 0x281   :  { %2870 = vrcp.f32 %v750_v17 }
 0x282   :  { %2872 = vrcp.f32 %v729_v62 }
 0x283   :  { %v759_v21 = vpop.xlane.xlu1 %758  ;;  %2874 = vrcp.f32 %v753_v3  ;;  %v723_v23 = vpop.xlane.xlu0 %722 }
 0x284   :  { %2876 = vrcp.f32 %v738_v0 }
 0x285   :  { %2878 = vrcp.f32 %v762_v2  ;;  %v2867_v28 = vpop.eup %2866 }
 0x286   :  { %2880 = vrcp.f32 %v735_v63 }
 0x287   :  { %v747_v24 = vpop.xlane.xlu1 %746  ;;  %2882 = vrcp.f32 %v759_v21  ;;  %v720_v36 = vpop.xlane.xlu0 %719 }
 0x288   :  { %2884 = vrcp.f32 %v723_v23 }
 0x289   :  { %2886 = vrcp.f32 %v747_v24 }
 0x28a   :  { %2888 = vrcp.f32 %v720_v36 }
 0x28b   :  { %v744_v41 = vpop.xlane.xlu1 %743  ;;  %v717_v54 = vpop.xlane.xlu0 %716 }
 0x28c   :  { %2890 = vrcp.f32 %v744_v41 }
 0x28d   :  { %v2869_v29 = vpop.eup %2868  ;;  %2892 = vrcp.f32 %v717_v54 }
 0x28e   :  { %v2871_v33 = vpop.eup %2870  ;;  %v3269_v35 = vmul.f32 %v2869_v29, %v701_v31  ;;  %v3281_v31 = vmul.f32 %v2867_v28, %v3205_v4 }
 0x28f   :  { %v3271_v38 = vmul.f32 %v2871_v33, %v709_v32  ;;  %v2873_v45 = vpop.eup %2872  ;;  %v810_v32 = vsel %vm5521_vm3, %v3276_v44, -inf  ;;  %v741_v60 = vpop.xlane.xlu1 %740 }
 0x290   :  { %5676 = vst [vmem:[#allocation18_spill] sm:$0xff] %v3269_v35  ;;  %v804_v42 = vsel %vm5521_vm3, %v3269_v35, -inf  ;;  %5679 = vst [vmem:[#allocation21_spill] sm:$0xff] %v3281_v31  ;;  %v2875_v50 = vpop.eup %2874  ;;  %v3286_v51 = vmul.f32 %v2873_v45, %v3186_v49  ;;  %v834_v55 = vsel %vm5521_vm3, %v3281_v31, -inf  ;;  %2894 = vrcp.f32 %v741_v60 }
 0x291   :  { %5677 = vst [vmem:[#allocation19_spill] sm:$0xff] %v3271_v38  ;;  %805 = vmax.xlane.f32.xlu0 %v804_v42  ;;  %v828_v48 = vsel %vm5521_vm3, %v3271_v38, -inf  ;;  %v2877_v43 = vpop.eup %2876  ;;  %v3291_v56 = vmul.f32 %v2875_v50, %v3211_v18 }
 0x292   :  { %829 = vmax.xlane.f32.xlu1 %v828_v48  ;;  %5680 = vst [vmem:[#allocation22_spill] sm:$0xff] %v3286_v51  ;;  %v2879_v4 = vpop.eup %2878  ;;  %v807_v61 = vsel %vm5521_vm3, %v3286_v51, -inf  ;;  %v3296_v49 = vmul.f32 %v2877_v43, %v3196_v59 }
 0x293   :  { %5681 = vst [vmem:[#allocation23_spill] sm:$0xff] %v3291_v56  ;;  %v2881_v62 = vpop.eup %2880  ;;  %v831_v63 = vsel %vm5521_vm3, %v3291_v56, -inf  ;;  %v3301_v0 = vmul.f32 %v2879_v4, %v3215_v26 }
 0x294   :  { %5682 = vst [vmem:[#allocation24_spill] sm:$0xff] %v3296_v49  ;;  %v2883_v18 = vpop.eup %2882  ;;  %v816_v1 = vsel %vm5521_vm3, %v3296_v49, -inf  ;;  %v3306_v2 = vmul.f32 %v2881_v62, %v3192_v58 }
 0x295   :  { %811 = vmax.xlane.f32.xlu0 %v810_v32  ;;  %5683 = vst [vmem:[#allocation25_spill] sm:$0xff] %v3301_v0  ;;  %v2885_v3 = vpop.eup %2884  ;;  %v840_v59 = vsel %vm5521_vm3, %v3301_v0, -inf  ;;  %v3311_v20 = vmul.f32 %v2883_v18, %v3233_v40 }
 0x296   :  { %835 = vmax.xlane.f32.xlu1 %v834_v55  ;;  %5684 = vst [vmem:[#allocation26_spill] sm:$0xff] %v3306_v2  ;;  %v2887_v17 = vpop.eup %2886  ;;  %v813_v26 = vsel %vm5521_vm3, %v3306_v2, -inf  ;;  %v3316_v21 = vmul.f32 %v2885_v3, %v3229_v39 }
 0x297   :  { %5685 = vst [vmem:[#allocation27_spill] sm:$0xff] %v3311_v20  ;;  %v2889_v23 = vpop.eup %2888  ;;  %v837_v58 = vsel %vm5521_vm3, %v3311_v20, -inf  ;;  %v3321_v24 = vmul.f32 %v2887_v17, %v3245_v47 }
 0x298   :  { %5686 = vst [vmem:[#allocation28_spill] sm:$0xff] %v3316_v21  ;;  %v801_v40 = vsel %vm5521_vm3, %v3316_v21, -inf  ;;  %v3326_v28 = vmul.f32 %v2889_v23, %v3241_v46 }
 0x299   :  { %808 = vmax.xlane.f32.xlu0 %v807_v61  ;;  %5687 = vst [vmem:[#allocation29_spill] sm:$0xff] %v3321_v24  ;;  %v2891_v27 = vpop.eup %2890  ;;  %v825_v39 = vsel %vm5521_vm3, %v3321_v24, -inf }
 0x29a   :  { %832 = vmax.xlane.f32.xlu1 %v831_v63  ;;  %5688 = vst [vmem:[#allocation30_spill] sm:$0xff] %v3326_v28  ;;  %v2893_v29 = vpop.eup %2892  ;;  %v3331_v33 = vmul.f32 %v2891_v27, %v3257_v53  ;;  %v798_v47 = vsel %vm5521_vm3, %v3326_v28, -inf }
 0x29b   :  { %v3336_v41 = vmul.f32 %v2893_v29, %v3253_v52 }
 0x29c   :  { %5689 = vst [vmem:[#allocation31_spill] sm:$0xff] %v3331_v33  ;;  %v822_v46 = vsel %vm5521_vm3, %v3331_v33, -inf }
 0x29d   :  { %817 = vmax.xlane.f32.xlu0 %v816_v1  ;;  %v2895_v36 = vpop.eup %2894  ;;  %5690 = vst [vmem:[#allocation32_spill] sm:$0xff] %v3336_v41  ;;  %v795_v53 = vsel %vm5521_vm3, %v3336_v41, -inf }
 0x29e   :  { %841 = vmax.xlane.f32.xlu1 %v840_v59  ;;  %v3341_v42 = vmul.f32 %v2895_v36, %v3265_v57 }
 0x2a0   :  { %5691 = vst [vmem:[#allocation33_spill] sm:$0xff] %v3341_v42  ;;  %v819_v45 = vsel %vm5521_vm3, %v3341_v42, -inf }
 0x2a1   :  { %814 = vmax.xlane.f32.xlu0 %v813_v26 }
 0x2a2   :  { %838 = vmax.xlane.f32.xlu1 %v837_v58 }
 0x2a5   :  { %802 = vmax.xlane.f32.xlu0 %v801_v40 }
 0x2a6   :  { %826 = vmax.xlane.f32.xlu1 %v825_v39 }
 0x2a9   :  { %799 = vmax.xlane.f32.xlu0 %v798_v47 }
 0x2aa   :  { %823 = vmax.xlane.f32.xlu1 %v822_v46 }
 0x2ad   :  { %796 = vmax.xlane.f32.xlu0 %v795_v53 }
 0x2ae   :  { %820 = vmax.xlane.f32.xlu1 %v819_v45 }
 0x31a   :  { %v3347_v48 = vpop.xlane.xlu0 %805 }
 0x31b   :  { %vm846_vm4 = vcmp.eq.f32.partialorder %v3269_v35, %v3347_v48  ;;  %v3351_v52 = vpop.xlane.xlu1 %829 }
 0x31c   :  { %v862_v57 = vsel %vm846_vm4, %v3175_v37, 64  ;;  %vm854_vm5 = vcmp.eq.f32.partialorder %v3271_v38, %v3351_v52 }
 0x31d   :  { %v870_v50 = vsel %vm854_vm5, %v3175_v37, 64  ;;  %v3364_v32 = vsel %vm5521_vm3, %v862_v57, 2147483647 }
 0x31e   :  { %v3366_v43 = vpop.xlane.xlu0 %811  ;;  %v922_v54 = vshra.s32 %v3364_v32, 16  ;;  %v3370_v55 = vsel %vm5521_vm3, %v870_v50, 2147483647 }
 0x31f   :  { %vm848_vm6 = vcmp.eq.f32.partialorder %v3276_v44, %v3366_v43  ;;  %v3374_v4 = vpop.xlane.xlu1 %835  ;;  %v1042_v60 = vshra.s32 %v3370_v55, 16 }
 0x320   :  { %v864_v61 = vsel %vm848_vm6, %v3175_v37, 64  ;;  %vm856_vm7 = vcmp.eq.f32.partialorder %v3281_v31, %v3374_v4  ;;  %v3383_v62 = vcvt.s32.f32 %v922_v54 }
 0x321   :  { %v872_v63 = vsel %vm856_vm7, %v3175_v37, 64  ;;  %v3389_v18 = vcvt.s32.f32 %v1042_v60  ;;  %v3392_v1 = vsel %vm5521_vm3, %v864_v61, 2147483647 }
 0x322   :  { %v3394_v3 = vpop.xlane.xlu0 %808  ;;  %925 = vmin.xlane.f32.xlu0 %v3383_v62  ;;  %v952_v59 = vshra.s32 %v3392_v1, 16  ;;  %v3399_v17 = vsel %vm5521_vm3, %v872_v63, 2147483647 }
 0x323   :  { %vm847_vm8 = vcmp.eq.f32.partialorder %v3286_v51, %v3394_v3  ;;  %1045 = vmin.xlane.f32.xlu1 %v3389_v18  ;;  %v3404_v26 = vpop.xlane.xlu1 %832  ;;  %v1072_v23 = vshra.s32 %v3399_v17, 16 }
 0x324   :  { %v863_v58 = vsel %vm847_vm8, %v3175_v37, 64  ;;  %vm855_vm9 = vcmp.eq.f32.partialorder %v3291_v56, %v3404_v26  ;;  %v3413_v27 = vcvt.s32.f32 %v952_v59 }
 0x325   :  { %v871_v40 = vsel %vm855_vm9, %v3175_v37, 64  ;;  %v3419_v29 = vcvt.s32.f32 %v1072_v23  ;;  %v3422_v39 = vsel %vm5521_vm3, %v863_v58, 2147483647 }
 0x326   :  { %v3424_v36 = vpop.xlane.xlu0 %817  ;;  %955 = vmin.xlane.f32.xlu0 %v3413_v27  ;;  %v937_v47 = vshra.s32 %v3422_v39, 16  ;;  %v3429_v46 = vsel %vm5521_vm3, %v871_v40, 2147483647 }
 0x327   :  { %vm850_vm10 = vcmp.eq.f32.partialorder %v3296_v49, %v3424_v36  ;;  %1075 = vmin.xlane.f32.xlu1 %v3419_v29  ;;  %v3434_v53 = vpop.xlane.xlu1 %841  ;;  %v1057_v45 = vshra.s32 %v3429_v46, 16 }
 0x328   :  { %v866_v57 = vsel %vm850_vm10, %v3175_v37, 64  ;;  %vm858_vm11 = vcmp.eq.f32.partialorder %v3301_v0, %v3434_v53  ;;  %v3443_v50 = vcvt.s32.f32 %v937_v47 }
 0x329   :  { %v874_v54 = vsel %vm858_vm11, %v3175_v37, 64  ;;  %v3449_v60 = vcvt.s32.f32 %v1057_v45  ;;  %v3452_v61 = vsel %vm5521_vm3, %v866_v57, 2147483647 }
 0x32a   :  { %940 = vmin.xlane.f32.xlu0 %v3443_v50  ;;  %v3455_v63 = vpop.xlane.xlu0 %814  ;;  %v982_v59 = vshra.s32 %v3452_v61, 16  ;;  %v3459_v23 = vsel %vm5521_vm3, %v874_v54, 2147483647 }
 0x32b   :  { %vm849_vm12 = vcmp.eq.f32.partialorder %v3306_v2, %v3455_v63  ;;  %1060 = vmin.xlane.f32.xlu1 %v3449_v60  ;;  %v3464_v58 = vpop.xlane.xlu1 %838  ;;  %v1102_v40 = vshra.s32 %v3459_v23, 16 }
 0x32c   :  { %v865_v47 = vsel %vm849_vm12, %v3175_v37, 64  ;;  %vm857_vm13 = vcmp.eq.f32.partialorder %v3311_v20, %v3464_v58  ;;  %v3473_v45 = vcvt.s32.f32 %v982_v59 }
 0x32d   :  { %v873_v57 = vsel %vm857_vm13, %v3175_v37, 64  ;;  %v3479_v54 = vcvt.s32.f32 %v1102_v40  ;;  %v3482_v34 = vsel %vm5521_vm3, %v865_v47, 2147483647 }
 0x32e   :  { %985 = vmin.xlane.f32.xlu0 %v3473_v45  ;;  %v3485_v14 = vpop.xlane.xlu0 %802  ;;  %v967_v6 = vshra.s32 %v3482_v34, 16  ;;  %v3489_v13 = vsel %vm5521_vm3, %v873_v57, 2147483647 }
 0x32f   :  { %5692 = vst [vmem:[#allocation34_spill] sm:$0xff] %v3485_v14  ;;  %vm845_vm14 = vcmp.eq.f32.partialorder %v3316_v21, %v3485_v14  ;;  %1105 = vmin.xlane.f32.xlu1 %v3479_v54  ;;  %v3494_v59 = vpop.xlane.xlu1 %826  ;;  %v1087_v40 = vshra.s32 %v3489_v13, 16 }
 0x330   :  { %5693 = vst [vmem:[#allocation35_spill] sm:$0xff] %v3494_v59  ;;  %v861_v47 = vsel %vm845_vm14, %v3175_v37, 64  ;;  %vm5520_vm15 = vcmp.eq.f32.partialorder %v3321_v24, %v3494_v59  ;;  %v3503_v5 = vcvt.s32.f32 %v967_v6 }
 0x331   :  { %v869_v57 = vsel %vm5520_vm15, %v3175_v37, 64  ;;  %v3509_v16 = vcvt.s32.f32 %v1087_v40  ;;  %v3512_v8 = vsel %vm5521_vm3, %v861_v47, 2147483647 }
 0x332   :  { %970 = vmin.xlane.f32.xlu0 %v3503_v5  ;;  %v3515_v15 = vpop.xlane.xlu0 %799  ;;  %v907_v7 = vshra.s32 %v3512_v8, 16  ;;  %v3519_v22 = vsel %vm5521_vm3, %v869_v57, 2147483647 }
 0x333   :  { %5694 = vst [vmem:[#allocation36_spill] sm:$0xff] %v3515_v15  ;;  %vm5519_vm0 = vcmp.eq.f32.partialorder %v3326_v28, %v3515_v15  ;;  %1090 = vmin.xlane.f32.xlu1 %v3509_v16  ;;  %v3524_v6 = vpop.xlane.xlu1 %823  ;;  %v1027_v40 = vshra.s32 %v3519_v22, 16  ;;  %v951_v28 = vand.u32 65535, %v3392_v1  ;;  %v936_v1 = vand.u32 65535, %v3422_v39 }
 0x334   :  { %5695 = vst [vmem:[#allocation37_spill] sm:$0xff] %v3524_v6  ;;  %v860_v47 = vsel %vm5519_vm0, %v3175_v37, 64  ;;  %vm5500_vm1 = vcmp.eq.f32.partialorder %v3331_v33, %v3524_v6  ;;  %v3533_v10 = vcvt.s32.f32 %v907_v7  ;;  %v981_v39 = vand.u32 65535, %v3452_v61 }
 0x335   :  { %v868_v57 = vsel %vm5500_vm1, %v3175_v37, 64  ;;  %v3539_v19 = vcvt.s32.f32 %v1027_v40  ;;  %v3542_v9 = vsel %vm5521_vm3, %v860_v47, 2147483647  ;;  %v966_v61 = vand.u32 65535, %v3482_v34 }
 0x336   :  { %910 = vmin.xlane.f32.xlu0 %v3533_v10  ;;  %v3545_v30 = vpop.xlane.xlu0 %796  ;;  %v892_v12 = vshra.s32 %v3542_v9, 16  ;;  %v3549_v25 = vsel %vm5521_vm3, %v868_v57, 2147483647  ;;  %v906_v34 = vand.u32 65535, %v3512_v8  ;;  %v891_v8 = vand.u32 65535, %v3542_v9 }
 0x337   :  { %5696 = vst [vmem:[#allocation38_spill] sm:$0xff] %v3545_v30  ;;  %vm5517_vm2 = vcmp.eq.f32.partialorder %v3336_v41, %v3545_v30  ;;  %1030 = vmin.xlane.f32.xlu1 %v3539_v19  ;;  %v3554_v7 = vpop.xlane.xlu1 %820  ;;  %v1012_v40 = vshra.s32 %v3549_v25, 16 }
 0x338   :  { %5697 = vst [vmem:[#allocation39_spill] sm:$0xff] %v3554_v7  ;;  %v859_v47 = vsel %vm5517_vm2, %v3175_v37, 64  ;;  %vm5514_vm1 = vcmp.eq.f32.partialorder %v3341_v42, %v3554_v7  ;;  %v3563_v11 = vcvt.s32.f32 %v892_v12 }
 0x339   :  { %v867_v57 = vsel %vm5514_vm1, %v3175_v37, 64  ;;  %v3569_v6 = vcvt.s32.f32 %v1012_v40  ;;  %v3572_v33 = vsel %vm5521_vm3, %v859_v47, 2147483647  ;;  %v921_v40 = vand.u32 65535, %v3364_v32 }
 0x33a   :  { %895 = vmin.xlane.f32.xlu0 %v3563_v11  ;;  %v877_v30 = vshra.s32 %v3572_v33, 16  ;;  %v3577_v41 = vsel %vm5521_vm3, %v867_v57, 2147483647  ;;  %v1041_v47 = vand.u32 65535, %v3370_v55  ;;  %v876_v9 = vand.u32 65535, %v3572_v33 }
 0x33b   :  { %1015 = vmin.xlane.f32.xlu1 %v3569_v6  ;;  %v997_v12 = vshra.s32 %v3577_v41, 16  ;;  %v923_v57 = vcvt.s32.f32 %v921_v40  ;;  %v953_v40 = vcvt.s32.f32 %v951_v28  ;;  %v938_v28 = vcvt.s32.f32 %v936_v1 }
 0x33c   :  { %v3581_v15 = vcvt.s32.f32 %v877_v30  ;;  %v1043_v30 = vcvt.s32.f32 %v1041_v47 }
 0x33d   :  { %v3583_v7 = vcvt.s32.f32 %v997_v12  ;;  %v1071_v12 = vand.u32 65535, %v3399_v17  ;;  %v1056_v17 = vand.u32 65535, %v3429_v46  ;;  %v1101_v46 = vand.u32 65535, %v3459_v23 }
 0x33e   :  { %880 = vmin.xlane.f32.xlu0 %v3581_v15  ;;  %v1086_v23 = vand.u32 65535, %v3489_v13  ;;  %v1026_v13 = vand.u32 65535, %v3519_v22  ;;  %v1011_v22 = vand.u32 65535, %v3549_v25  ;;  %v996_v25 = vand.u32 65535, %v3577_v41 }
 0x33f   :  { %1000 = vmin.xlane.f32.xlu1 %v3583_v7 }
 0x340   :  { %v998_v33 = vcvt.s32.f32 %v996_v25 }
 0x3ab   :  { %v3589_v42 = vpop.xlane.xlu0 %925 }
 0x3ac   :  { %v3592_v59 = vpop.xlane.xlu1 %1045  ;;  %vm927_vm1 = vcmp.eq.f32.partialorder %v3383_v62, %v3589_v42  ;;  %v1073_v62 = vcvt.s32.f32 %v1071_v12 }
 0x3ad   :  { %v928_v24 = vsel %vm927_vm1, %v923_v57, inf  ;;  %vm1047_vm2 = vcmp.eq.f32.partialorder %v3389_v18, %v3592_v59 }
 0x3ae   :  { %929 = vmin.xlane.f32.xlu0 %v928_v24  ;;  %v1048_v32 = vsel %vm1047_vm2, %v1043_v30, inf }
 0x3af   :  { %1049 = vmin.xlane.f32.xlu1 %v1048_v32  ;;  %v3599_v55 = vpop.xlane.xlu0 %955  ;;  %v983_v32 = vcvt.s32.f32 %v981_v39  ;;  %v908_v39 = vcvt.s32.f32 %v906_v34 }
 0x3b0   :  { %v3602_v14 = vpop.xlane.xlu1 %1075  ;;  %vm957_vm0 = vcmp.eq.f32.partialorder %v3413_v27, %v3599_v55  ;;  %v1058_v27 = vcvt.s32.f32 %v1056_v17  ;;  %v968_v17 = vcvt.s32.f32 %v966_v61 }
 0x3b1   :  { %v958_v47 = vsel %vm957_vm0, %v953_v40, inf  ;;  %vm1077_vm1 = vcmp.eq.f32.partialorder %v3419_v29, %v3602_v14 }
 0x3b2   :  { %959 = vmin.xlane.f32.xlu0 %v958_v47  ;;  %v1078_v24 = vsel %vm1077_vm1, %v1073_v62, inf }
 0x3b3   :  { %1079 = vmin.xlane.f32.xlu1 %v1078_v24  ;;  %v3609_v18 = vpop.xlane.xlu0 %940 }
 0x3b4   :  { %v3612_v57 = vpop.xlane.xlu1 %1060  ;;  %vm942_vm2 = vcmp.eq.f32.partialorder %v3443_v50, %v3609_v18  ;;  %v1103_v50 = vcvt.s32.f32 %v1101_v46 }
 0x3b5   :  { %v943_v30 = vsel %vm942_vm2, %v938_v28, inf  ;;  %vm1062_vm0 = vcmp.eq.f32.partialorder %v3449_v60, %v3612_v57 }
 0x3b6   :  { %944 = vmin.xlane.f32.xlu0 %v943_v30  ;;  %v1063_v29 = vsel %vm1062_vm0, %v1058_v27, inf }
 0x3b7   :  { %1064 = vmin.xlane.f32.xlu1 %v1063_v29  ;;  %v3619_v12 = vpop.xlane.xlu0 %985  ;;  %v893_v29 = vcvt.s32.f32 %v891_v8 }
 0x3b8   :  { %v3622_v40 = vpop.xlane.xlu1 %1105  ;;  %vm987_vm1 = vcmp.eq.f32.partialorder %v3473_v45, %v3619_v12  ;;  %v1088_v45 = vcvt.s32.f32 %v1086_v23  ;;  %v878_v23 = vcvt.s32.f32 %v876_v9 }
 0x3b9   :  { %v988_v1 = vsel %vm987_vm1, %v983_v32, inf  ;;  %vm1107_vm2 = vcmp.eq.f32.partialorder %v3479_v54, %v3622_v40 }
 0x3ba   :  { %989 = vmin.xlane.f32.xlu0 %v988_v1  ;;  %v1108_v60 = vsel %vm1107_vm2, %v1103_v50, inf }
 0x3bb   :  { %1109 = vmin.xlane.f32.xlu1 %v1108_v60  ;;  %v3629_v62 = vpop.xlane.xlu0 %970  ;;  %v1052_v60 = vcvt.f32.s32 %v3592_v59 }
 0x3bc   :  { %v3632_v47 = vpop.xlane.xlu1 %1090  ;;  %vm972_vm0 = vcmp.eq.f32.partialorder %v3503_v5, %v3629_v62  ;;  %v1028_v5 = vcvt.s32.f32 %v1026_v13  ;;  %v977_v43 = vcvt.f32.s32 %v3629_v62 }
 0x3bd   :  { %v973_v24 = vsel %vm972_vm0, %v968_v17, inf  ;;  %vm1092_vm1 = vcmp.eq.f32.partialorder %v3509_v16, %v3632_v47 }
 0x3be   :  { %974 = vmin.xlane.f32.xlu0 %v973_v24  ;;  %v1093_v54 = vsel %vm1092_vm1, %v1088_v45, inf  ;;  %v962_v45 = vcvt.f32.s32 %v3599_v55  ;;  %v978_v3 = vshll.u32 %v977_v43, 16 }
 0x3bf   :  { %1094 = vmin.xlane.f32.xlu1 %v1093_v54  ;;  %v3639_v28 = vpop.xlane.xlu0 %910  ;;  %v1053_v54 = vshll.u32 %v1052_v60, 16 }
 0x3c0   :  { %v3642_v27 = vpop.xlane.xlu1 %1030  ;;  %vm912_vm2 = vcmp.eq.f32.partialorder %v3533_v10, %v3639_v28  ;;  %v1013_v10 = vcvt.s32.f32 %v1011_v22 }
 0x3c1   :  { %v913_v46 = vsel %vm912_vm2, %v908_v39, inf  ;;  %vm1032_vm0 = vcmp.eq.f32.partialorder %v3539_v19, %v3642_v27 }
 0x3c2   :  { %914 = vmin.xlane.f32.xlu0 %v913_v46  ;;  %v1033_v16 = vsel %vm1032_vm0, %v1028_v5, inf  ;;  %v963_v46 = vshll.u32 %v962_v45, 16 }
 0x3c3   :  { %1034 = vmin.xlane.f32.xlu1 %v1033_v16  ;;  %v3649_v30 = vpop.xlane.xlu0 %895 }
 0x3c4   :  { %v3652_v32 = vpop.xlane.xlu1 %1015  ;;  %vm897_vm1 = vcmp.eq.f32.partialorder %v3563_v11, %v3649_v30  ;;  %v902_v36 = vcvt.f32.s32 %v3649_v30 }
 0x3c5   :  { %v898_v61 = vsel %vm897_vm1, %v893_v29, inf  ;;  %vm1017_vm2 = vcmp.eq.f32.partialorder %v3569_v6, %v3652_v32  ;;  %v932_v6 = vcvt.f32.s32 %v3589_v42  ;;  %v1067_v29 = vcvt.f32.s32 %v3612_v57 }
 0x3c6   :  { %899 = vmin.xlane.f32.xlu0 %v898_v61  ;;  %v1018_v19 = vsel %vm1017_vm2, %v1013_v10, inf  ;;  %v903_v63 = vshll.u32 %v902_v36, 16 }
 0x3c7   :  { %1019 = vmin.xlane.f32.xlu1 %v1018_v19  ;;  %v3659_v50 = vpop.xlane.xlu0 %880  ;;  %v933_v34 = vshll.u32 %v932_v6, 16  ;;  %v1112_v6 = vcvt.f32.s32 %v3622_v40 }
 0x3c8   :  { %v3661_v1 = vpop.xlane.xlu1 %1000  ;;  %vm882_vm0 = vcmp.eq.f32.partialorder %v3581_v15, %v3659_v50  ;;  %v1082_v15 = vcvt.f32.s32 %v3602_v14 }
 0x3c9   :  { %v883_v11 = vsel %vm882_vm0, %v878_v23, inf  ;;  %vm1002_vm15 = vcmp.eq.f32.partialorder %v3583_v7, %v3661_v1  ;;  %v947_v7 = vcvt.f32.s32 %v3609_v18  ;;  %v992_v23 = vcvt.f32.s32 %v3619_v12 }
 0x3ca   :  { %884 = vmin.xlane.f32.xlu0 %v883_v11  ;;  %v1003_v41 = vsel %vm1002_vm15, %v998_v33, inf  ;;  %v1083_v59 = vshll.u32 %v1082_v15, 16  ;;  %v1113_v62 = vshll.u32 %v1112_v6, 16 }
 0x3cb   :  { %1004 = vmin.xlane.f32.xlu1 %v1003_v41  ;;  %v948_v48 = vshll.u32 %v947_v7, 16  ;;  %v1068_v41 = vshll.u32 %v1067_v29, 16  ;;  %v993_v15 = vshll.u32 %v992_v23, 16  ;;  %v1097_v7 = vcvt.f32.s32 %v3632_v47 }
 0x437   :  { %v930_v17 = vpop.xlane.xlu0 %929 }
 0x438   :  { %v931_v13 = vcvt.f32.s32 %v930_v17  ;;  %v1050_v24 = vpop.xlane.xlu1 %1049 }
 0x439   :  { %v1051_v39 = vcvt.f32.s32 %v1050_v24 }
 0x43a   :  { %v934_v8 = vadd.s32 %v933_v34, %v931_v13 }
 0x43b   :  { %v1054_v5 = vadd.s32 %v1053_v54, %v1051_v39  ;;  %v960_v22 = vpop.xlane.xlu0 %959 }
 0x43c   :  { %v961_v16 = vcvt.f32.s32 %v960_v22  ;;  %v1080_v42 = vpop.xlane.xlu1 %1079  ;;  %vm1118_vm15 = vcmp.eq.s32.totalorder %v3175_v37, %v934_v8 }
 0x43d   :  { %v1081_v55 = vcvt.f32.s32 %v1080_v42  ;;  %vm3677_vm1 = vmand %vm846_vm4, %vm1118_vm15  ;;  %vm1126_vm2 = vcmp.eq.s32.totalorder %v3175_v37, %v1054_v5 }
 0x43e   :  { %v964_v18 = vadd.s32 %v963_v46, %v961_v16  ;;  %v3685_v9 = vsel %vm3677_vm1, -1.0, %v3269_v35  ;;  %vm3690_vm0 = vmand %vm854_vm5, %vm1126_vm2 }
 0x43f   :  { %v1084_v10 = vadd.s32 %v1083_v59, %v1081_v55  ;;  %v945_v25 = vpop.xlane.xlu0 %944  ;;  %v1188_v61 = vsel %vm5521_vm3, %v3685_v9, -inf  ;;  %v3699_v19 = vsel %vm3690_vm0, -1.0, %v3271_v38 }
 0x440   :  { %v946_v33 = vcvt.f32.s32 %v945_v25  ;;  %v1065_v11 = vpop.xlane.xlu1 %1064  ;;  %1189 = vmax.xlane.f32.xlu0 %v1188_v61  ;;  %v1212_v52 = vsel %vm5521_vm3, %v3699_v19, -inf  ;;  %vm1120_vm4 = vcmp.eq.s32.totalorder %v3175_v37, %v964_v18  ;;  %v917_v18 = vcvt.f32.s32 %v3639_v28 }
 0x441   :  { %v1066_v60 = vcvt.f32.s32 %v1065_v11  ;;  %1213 = vmax.xlane.f32.xlu1 %v1212_v52  ;;  %vm3709_vm5 = vmand %vm848_vm6, %vm1120_vm4  ;;  %vm1128_vm15 = vcmp.eq.s32.totalorder %v3175_v37, %v1084_v10  ;;  %v1098_v25 = vshll.u32 %v1097_v7, 16  ;;  %v1037_v61 = vcvt.f32.s32 %v3642_v27 }
 0x442   :  { %v949_v12 = vadd.s32 %v948_v48, %v946_v33  ;;  %v3717_v34 = vsel %vm3709_vm5, -1.0, %v3276_v44  ;;  %vm3722_vm2 = vmand %vm856_vm7, %vm1128_vm15 }
 0x443   :  { %v1069_v45 = vadd.s32 %v1068_v41, %v1066_v60  ;;  %v990_v13 = vpop.xlane.xlu0 %989  ;;  %v1194_v24 = vsel %vm5521_vm3, %v3717_v34, -inf  ;;  %v3732_v54 = vsel %vm3722_vm2, -1.0, %v3281_v31  ;;  %v1038_v30 = vshll.u32 %v1037_v61, 16  ;;  %v5728_v61 = vld [vmem:[#allocation35_spill] sm:$0xff] }
 0x444   :  { %v991_v39 = vcvt.f32.s32 %v990_v13  ;;  %v1110_v8 = vpop.xlane.xlu1 %1109  ;;  %1195 = vmax.xlane.f32.xlu0 %v1194_v24  ;;  %v1218_v4 = vsel %vm5521_vm3, %v3732_v54, -inf  ;;  %vm1119_vm6 = vcmp.eq.s32.totalorder %v3175_v37, %v949_v12  ;;  %v918_v12 = vshll.u32 %v917_v18, 16 }
 0x445   :  { %v1111_v5 = vcvt.f32.s32 %v1110_v8  ;;  %1219 = vmax.xlane.f32.xlu1 %v1218_v4  ;;  %vm3741_vm7 = vmand %vm847_vm8, %vm1119_vm6  ;;  %vm1127_vm4 = vcmp.eq.s32.totalorder %v3175_v37, %v1069_v45  ;;  %v1022_v13 = vcvt.f32.s32 %v3652_v32  ;;  %v5720_v32 = vmov 0 }
 0x446   :  { %v994_v46 = vadd.s32 %v993_v15, %v991_v39  ;;  %v3749_v16 = vsel %vm3741_vm7, -1.0, %v3286_v51  ;;  %vm3754_vm15 = vmand %vm855_vm9, %vm1127_vm4 }
 0x447   :  { %v1114_v42 = vadd.s32 %v1113_v62, %v1111_v5  ;;  %v975_v59 = vpop.xlane.xlu0 %974  ;;  %v1191_v29 = vsel %vm5521_vm3, %v3749_v16, -inf  ;;  %v3763_v55 = vsel %vm3754_vm15, -1.0, %v3291_v56 }
 0x448   :  { %5710 = vst [vmem:[#allocation40_spill] sm:$0xff] %v3763_v55  ;;  %v976_v48 = vcvt.f32.s32 %v975_v59  ;;  %v1095_v10 = vpop.xlane.xlu1 %1094  ;;  %1192 = vmax.xlane.f32.xlu0 %v1191_v29  ;;  %v1215_v26 = vsel %vm5521_vm3, %v3763_v55, -inf  ;;  %vm1122_vm8 = vcmp.eq.s32.totalorder %v3175_v37, %v994_v46  ;;  %v887_v46 = vcvt.f32.s32 %v3659_v50 }
 0x449   :  { %v1096_v23 = vcvt.f32.s32 %v1095_v10  ;;  %1216 = vmax.xlane.f32.xlu1 %v1215_v26  ;;  %vm3773_vm9 = vmand %vm850_vm10, %vm1122_vm8  ;;  %vm1130_vm6 = vcmp.eq.s32.totalorder %v3175_v37, %v1114_v42  ;;  %v1023_v59 = vshll.u32 %v1022_v13, 16  ;;  %v1007_v29 = vcvt.f32.s32 %v3661_v1  ;;  %v5737_v13 = vld [vmem:[#allocation36_spill] sm:$0xff] }
 0x44a   :  { %v979_v28 = vadd.s32 %v978_v3, %v976_v48  ;;  %v3781_v11 = vsel %vm3773_vm9, -1.0, %v3296_v49  ;;  %vm3786_vm4 = vmand %vm858_vm11, %vm1130_vm6  ;;  %v5724_v10 = vmov 0  ;;  %v5730_v1 = vmov 0 }
 0x44b   :  { %5713 = vst [vmem:[#allocation41_spill] sm:$0xff] %v3781_v11  ;;  %v1099_v52 = vadd.s32 %v1098_v25, %v1096_v23  ;;  %v915_v41 = vpop.xlane.xlu0 %914  ;;  %v1200_v6 = vsel %vm5521_vm3, %v3781_v11, -inf  ;;  %v3796_v60 = vsel %vm3786_vm4, -1.0, %v3301_v0  ;;  %v5727_v25 = vld [vmem:[#allocation29_spill] sm:$0xff] }
 0x44c   :  { %5716 = vst [vmem:[#allocation42_spill] sm:$0xff] %v3796_v60  ;;  %v916_v43 = vcvt.f32.s32 %v915_v41  ;;  %v1035_v45 = vpop.xlane.xlu1 %1034  ;;  %1201 = vmax.xlane.f32.xlu0 %v1200_v6  ;;  %v1224_v53 = vsel %vm5521_vm3, %v3796_v60, -inf  ;;  %vm1121_vm10 = vcmp.eq.s32.totalorder %v3175_v37, %v979_v28  ;;  %v888_v41 = vshll.u32 %v887_v46, 16 }
 0x44d   :  { %v1036_v24 = vcvt.f32.s32 %v1035_v45  ;;  %1225 = vmax.xlane.f32.xlu1 %v1224_v53  ;;  %vm3805_vm11 = vmand %vm849_vm12, %vm1121_vm10  ;;  %vm1129_vm8 = vcmp.eq.s32.totalorder %v3175_v37, %v1099_v52  ;;  %v1008_v45 = vshll.u32 %v1007_v29, 16  ;;  %v5753_v29 = vld [vmem:[#allocation38_spill] sm:$0xff] }
 0x44e   :  { %v919_v39 = vadd.s32 %v918_v12, %v916_v43  ;;  %v3813_v8 = vsel %vm3805_vm11, -1.0, %v3306_v2  ;;  %vm3818_vm6 = vmand %vm857_vm13, %vm1129_vm8  ;;  %vm5729_vm8 = vcmp.eq.f32.partialorder %v5727_v25, %v5728_v61  ;;  %v5760_v61 = vld [vmem:[#allocation39_spill] sm:$0xff] }
 0x44f   :  { %5719 = vst [vmem:[#allocation43_spill] sm:$0xff] %v3813_v8  ;;  %v5721_v32 = vsel %vm3818_vm6, 4294967295, %v5720_v32  ;;  %v1039_v4 = vadd.s32 %v1038_v30, %v1036_v24  ;;  %v900_v62 = vpop.xlane.xlu0 %899  ;;  %v1197_v7 = vsel %vm5521_vm3, %v3813_v8, -inf  ;;  %v3827_v5 = vsel %vm3818_vm6, -1.0, %v3311_v20  ;;  %v5736_v30 = vld [vmem:[#allocation30_spill] sm:$0xff] }
 0x450   :  { %5722 = vst [vmem:[#allocation44_spill] sm:$0xff] %v3827_v5  ;;  %v901_v3 = vcvt.f32.s32 %v900_v62  ;;  %v1020_v42 = vpop.xlane.xlu1 %1019  ;;  %1198 = vmax.xlane.f32.xlu0 %v1197_v7  ;;  %v1221_v58 = vsel %vm5521_vm3, %v3827_v5, -inf  ;;  %vm1117_vm12 = vcmp.eq.s32.totalorder %v3175_v37, %v919_v39  ;;  %v5739_v24 = vmov 0  ;;  %v5744_v62 = vld [vmem:[#allocation37_spill] sm:$0xff] }
 0x451   :  { %v1021_v18 = vcvt.f32.s32 %v1020_v42  ;;  %1222 = vmax.xlane.f32.xlu1 %v1221_v58  ;;  %vm3837_vm13 = vmand %vm845_vm14, %vm1117_vm12  ;;  %vm1125_vm10 = vcmp.eq.s32.totalorder %v3175_v37, %v1039_v4  ;;  %vm5733_vm14 = vcmask 523264   ;;  %v5743_v4 = vld [vmem:[#allocation31_spill] sm:$0xff]  ;;  %v5746_v7 = vmov 0 }
 0x452   :  { %v5725_v10 = vsel %vm3837_vm13, 4294967295, %v5724_v10  ;;  %v904_v50 = vadd.s32 %v903_v63, %v901_v3  ;;  %v3845_v26 = vsel %vm3837_vm13, -1.0, %v3316_v21  ;;  %vm3850_vm3 = vmand %vm5729_vm8, %vm1125_vm10  ;;  %vm5738_vm8 = vcmp.eq.f32.partialorder %v5736_v30, %v5737_v13 }
 0x453   :  { %5726 = vst [vmem:[#allocation34_spill] sm:$0xff] %v3845_v26  ;;  %v5731_v1 = vsel %vm3850_vm3, 4294967295, %v5730_v1  ;;  %v1024_v23 = vadd.s32 %v1023_v59, %v1021_v18  ;;  %v885_v28 = vpop.xlane.xlu0 %884  ;;  %v1185_v36 = vsel %vm5733_vm14, %v3845_v26, -inf  ;;  %v3859_v52 = vsel %vm3850_vm3, -1.0, %v5727_v25  ;;  %vm5735_vm12 = vmmov %vm5733_vm14  ;;  %v5752_v59 = vld [vmem:[#allocation32_spill] sm:$0xff] }
 0x454   :  { %5732 = vst [vmem:[#allocation35_spill] sm:$0xff] %v5731_v1  ;;  %5734 = vst [vmem:[#allocation45_spill] sm:$0xff] %v3859_v52  ;;  %v886_v6 = vcvt.f32.s32 %v885_v28  ;;  %v1005_v12 = vpop.xlane.xlu1 %1004  ;;  %1186 = vmax.xlane.f32.xlu0 %v1185_v36  ;;  %v1209_v43 = vsel %vm5735_vm12, %v3859_v52, -inf  ;;  %vm1116_vm10 = vcmp.eq.s32.totalorder %v3175_v37, %v904_v50  ;;  %vm5745_vm12 = vcmp.eq.f32.partialorder %v5743_v4, %v5744_v62  ;;  %v5759_v50 = vld [vmem:[#allocation33_spill] sm:$0xff] }
 0x455   :  { %v1006_v53 = vcvt.f32.s32 %v1005_v12  ;;  %1210 = vmax.xlane.f32.xlu1 %v1209_v43  ;;  %vm3867_vm14 = vmand %vm5738_vm8, %vm1116_vm10  ;;  %vm1124_vm3 = vcmp.eq.s32.totalorder %v3175_v37, %v1024_v23  ;;  %vm5749_vm10 = vcmask 523264   ;;  %v5755_v18 = vmov 0 }
 0x456   :  { %v5740_v24 = vsel %vm3867_vm14, 4294967295, %v5739_v24  ;;  %v889_v39 = vadd.s32 %v888_v41, %v886_v6  ;;  %v3875_v63 = vsel %vm3867_vm14, -1.0, %v5736_v30  ;;  %vm3880_vm13 = vmand %vm5745_vm12, %vm1124_vm3  ;;  %vm5754_vm3 = vcmp.eq.f32.partialorder %v5752_v59, %v5753_v29 }
 0x457   :  { %5741 = vst [vmem:[#allocation36_spill] sm:$0xff] %v5740_v24  ;;  %5742 = vst [vmem:[#allocation46_spill] sm:$0xff] %v3875_v63  ;;  %v5747_v7 = vsel %vm3880_vm13, 4294967295, %v5746_v7  ;;  %v1009_v46 = vadd.s32 %v1008_v45, %v1006_v53  ;;  %v1182_v3 = vsel %vm5749_vm10, %v3875_v63, -inf  ;;  %v3889_v42 = vsel %vm3880_vm13, -1.0, %v5743_v4 }
 0x458   :  { %5748 = vst [vmem:[#allocation37_spill] sm:$0xff] %v5747_v7  ;;  %5750 = vst [vmem:[#allocation47_spill] sm:$0xff] %v3889_v42  ;;  %1183 = vmax.xlane.f32.xlu0 %v1182_v3  ;;  %vm1115_vm14 = vcmp.eq.s32.totalorder %v3175_v37, %v889_v39  ;;  %v5762_v23 = vmov 0  ;;  %vm5765_vm6 = vcmask 523264  }
 0x459   :  { %vm5751_vm8 = vmmov %vm5749_vm10  ;;  %vm1123_vm10 = vcmp.eq.s32.totalorder %v3175_v37, %v1009_v46 }
 0x45a   :  { %v1206_v58 = vsel %vm5751_vm8, %v3889_v42, -inf  ;;  %vm3897_vm12 = vmand %vm5754_vm3, %vm1115_vm14  ;;  %vm5761_vm8 = vcmp.eq.f32.partialorder %v5759_v50, %v5760_v61 }
 0x45b   :  { %1207 = vmax.xlane.f32.xlu1 %v1206_v58  ;;  %v5756_v18 = vsel %vm3897_vm12, 4294967295, %v5755_v18  ;;  %v3905_v48 = vsel %vm3897_vm12, -1.0, %v5752_v59  ;;  %vm3910_vm13 = vmand %vm5761_vm8, %vm1123_vm10 }
 0x45c   :  { %5757 = vst [vmem:[#allocation38_spill] sm:$0xff] %v5756_v18  ;;  %5758 = vst [vmem:[#allocation48_spill] sm:$0xff] %v3905_v48  ;;  %v5763_v23 = vsel %vm3910_vm13, 4294967295, %v5762_v23  ;;  %v1179_v28 = vsel %vm5765_vm6, %v3905_v48, -inf  ;;  %v3919_v36 = vsel %vm3910_vm13, -1.0, %v5759_v50 }
 0x45d   :  { %5764 = vst [vmem:[#allocation39_spill] sm:$0xff] %v5763_v23  ;;  %5766 = vst [vmem:[#allocation49_spill] sm:$0xff] %v3919_v36  ;;  %1180 = vmax.xlane.f32.xlu0 %v1179_v28 }
 0x45e   :  { %vm5767_vm14 = vmmov %vm5765_vm6 }
 0x45f   :  { %v1203_v41 = vsel %vm5767_vm14, %v3919_v36, -inf  ;;  %vm5768_vm10 = vmmov %vm5767_vm14 }
 0x460   :  { %1204 = vmax.xlane.f32.xlu1 %v1203_v41  ;;  %vm5769_vm8 = vmmov %vm5768_vm10 }
 0x4c9   :  { %v3923_v6 = vpop.xlane.xlu0 %1189 }
 0x4ca   :  { %vm1230_vm3 = vcmp.eq.f32.partialorder %v3685_v9, %v3923_v6  ;;  %v3927_v12 = vpop.xlane.xlu1 %1213 }
 0x4cb   :  { %v1246_v43 = vsel %vm1230_vm3, %v3175_v37, 64  ;;  %vm5529_vm6 = vcmp.eq.f32.partialorder %v3699_v19, %v3927_v12 }
 0x4cc   :  { %v1254_v45 = vsel %vm5529_vm6, %v3175_v37, 64  ;;  %v3940_v53 = vsel %vm5768_vm10, %v1246_v43, 2147483647 }
 0x4cd   :  { %v3942_v13 = vpop.xlane.xlu0 %1195  ;;  %v1306_v39 = vshra.s32 %v3940_v53, 16  ;;  %v3946_v62 = vsel %vm5769_vm8, %v1254_v45, 2147483647 }
 0x4ce   :  { %vm5527_vm14 = vcmp.eq.f32.partialorder %v3717_v34, %v3942_v13  ;;  %v3950_v46 = vpop.xlane.xlu1 %1219  ;;  %v1426_v3 = vshra.s32 %v3946_v62, 16 }
 0x4cf   :  { %v1248_v58 = vsel %vm5527_vm14, %v3175_v37, 64  ;;  %vm5537_vm10 = vcmp.eq.f32.partialorder %v3732_v54, %v3950_v46  ;;  %v3959_v29 = vcvt.s32.f32 %v1306_v39  ;;  %vm5770_vm14 = vmmov %vm5769_vm8 }
 0x4d0   :  { %v1256_v61 = vsel %vm5537_vm10, %v3175_v37, 64  ;;  %v3965_v28 = vcvt.s32.f32 %v1426_v3  ;;  %v3968_v41 = vsel %vm5769_vm8, %v1248_v58, 2147483647 }
 0x4d1   :  { %1309 = vmin.xlane.f32.xlu0 %v3959_v29  ;;  %v3971_v43 = vpop.xlane.xlu0 %1192  ;;  %v1336_v45 = vshra.s32 %v3968_v41, 16  ;;  %v3975_v50 = vsel %vm5770_vm14, %v1256_v61, 2147483647 }
 0x4d2   :  { %vm5535_vm6 = vcmp.eq.f32.partialorder %v3749_v16, %v3971_v43  ;;  %1429 = vmin.xlane.f32.xlu1 %v3965_v28  ;;  %v3980_v39 = vpop.xlane.xlu1 %1216  ;;  %v1456_v3 = vshra.s32 %v3975_v50, 16 }
 0x4d3   :  { %5771 = vst [vmem:[#allocation50_spill] sm:$0xff] %v3980_v39  ;;  %v1247_v58 = vsel %vm5535_vm6, %v3175_v37, 64  ;;  %vm5545_vm8 = vcmp.eq.f32.partialorder %v3763_v55, %v3980_v39  ;;  %v3989_v59 = vcvt.s32.f32 %v1336_v45  ;;  %vm5773_vm6 = vmmov %vm5770_vm14 }
 0x4d4   :  { %v1255_v61 = vsel %vm5545_vm8, %v3175_v37, 64  ;;  %v3995_v4 = vcvt.s32.f32 %v1456_v3  ;;  %v3998_v30 = vsel %vm5770_vm14, %v1247_v58, 2147483647 }
 0x4d5   :  { %1339 = vmin.xlane.f32.xlu0 %v3989_v59  ;;  %v4001_v25 = vpop.xlane.xlu0 %1201  ;;  %v1321_v21 = vshra.s32 %v3998_v30, 16  ;;  %v4005_v20 = vsel %vm5773_vm6, %v1255_v61, 2147483647 }
 0x4d6   :  { %5772 = vst [vmem:[#allocation51_spill] sm:$0xff] %v4001_v25  ;;  %vm5543_vm10 = vcmp.eq.f32.partialorder %v3781_v11, %v4001_v25  ;;  %1459 = vmin.xlane.f32.xlu1 %v3995_v4  ;;  %v4010_v45 = vpop.xlane.xlu1 %1225  ;;  %v1441_v3 = vshra.s32 %v4005_v20, 16  ;;  %v1455_v11 = vand.u32 65535, %v3975_v50  ;;  %v1440_v50 = vand.u32 65535, %v4005_v20 }
 0x4d7   :  { %5774 = vst [vmem:[#allocation52_spill] sm:$0xff] %v4010_v45  ;;  %v1250_v58 = vsel %vm5543_vm10, %v3175_v37, 64  ;;  %vm5553_vm14 = vcmp.eq.f32.partialorder %v3796_v60, %v4010_v45  ;;  %v4019_v2 = vcvt.s32.f32 %v1321_v21  ;;  %vm5776_vm10 = vmmov %vm5773_vm6 }
 0x4d8   :  { %v1258_v61 = vsel %vm5553_vm14, %v3175_v37, 64  ;;  %v4025_v0 = vcvt.s32.f32 %v1441_v3  ;;  %v4028_v49 = vsel %vm5773_vm6, %v1250_v58, 2147483647 }
 0x4d9   :  { %1324 = vmin.xlane.f32.xlu0 %v4019_v2  ;;  %v4031_v56 = vpop.xlane.xlu0 %1198  ;;  %v1366_v51 = vshra.s32 %v4028_v49, 16  ;;  %v4035_v31 = vsel %vm5776_vm10, %v1258_v61, 2147483647 }
 0x4da   :  { %5775 = vst [vmem:[#allocation53_spill] sm:$0xff] %v4031_v56  ;;  %vm5551_vm8 = vcmp.eq.f32.partialorder %v3813_v8, %v4031_v56  ;;  %1444 = vmin.xlane.f32.xlu1 %v4025_v0  ;;  %v4040_v21 = vpop.xlane.xlu1 %1222  ;;  %v1486_v3 = vshra.s32 %v4035_v31, 16  ;;  %v1485_v20 = vand.u32 65535, %v4035_v31 }
 0x4db   :  { %5777 = vst [vmem:[#allocation54_spill] sm:$0xff] %v4040_v21  ;;  %v1249_v58 = vsel %vm5551_vm8, %v3175_v37, 64  ;;  %vm5563_vm6 = vcmp.eq.f32.partialorder %v3827_v5, %v4040_v21  ;;  %v4049_v44 = vcvt.s32.f32 %v1366_v51  ;;  %vm5779_vm8 = vmmov %vm5776_vm10 }
 0x4dc   :  { %v1257_v61 = vsel %vm5563_vm6, %v3175_v37, 64  ;;  %v4055_v38 = vcvt.s32.f32 %v1486_v3  ;;  %v4058_v35 = vsel %vm5776_vm10, %v1249_v58, 2147483647 }
 0x4dd   :  { %1369 = vmin.xlane.f32.xlu0 %v4049_v44  ;;  %v4061_v23 = vpop.xlane.xlu0 %1186  ;;  %v1351_v18 = vshra.s32 %v4058_v35, 16  ;;  %v4065_v7 = vsel %vm5779_vm8, %v1257_v61, 2147483647 }
 0x4de   :  { %5778 = vst [vmem:[#allocation55_spill] sm:$0xff] %v4061_v23  ;;  %vm5560_vm14 = vcmp.eq.f32.partialorder %v3845_v26, %v4061_v23  ;;  %1489 = vmin.xlane.f32.xlu1 %v4055_v38  ;;  %v4070_v51 = vpop.xlane.xlu1 %1210  ;;  %v1471_v3 = vshra.s32 %v4065_v7, 16  ;;  %v1470_v31 = vand.u32 65535, %v4065_v7 }
 0x4df   :  { %5780 = vst [vmem:[#allocation56_spill] sm:$0xff] %v4070_v51  ;;  %v1245_v58 = vsel %vm5560_vm14, %v3175_v37, 64  ;;  %vm5574_vm10 = vcmp.eq.f32.partialorder %v3859_v52, %v4070_v51  ;;  %v4079_v24 = vcvt.s32.f32 %v1351_v18  ;;  %vm5782_vm14 = vmmov %vm5779_vm8 }
 0x4e0   :  { %v1253_v61 = vsel %vm5574_vm10, %v3175_v37, 64  ;;  %v4085_v1 = vcvt.s32.f32 %v1471_v3  ;;  %v4088_v21 = vsel %vm5779_vm8, %v1245_v58, 2147483647 }
 0x4e1   :  { %1354 = vmin.xlane.f32.xlu0 %v4079_v24  ;;  %v4091_v5 = vpop.xlane.xlu0 %1183  ;;  %v1291_v23 = vshra.s32 %v4088_v21, 16  ;;  %v4095_v26 = vsel %vm5782_vm14, %v1253_v61, 2147483647 }
 0x4e2   :  { %5781 = vst [vmem:[#allocation57_spill] sm:$0xff] %v4091_v5  ;;  %vm5571_vm6 = vcmp.eq.f32.partialorder %v3875_v63, %v4091_v5  ;;  %1474 = vmin.xlane.f32.xlu1 %v4085_v1  ;;  %v1411_v3 = vshra.s32 %v4095_v26, 16  ;;  %v1410_v7 = vand.u32 65535, %v4095_v26 }
 0x4e3   :  { %v1244_v58 = vsel %vm5571_vm6, %v3175_v37, 64  ;;  %v4109_v51 = vcvt.s32.f32 %v1291_v23  ;;  %vm5785_vm6 = vmmov %vm5782_vm14 }
 0x4e4   :  { %v4100_v18 = vpop.xlane.xlu1 %1207  ;;  %v4115_v52 = vcvt.s32.f32 %v1411_v3  ;;  %v4118_v56 = vsel %vm5782_vm14, %v1244_v58, 2147483647 }
 0x4e5   :  { %5783 = vst [vmem:[#allocation58_spill] sm:$0xff] %v4100_v18  ;;  %vm5579_vm8 = vcmp.eq.f32.partialorder %v3889_v42, %v4100_v18  ;;  %1294 = vmin.xlane.f32.xlu0 %v4109_v51  ;;  %v1276_v5 = vshra.s32 %v4118_v56, 16 }
 0x4e6   :  { %v1252_v61 = vsel %vm5579_vm8, %v3175_v37, 64  ;;  %v4121_v8 = vpop.xlane.xlu0 %1180  ;;  %1414 = vmin.xlane.f32.xlu1 %v4115_v52  ;;  %vm5787_vm8 = vmmov %vm5785_vm6 }
 0x4e7   :  { %5784 = vst [vmem:[#allocation59_spill] sm:$0xff] %v4121_v8  ;;  %v4125_v63 = vsel %vm5785_vm6, %v1252_v61, 2147483647  ;;  %vm5595_vm10 = vcmp.eq.f32.partialorder %v3905_v48, %v4121_v8  ;;  %v4139_v18 = vcvt.s32.f32 %v1276_v5 }
 0x4e8   :  { %v1396_v3 = vshra.s32 %v4125_v63, 16  ;;  %v1243_v58 = vsel %vm5595_vm10, %v3175_v37, 64  ;;  %v1395_v26 = vand.u32 65535, %v4125_v63 }
 0x4e9   :  { %v4130_v23 = vpop.xlane.xlu1 %1204  ;;  %v4142_v61 = vsel %vm5785_vm6, %v1243_v58, 2147483647  ;;  %1279 = vmin.xlane.f32.xlu0 %v4139_v18 }
 0x4ea   :  { %5786 = vst [vmem:[#allocation60_spill] sm:$0xff] %v4130_v23  ;;  %vm5592_vm14 = vcmp.eq.f32.partialorder %v3919_v36, %v4130_v23  ;;  %v4148_v45 = vcvt.s32.f32 %v1396_v3  ;;  %v1261_v8 = vshra.s32 %v4142_v61, 16  ;;  %v1305_v3 = vand.u32 65535, %v3940_v53 }
 0x4eb   :  { %v1251_v42 = vsel %vm5592_vm14, %v3175_v37, 64  ;;  %v1335_v23 = vand.u32 65535, %v3968_v41 }
 0x4ec   :  { %v4151_v60 = vsel %vm5787_vm8, %v1251_v42, 2147483647  ;;  %1399 = vmin.xlane.f32.xlu1 %v4148_v45  ;;  %v4157_v58 = vcvt.s32.f32 %v1261_v8  ;;  %v1425_v42 = vand.u32 65535, %v3946_v62  ;;  %v1307_v25 = vcvt.s32.f32 %v1305_v3 }
 0x4ed   :  { %v1381_v5 = vshra.s32 %v4151_v60, 16  ;;  %v1320_v62 = vand.u32 65535, %v3998_v30  ;;  %v1337_v3 = vcvt.s32.f32 %v1335_v23  ;;  %v1365_v30 = vand.u32 65535, %v4028_v49 }
 0x4ee   :  { %1264 = vmin.xlane.f32.xlu0 %v4157_v58  ;;  %v1427_v8 = vcvt.s32.f32 %v1425_v42  ;;  %v1350_v49 = vand.u32 65535, %v4058_v35  ;;  %v1290_v35 = vand.u32 65535, %v4088_v21  ;;  %v1275_v21 = vand.u32 65535, %v4118_v56 }
 0x4ef   :  { %v4159_v48 = vcvt.s32.f32 %v1381_v5  ;;  %v1322_v23 = vcvt.s32.f32 %v1320_v62  ;;  %v1487_v62 = vcvt.s32.f32 %v1485_v20  ;;  %v1412_v20 = vcvt.s32.f32 %v1410_v7 }
 0x4f0   :  { %v1260_v56 = vand.u32 65535, %v4142_v61  ;;  %v1380_v63 = vand.u32 65535, %v4151_v60 }
 0x4f1   :  { %1384 = vmin.xlane.f32.xlu1 %v4159_v48 }
 0x55a   :  { %v4166_v36 = vpop.xlane.xlu0 %1309 }
 0x55b   :  { %v4169_v39 = vpop.xlane.xlu1 %1429  ;;  %vm1311_vm8 = vcmp.eq.f32.partialorder %v3959_v29, %v4166_v36  ;;  %v1457_v29 = vcvt.s32.f32 %v1455_v11  ;;  %v1442_v11 = vcvt.s32.f32 %v1440_v50 }
 0x55c   :  { %v1312_v5 = vsel %vm1311_vm8, %v1307_v25, inf  ;;  %vm1431_vm6 = vcmp.eq.f32.partialorder %v3965_v28, %v4169_v39 }
 0x55d   :  { %1313 = vmin.xlane.f32.xlu0 %v1312_v5  ;;  %v1432_v53 = vsel %vm1431_vm6, %v1427_v8, inf }
 0x55e   :  { %1433 = vmin.xlane.f32.xlu1 %v1432_v53  ;;  %v4176_v41 = vpop.xlane.xlu0 %1339  ;;  %v1367_v53 = vcvt.s32.f32 %v1365_v30 }
 0x55f   :  { %vm1341_vm14 = vcmp.eq.f32.partialorder %v3989_v59, %v4176_v41  ;;  %v4181_v55 = vpop.xlane.xlu1 %1459  ;;  %v1346_v14 = vcvt.f32.s32 %v4176_v41 }
 0x560   :  { %vm1461_vm8 = vcmp.eq.f32.partialorder %v3995_v4, %v4181_v55  ;;  %v1342_v25 = vsel %vm1341_vm14, %v1337_v3, inf  ;;  %v1466_v17 = vcvt.f32.s32 %v4181_v55 }
 0x561   :  { %1343 = vmin.xlane.f32.xlu0 %v1342_v25  ;;  %v1462_v28 = vsel %vm1461_vm8, %v1457_v29, inf  ;;  %v1352_v29 = vcvt.s32.f32 %v1350_v49  ;;  %v1472_v25 = vcvt.s32.f32 %v1470_v31  ;;  %v1397_v49 = vcvt.s32.f32 %v1395_v26 }
 0x562   :  { %1463 = vmin.xlane.f32.xlu1 %v1462_v28  ;;  %v4186_v42 = vpop.xlane.xlu0 %1324  ;;  %v1262_v31 = vcvt.s32.f32 %v1260_v56  ;;  %v1347_v27 = vshll.u32 %v1346_v14, 16  ;;  %v1467_v15 = vshll.u32 %v1466_v17, 16 }
 0x563   :  { %vm1326_vm6 = vcmp.eq.f32.partialorder %v4019_v2, %v4186_v42  ;;  %v4191_v59 = vpop.xlane.xlu1 %1444 }
 0x564   :  { %vm1446_vm10 = vcmp.eq.f32.partialorder %v4025_v0, %v4191_v59  ;;  %v1327_v4 = vsel %vm1326_vm6, %v1322_v23, inf  ;;  %v1292_v23 = vcvt.s32.f32 %v1290_v35  ;;  %v2928_v35 = vmov 0.0  }
 0x565   :  { %1328 = vmin.xlane.f32.xlu0 %v1327_v4  ;;  %v1447_v8 = vsel %vm1446_vm10, %v1442_v11, inf  ;;  %v4269_v57 = vsel %vm3741_vm7, 1.0, %v2928_v35  ;;  %v4275_v40 = vsel %vm3754_vm15, 1.0, %v2928_v35  ;;  %v4280_v41 = vsel %vm3773_vm9, 1.0, %v2928_v35 }
 0x566   :  { %1448 = vmin.xlane.f32.xlu1 %v1447_v8  ;;  %v4196_v5 = vpop.xlane.xlu0 %1369  ;;  %v1277_v8 = vcvt.s32.f32 %v1275_v21  ;;  %5788 = vst [vmem:[#allocation61_spill] sm:$0xff] %v4275_v40  ;;  %5789 = vst [vmem:[#allocation62_spill] sm:$0xff] %v4280_v41  ;;  %v4286_v22 = vsel %vm3786_vm4, 1.0, %v2928_v35  ;;  %v4291_v55 = vsel %vm3805_vm11, 1.0, %v2928_v35  ;;  %v1451_v56 = vcvt.f32.s32 %v4191_v59 }
 0x567   :  { %vm1371_vm14 = vcmp.eq.f32.partialorder %v4049_v44, %v4196_v5  ;;  %v4201_v2 = vpop.xlane.xlu1 %1489  ;;  %5790 = vst [vmem:[#allocation63_spill] sm:$0xff] %v4286_v22  ;;  %5791 = vst [vmem:[#allocation64_spill] sm:$0xff] %v4291_v55  ;;  %vm5798_vm15 = vcmp.eq.f32.partialorder %v3699_v19, %v3927_v12  ;;  %vm5801_vm4 = vcmask 523264   ;;  %v1376_v12 = vcvt.f32.s32 %v4196_v5 }
 0x568   :  { %vm1491_vm8 = vcmp.eq.f32.partialorder %v4055_v38, %v4201_v2  ;;  %v1372_v0 = vsel %vm1371_vm14, %v1367_v53, inf }
 0x569   :  { %1373 = vmin.xlane.f32.xlu0 %v1372_v0  ;;  %v1492_v3 = vsel %vm1491_vm8, %v1487_v62, inf  ;;  %v1382_v62 = vcvt.s32.f32 %v1380_v63 }
 0x56a   :  { %1493 = vmin.xlane.f32.xlu1 %v1492_v3  ;;  %v4206_v50 = vpop.xlane.xlu0 %1354  ;;  %v1436_v3 = vcvt.f32.s32 %v4169_v39 }
 0x56b   :  { %vm1356_vm10 = vcmp.eq.f32.partialorder %v4079_v24, %v4206_v50  ;;  %v4211_v44 = vpop.xlane.xlu1 %1474 }
 0x56c   :  { %vm1476_vm6 = vcmp.eq.f32.partialorder %v4085_v1, %v4211_v44  ;;  %v1357_v38 = vsel %vm1356_vm10, %v1352_v29, inf  ;;  %v4248_v29 = vsel %vm3677_vm1, 1.0, %v2928_v35  ;;  %vm5792_vm1 = vnez %v5721_v32 }
 0x56d   :  { %1358 = vmin.xlane.f32.xlu0 %v1357_v38  ;;  %v1477_v28 = vsel %vm1476_vm6, %v1472_v25, inf  ;;  %v4296_v47 = vsel %vm5792_vm1, 1.0, %v2928_v35 }
 0x56e   :  { %1478 = vmin.xlane.f32.xlu1 %v1477_v28  ;;  %v4216_v30 = vpop.xlane.xlu0 %1294  ;;  %v1437_v28 = vshll.u32 %v1436_v3, 16  ;;  %5793 = vst [vmem:[#allocation65_spill] sm:$0xff] %v4296_v47  ;;  %v1452_v3 = vshll.u32 %v1451_v56, 16  ;;  %v5814_v56 = vld [vmem:[#allocation40_spill] sm:$0xff] }
 0x56f   :  { %vm1296_vm14 = vcmp.eq.f32.partialorder %v4109_v51, %v4216_v30  ;;  %v4221_v24 = vpop.xlane.xlu1 %1414 }
 0x570   :  { %vm1416_vm8 = vcmp.eq.f32.partialorder %v4115_v52, %v4221_v24  ;;  %v1297_v1 = vsel %vm1296_vm14, %v1292_v23, inf  ;;  %v1331_v23 = vcvt.f32.s32 %v4186_v42 }
 0x571   :  { %1298 = vmin.xlane.f32.xlu0 %v1297_v1  ;;  %v1417_v11 = vsel %vm1416_vm8, %v1412_v20, inf }
 0x572   :  { %1418 = vmin.xlane.f32.xlu1 %v1417_v11  ;;  %v4226_v4 = vpop.xlane.xlu0 %1279 }
 0x573   :  { %vm1281_vm10 = vcmp.eq.f32.partialorder %v4139_v18, %v4226_v4 }
 0x574   :  { %v1282_v52 = vsel %vm1281_vm10, %v1277_v8, inf }
 0x575   :  { %v4231_v51 = vpop.xlane.xlu1 %1399  ;;  %1283 = vmin.xlane.f32.xlu0 %v1282_v52 }
 0x576   :  { %vm1401_vm6 = vcmp.eq.f32.partialorder %v4148_v45, %v4231_v51  ;;  %v1316_v45 = vcvt.f32.s32 %v4166_v36  ;;  %v4263_v36 = vsel %vm3722_vm2, 1.0, %v2928_v35 }
 0x577   :  { %v1402_v53 = vsel %vm1401_vm6, %v1397_v49, inf  ;;  %v4235_v61 = vpop.xlane.xlu0 %1264  ;;  %vm5803_vm6 = vcmp.eq.f32.partialorder %v3717_v34, %v3942_v13 }
 0x578   :  { %1403 = vmin.xlane.f32.xlu1 %v1402_v53  ;;  %vm1266_vm14 = vcmp.eq.f32.partialorder %v4157_v58, %v4235_v61  ;;  %v4253_v58 = vsel %vm3690_vm0, 1.0, %v2928_v35  ;;  %v1317_v39 = vshll.u32 %v1316_v45, 16  ;;  %vm5794_vm0 = vnez %v5725_v10 }
 0x579   :  { %v1267_v18 = vsel %vm1266_vm14, %v1262_v31, inf  ;;  %v4301_v42 = vsel %vm5794_vm0, 1.0, %v2928_v35  ;;  %v1332_v10 = vshll.u32 %v1331_v23, 16 }
 0x57a   :  { %v4239_v60 = vpop.xlane.xlu1 %1384  ;;  %1268 = vmin.xlane.f32.xlu0 %v1267_v18  ;;  %5795 = vst [vmem:[#allocation66_spill] sm:$0xff] %v4301_v42 }
 0x57b   :  { %vm1386_vm8 = vcmp.eq.f32.partialorder %v4159_v48, %v4239_v60  ;;  %v4258_v48 = vsel %vm3709_vm5, 1.0, %v2928_v35 }
 0x57c   :  { %v1387_v0 = vsel %vm1386_vm8, %v1382_v62, inf  ;;  %vm5806_vm8 = vcmp.eq.f32.partialorder %v3732_v54, %v3950_v46 }
 0x57d   :  { %1388 = vmin.xlane.f32.xlu1 %v1387_v0 }
 0x5e6   :  { %v1314_v7 = vpop.xlane.xlu0 %1313 }
 0x5e7   :  { %v1315_v25 = vcvt.f32.s32 %v1314_v7  ;;  %v1434_v38 = vpop.xlane.xlu1 %1433  ;;  %v1496_v7 = vcvt.f32.s32 %v4201_v2 }
 0x5e8   :  { %v1435_v21 = vcvt.f32.s32 %v1434_v38 }
 0x5e9   :  { %v1318_v26 = vadd.s32 %v1317_v39, %v1315_v25  ;;  %v1361_v39 = vcvt.f32.s32 %v4206_v50 }
 0x5ea   :  { %v1438_v33 = vadd.s32 %v1437_v28, %v1435_v21  ;;  %v1344_v20 = vpop.xlane.xlu0 %1343  ;;  %v1377_v21 = vshll.u32 %v1376_v12, 16 }
 0x5eb   :  { %vm1502_vm5 = vcmp.eq.s32.totalorder %v3175_v37, %v1318_v26  ;;  %v1345_v1 = vcvt.f32.s32 %v1344_v20  ;;  %v1464_v11 = vpop.xlane.xlu1 %1463  ;;  %v1481_v20 = vcvt.f32.s32 %v4211_v44 }
 0x5ec   :  { %vm1510_vm2 = vcmp.eq.s32.totalorder %v3175_v37, %v1438_v33  ;;  %v1465_v32 = vcvt.f32.s32 %v1464_v11  ;;  %vm4309_vm7 = vmand %vm1230_vm3, %vm1502_vm5  ;;  %v1497_v33 = vshll.u32 %v1496_v7, 16 }
 0x5ed   :  { %v1348_v63 = vadd.s32 %v1347_v27, %v1345_v1  ;;  %v4316_v49 = vsel %vm4309_vm7, -1.0, %v3685_v9  ;;  %vm4324_vm9 = vmand %vm5798_vm15, %vm1510_vm2  ;;  %v1362_v1 = vshll.u32 %v1361_v39, 16  ;;  %v5822_v39 = vld [vmem:[#allocation51_spill] sm:$0xff] }
 0x5ee   :  { %v1468_v52 = vadd.s32 %v1467_v15, %v1465_v32  ;;  %v1329_v53 = vpop.xlane.xlu0 %1328  ;;  %v1572_v31 = vsel %vm5801_vm4, %v4316_v49, -inf  ;;  %v4333_v9 = vsel %vm4324_vm9, -1.0, %v3699_v19  ;;  %vm5802_vm3 = vmmov %vm5801_vm4  ;;  %vm5811_vm4 = vcmp.eq.f32.partialorder %v3749_v16, %v3971_v43  ;;  %v5815_v32 = vld [vmem:[#allocation50_spill] sm:$0xff] }
 0x5ef   :  { %vm1504_vm11 = vcmp.eq.s32.totalorder %v3175_v37, %v1348_v63  ;;  %v1330_v18 = vcvt.f32.s32 %v1329_v53  ;;  %v1449_v0 = vpop.xlane.xlu1 %1448  ;;  %1573 = vmax.xlane.f32.xlu0 %v1572_v31  ;;  %v1596_v45 = vsel %vm5802_vm3, %v4333_v9, -inf  ;;  %vm5809_vm0 = vmmov %vm5802_vm3  ;;  %vm5816_vm3 = vcmp.eq.f32.partialorder %v5814_v56, %v5815_v32 }
 0x5f0   :  { %vm1512_vm10 = vcmp.eq.s32.totalorder %v3175_v37, %v1468_v52  ;;  %v1450_v19 = vcvt.f32.s32 %v1449_v0  ;;  %1597 = vmax.xlane.f32.xlu1 %v1596_v45  ;;  %vm4347_vm14 = vmand %vm5803_vm6, %vm1504_vm11  ;;  %v5817_v43 = vmov 0  ;;  %v1301_v31 = vcvt.f32.s32 %v4216_v30 }
 0x5f1   :  { %v1333_v14 = vadd.s32 %v1332_v10, %v1330_v18  ;;  %v4355_v25 = vsel %vm4347_vm14, -1.0, %v3717_v34  ;;  %vm4363_vm1 = vmand %vm5806_vm8, %vm1512_vm10  ;;  %v1482_v45 = vshll.u32 %v1481_v20, 16  ;;  %v5824_v30 = vmov 0 }
 0x5f2   :  { %v1453_v38 = vadd.s32 %v1452_v3, %v1450_v19  ;;  %v1374_v28 = vpop.xlane.xlu0 %1373  ;;  %v1578_v50 = vsel %vm5809_vm0, %v4355_v25, -inf  ;;  %v4372_v34 = vsel %vm4363_vm1, -1.0, %v3732_v54  ;;  %vm5810_vm2 = vmmov %vm5809_vm0  ;;  %v1421_v3 = vcvt.f32.s32 %v4221_v24  ;;  %v5821_v19 = vld [vmem:[#allocation41_spill] sm:$0xff] }
 0x5f3   :  { %vm1503_vm5 = vcmp.eq.s32.totalorder %v3175_v37, %v1333_v14  ;;  %v1375_v46 = vcvt.f32.s32 %v1374_v28  ;;  %v1494_v23 = vpop.xlane.xlu1 %1493  ;;  %1579 = vmax.xlane.f32.xlu0 %v1578_v50  ;;  %v1602_v26 = vsel %vm5810_vm2, %v4372_v34, -inf  ;;  %vm5820_vm6 = vmmov %vm5809_vm0  ;;  %vm5823_vm2 = vcmp.eq.f32.partialorder %v5821_v19, %v5822_v39  ;;  %v5828_v50 = vld [vmem:[#allocation42_spill] sm:$0xff] }
 0x5f4   :  { %vm1511_vm15 = vcmp.eq.s32.totalorder %v3175_v37, %v1453_v38  ;;  %v1495_v54 = vcvt.f32.s32 %v1494_v23  ;;  %1603 = vmax.xlane.f32.xlu1 %v1602_v26  ;;  %vm4385_vm11 = vmand %vm5811_vm4, %vm1503_vm5  ;;  %v1286_v14 = vcvt.f32.s32 %v4226_v4  ;;  %v1422_v32 = vshll.u32 %v1421_v3, 16  ;;  %v5843_v3 = vld [vmem:[#allocation44_spill] sm:$0xff] }
 0x5f5   :  { %v1378_v11 = vadd.s32 %v1377_v21, %v1375_v46  ;;  %v4392_v15 = vsel %vm4385_vm11, -1.0, %v3749_v16  ;;  %vm4400_vm10 = vmand %vm5816_vm3, %vm1511_vm15  ;;  %v5829_v21 = vld [vmem:[#allocation52_spill] sm:$0xff]  ;;  %v5831_v46 = vmov 0 }
 0x5f6   :  { %v5818_v43 = vsel %vm4400_vm10, 4294967295, %v5817_v43  ;;  %v1498_v10 = vadd.s32 %v1497_v33, %v1495_v54  ;;  %v1359_v63 = vpop.xlane.xlu0 %1358  ;;  %v1575_v52 = vsel %vm5820_vm6, %v4392_v15, -inf  ;;  %v4409_v16 = vsel %vm4400_vm10, -1.0, %v5814_v56  ;;  %vm5834_vm6 = vmmov %vm5809_vm0 }
 0x5f7   :  { %5819 = vst [vmem:[#allocation40_spill] sm:$0xff] %v5818_v43  ;;  %vm1506_vm8 = vcmp.eq.s32.totalorder %v3175_v37, %v1378_v11  ;;  %v1360_v12 = vcvt.f32.s32 %v1359_v63  ;;  %v1479_v18 = vpop.xlane.xlu1 %1478  ;;  %1576 = vmax.xlane.f32.xlu0 %v1575_v52  ;;  %v1599_v0 = vsel %vm5809_vm0, %v4409_v16, -inf  ;;  %vm5830_vm4 = vcmp.eq.f32.partialorder %v5828_v50, %v5829_v21  ;;  %v5836_v52 = vld [vmem:[#allocation43_spill] sm:$0xff] }
 0x5f8   :  { %vm1514_vm5 = vcmp.eq.s32.totalorder %v3175_v37, %v1498_v10  ;;  %v1480_v7 = vcvt.f32.s32 %v1479_v18  ;;  %1600 = vmax.xlane.f32.xlu1 %v1599_v0  ;;  %vm4423_vm15 = vmand %vm5823_vm2, %vm1506_vm8  ;;  %v1302_v54 = vshll.u32 %v1301_v31, 16  ;;  %v1406_v10 = vcvt.f32.s32 %v4231_v51 }
 0x5f9   :  { %v5825_v30 = vsel %vm4423_vm15, 4294967295, %v5824_v30  ;;  %v1363_v38 = vadd.s32 %v1362_v1, %v1360_v12  ;;  %v4431_v28 = vsel %vm4423_vm15, -1.0, %v5821_v19  ;;  %vm4439_vm3 = vmand %vm5830_vm4, %vm1514_vm5  ;;  %v5837_v12 = vld [vmem:[#allocation53_spill] sm:$0xff]  ;;  %v5839_v31 = vmov 0 }
 0x5fa   :  { %5826 = vst [vmem:[#allocation50_spill] sm:$0xff] %v5825_v30  ;;  %5827 = vst [vmem:[#allocation41_spill] sm:$0xff] %v4431_v28  ;;  %v5832_v46 = vsel %vm4439_vm3, 4294967295, %v5831_v46  ;;  %v1483_v23 = vadd.s32 %v1482_v45, %v1480_v7  ;;  %v1299_v26 = vpop.xlane.xlu0 %1298  ;;  %v1584_v4 = vsel %vm5834_vm6, %v4431_v28, -inf  ;;  %v4448_v33 = vsel %vm4439_vm3, -1.0, %v5828_v50  ;;  %v5844_v7 = vld [vmem:[#allocation54_spill] sm:$0xff] }
 0x5fb   :  { %5833 = vst [vmem:[#allocation51_spill] sm:$0xff] %v5832_v46  ;;  %5835 = vst [vmem:[#allocation42_spill] sm:$0xff] %v4448_v33  ;;  %vm1505_vm8 = vcmp.eq.s32.totalorder %v3175_v37, %v1363_v38  ;;  %v1300_v1 = vcvt.f32.s32 %v1299_v26  ;;  %v1419_v11 = vpop.xlane.xlu1 %1418  ;;  %1585 = vmax.xlane.f32.xlu0 %v1584_v4  ;;  %v1608_v56 = vsel %vm5809_vm0, %v4448_v33, -inf  ;;  %vm5838_vm2 = vcmp.eq.f32.partialorder %v5836_v52, %v5837_v12 }
 0x5fc   :  { %vm1513_vm5 = vcmp.eq.s32.totalorder %v3175_v37, %v1483_v23  ;;  %v1420_v63 = vcvt.f32.s32 %v1419_v11  ;;  %1609 = vmax.xlane.f32.xlu1 %v1608_v56  ;;  %vm4461_vm4 = vmand %vm5838_vm2, %vm1505_vm8  ;;  %v1287_v18 = vshll.u32 %v1286_v14, 16  ;;  %vm5845_vm6 = vcmp.eq.f32.partialorder %v5843_v3, %v5844_v7  ;;  %v5863_v7 = vld [vmem:[#allocation56_spill] sm:$0xff] }
 0x5fd   :  { %v5840_v31 = vsel %vm4461_vm4, 4294967295, %v5839_v31  ;;  %v1303_v0 = vadd.s32 %v1302_v54, %v1300_v1  ;;  %v4468_v45 = vsel %vm4461_vm4, -1.0, %v5836_v52  ;;  %vm4476_vm0 = vmand %vm5845_vm6, %vm1513_vm5  ;;  %v5846_v19 = vmov 0  ;;  %v5858_v52 = vld [vmem:[#allocation35_spill] sm:$0xff] }
 0x5fe   :  { %5841 = vst [vmem:[#allocation52_spill] sm:$0xff] %v5840_v31  ;;  %5842 = vst [vmem:[#allocation43_spill] sm:$0xff] %v4468_v45  ;;  %v5847_v19 = vsel %vm4476_vm0, 4294967295, %v5846_v19  ;;  %v1423_v39 = vadd.s32 %v1422_v32, %v1420_v63  ;;  %v1284_v38 = vpop.xlane.xlu0 %1283  ;;  %vm5849_vm8 = vcmask 523264   ;;  %v4485_v50 = vsel %vm4476_vm0, -1.0, %v5843_v3  ;;  %v5852_v32 = vld [vmem:[#allocation34_spill] sm:$0xff] }
 0x5ff   :  { %5848 = vst [vmem:[#allocation53_spill] sm:$0xff] %v5847_v19  ;;  %v1581_v14 = vsel %vm5849_vm8, %v4468_v45, -inf  ;;  %5850 = vst [vmem:[#allocation44_spill] sm:$0xff] %v4485_v50  ;;  %v1271_v23 = vcvt.f32.s32 %v4235_v61  ;;  %vm1501_vm5 = vcmp.eq.s32.totalorder %v3175_v37, %v1303_v0  ;;  %v1285_v26 = vcvt.f32.s32 %v1284_v38  ;;  %v5853_v63 = vld [vmem:[#allocation55_spill] sm:$0xff]  ;;  %v5862_v3 = vld [vmem:[#allocation45_spill] sm:$0xff] }
 0x600   :  { %1582 = vmax.xlane.f32.xlu0 %v1581_v14  ;;  %vm5851_vm2 = vmmov %vm5849_vm8  ;;  %v1407_v1 = vshll.u32 %v1406_v10, 16  ;;  %v1391_v11 = vcvt.f32.s32 %v4239_v60  ;;  %vm1509_vm6 = vcmp.eq.s32.totalorder %v3175_v37, %v1423_v39  ;;  %vm5854_vm8 = vcmp.eq.f32.partialorder %v5852_v32, %v5853_v63 }
 0x601   :  { %v1404_v4 = vpop.xlane.xlu1 %1403  ;;  %v1605_v54 = vsel %vm5851_vm2, %v4485_v50, -inf  ;;  %vm4499_vm0 = vmand %vm5854_vm8, %vm1501_vm5  ;;  %v5855_v61 = vmov 0  ;;  %vm5859_vm4 = vnez %v5858_v52  ;;  %v1288_v0 = vadd.s32 %v1287_v18, %v1285_v26 }
 0x602   :  { %v1405_v56 = vcvt.f32.s32 %v1404_v4  ;;  %1606 = vmax.xlane.f32.xlu1 %v1605_v54  ;;  %v5856_v61 = vsel %vm4499_vm0, 4294967295, %v5855_v61  ;;  %v4506_v12 = vsel %vm5859_vm4, 1.0, %v2928_v35  ;;  %v4511_v60 = vsel %vm4499_vm0, -1.0, %v5852_v32  ;;  %v5874_v4 = vld [vmem:[#allocation46_spill] sm:$0xff] }
 0x603   :  { %5857 = vst [vmem:[#allocation54_spill] sm:$0xff] %v5856_v61  ;;  %5860 = vst [vmem:[#allocation34_spill] sm:$0xff] %v4506_v12  ;;  %vm5864_vm5 = vcmp.eq.f32.partialorder %v5862_v3, %v5863_v7  ;;  %v5865_v39 = vmov 0  ;;  %v1269_v14 = vpop.xlane.xlu0 %1268  ;;  %vm5868_vm4 = vcmask 523264   ;;  %v1272_v54 = vshll.u32 %v1271_v23, 16  ;;  %v5875_v23 = vld [vmem:[#allocation57_spill] sm:$0xff] }
 0x604   :  { %5861 = vst [vmem:[#allocation55_spill] sm:$0xff] %v4511_v60  ;;  %vm4519_vm2 = vmand %vm5864_vm5, %vm1509_vm6  ;;  %v1408_v38 = vadd.s32 %v1407_v1, %v1405_v56  ;;  %v1569_v18 = vsel %vm5868_vm4, %v4511_v60, -inf  ;;  %vm1500_vm6 = vcmp.eq.s32.totalorder %v3175_v37, %v1288_v0  ;;  %v1270_v32 = vcvt.f32.s32 %v1269_v14  ;;  %v5871_v56 = vld [vmem:[#allocation36_spill] sm:$0xff]  ;;  %v5880_v14 = vld [vmem:[#allocation37_spill] sm:$0xff] }
 0x605   :  { %v5866_v39 = vsel %vm4519_vm2, 4294967295, %v5865_v39  ;;  %v4528_v26 = vsel %vm4519_vm2, -1.0, %v5862_v3  ;;  %1570 = vmax.xlane.f32.xlu0 %v1569_v18  ;;  %vm5870_vm8 = vmmov %vm5868_vm4  ;;  %vm5872_vm5 = vnez %v5871_v56  ;;  %v1392_v3 = vshll.u32 %v1391_v11, 16 }
 0x606   :  { %5867 = vst [vmem:[#allocation35_spill] sm:$0xff] %v5866_v39  ;;  %5869 = vst [vmem:[#allocation45_spill] sm:$0xff] %v4528_v26  ;;  %v1389_v63 = vpop.xlane.xlu1 %1388  ;;  %v1593_v1 = vsel %vm5870_vm8, %v4528_v26, -inf  ;;  %v4539_v52 = vsel %vm5872_vm5, 1.0, %v2928_v35  ;;  %vm1508_vm4 = vcmp.eq.s32.totalorder %v3175_v37, %v1408_v38  ;;  %vm5876_vm2 = vcmp.eq.f32.partialorder %v5874_v4, %v5875_v23  ;;  %v5896_v38 = vld [vmem:[#allocation59_spill] sm:$0xff] }
 0x607   :  { %5873 = vst [vmem:[#allocation56_spill] sm:$0xff] %v4539_v52  ;;  %v1390_v7 = vcvt.f32.s32 %v1389_v63  ;;  %1594 = vmax.xlane.f32.xlu1 %v1593_v1  ;;  %vm4545_vm0 = vmand %vm5876_vm2, %vm1500_vm6  ;;  %v5877_v0 = vmov 0  ;;  %vm5881_vm8 = vnez %v5880_v14  ;;  %v1273_v56 = vadd.s32 %v1272_v54, %v1270_v32  ;;  %v5884_v63 = vld [vmem:[#allocation47_spill] sm:$0xff]  ;;  %v5885_v1 = vld [vmem:[#allocation58_spill] sm:$0xff] }
 0x608   :  { %v5878_v0 = vsel %vm4545_vm0, 4294967295, %v5877_v0  ;;  %v4552_v18 = vsel %vm5881_vm8, 1.0, %v2928_v35  ;;  %v4557_v11 = vsel %vm4545_vm0, -1.0, %v5874_v4  ;;  %vm5886_vm2 = vcmp.eq.f32.partialorder %v5884_v63, %v5885_v1 }
 0x609   :  { %5879 = vst [vmem:[#allocation36_spill] sm:$0xff] %v5878_v0  ;;  %5882 = vst [vmem:[#allocation46_spill] sm:$0xff] %v4552_v18  ;;  %v5887_v23 = vmov 0  ;;  %v1393_v14 = vadd.s32 %v1392_v3, %v1390_v7  ;;  %vm5890_vm5 = vcmask 523264   ;;  %vm1499_vm8 = vcmp.eq.s32.totalorder %v3175_v37, %v1273_v56 }
 0x60a   :  { %5883 = vst [vmem:[#allocation57_spill] sm:$0xff] %v4557_v11  ;;  %vm4565_vm6 = vmand %vm5886_vm2, %vm1508_vm4  ;;  %v1566_v54 = vsel %vm5890_vm5, %v4557_v11, -inf  ;;  %v4585_v7 = vsel %vm3897_vm12, 1.0, %v2928_v35  ;;  %v5898_v10 = vmov 0  ;;  %v5907_v32 = vmov 0 }
 0x60b   :  { %v5888_v23 = vsel %vm4565_vm6, 4294967295, %v5887_v23  ;;  %v4574_v4 = vsel %vm4565_vm6, -1.0, %v5884_v63  ;;  %1567 = vmax.xlane.f32.xlu0 %v1566_v54  ;;  %vm5892_vm4 = vmmov %vm5890_vm5  ;;  %5894 = vst [vmem:[#allocation58_spill] sm:$0xff] %v4585_v7  ;;  %vm1507_vm2 = vcmp.eq.s32.totalorder %v3175_v37, %v1393_v14  ;;  %v5895_v63 = vld [vmem:[#allocation48_spill] sm:$0xff]  ;;  %v4598_v54 = vsel %vm3910_vm13, 1.0, %v2928_v35 }
 0x60c   :  { %5889 = vst [vmem:[#allocation37_spill] sm:$0xff] %v5888_v23  ;;  %5891 = vst [vmem:[#allocation47_spill] sm:$0xff] %v4574_v4  ;;  %v1590_v1 = vsel %vm5892_vm4, %v4574_v4, -inf  ;;  %vm5897_vm5 = vcmp.eq.f32.partialorder %v5895_v63, %v5896_v38  ;;  %v5905_v38 = vld [vmem:[#allocation60_spill] sm:$0xff] }
 0x60d   :  { %1591 = vmax.xlane.f32.xlu1 %v1590_v1  ;;  %vm4591_vm0 = vmand %vm5897_vm5, %vm1499_vm8  ;;  %5902 = vst [vmem:[#allocation48_spill] sm:$0xff] %v4598_v54  ;;  %v5904_v1 = vld [vmem:[#allocation49_spill] sm:$0xff] }
 0x60e   :  { %v5899_v10 = vsel %vm4591_vm0, 4294967295, %v5898_v10  ;;  %v4603_v3 = vsel %vm4591_vm0, -1.0, %v5895_v63  ;;  %vm5906_vm12 = vcmp.eq.f32.partialorder %v5904_v1, %v5905_v38  ;;  %vm5911_vm13 = vmmov %vm5892_vm4 }
 0x60f   :  { %5900 = vst [vmem:[#allocation38_spill] sm:$0xff] %v5899_v10  ;;  %5903 = vst [vmem:[#allocation59_spill] sm:$0xff] %v4603_v3  ;;  %v1563_v35 = vsel %vm5892_vm4, %v4603_v3, -inf }
 0x610   :  { %vm4611_vm8 = vmand %vm5906_vm12, %vm1507_vm2  ;;  %1564 = vmax.xlane.f32.xlu0 %v1563_v35 }
 0x611   :  { %v5908_v32 = vsel %vm4611_vm8, 4294967295, %v5907_v32  ;;  %v4620_v56 = vsel %vm4611_vm8, -1.0, %v5904_v1  ;;  %vm5912_vm12 = vmmov %vm5892_vm4 }
 0x612   :  { %5909 = vst [vmem:[#allocation39_spill] sm:$0xff] %v5908_v32  ;;  %5910 = vst [vmem:[#allocation49_spill] sm:$0xff] %v4620_v56  ;;  %v1587_v38 = vsel %vm5911_vm13, %v4620_v56, -inf }
 0x613   :  { %1588 = vmax.xlane.f32.xlu1 %v1587_v38 }
 0x678   :  { %v4627_v14 = vpop.xlane.xlu0 %1573 }
 0x679   :  { %vm1614_vm2 = vcmp.eq.f32.partialorder %v4316_v49, %v4627_v14  ;;  %v4631_v21 = vpop.xlane.xlu1 %1597  ;;  %v5938_v49 = vsel %vm4309_vm7, 1.0, %v4248_v29 }
 0x67a   :  { %v1630_v1 = vsel %vm1614_vm2, %v3175_v37, 64  ;;  %vm5601_vm5 = vcmp.eq.f32.partialorder %v4333_v9, %v4631_v21 }
 0x67b   :  { %v4640_v35 = vsel %vm5912_vm12, %v1630_v1, 2147483647  ;;  %v1638_v38 = vsel %vm5601_vm5, %v3175_v37, 64  ;;  %vm5913_vm5 = vmmov %vm5892_vm4 }
 0x67c   :  { %v1690_v63 = vshra.s32 %v4640_v35, 16  ;;  %v4648_v51 = vsel %vm5892_vm4, %v1638_v38, 2147483647  ;;  %v4650_v20 = vpop.xlane.xlu0 %1579 }
 0x67d   :  { %v1810_v24 = vshra.s32 %v4648_v51, 16  ;;  %vm5608_vm13 = vcmp.eq.f32.partialorder %v4355_v25, %v4650_v20  ;;  %v4655_v53 = vpop.xlane.xlu1 %1603 }
 0x67e   :  { %v1632_v1 = vsel %vm5608_vm13, %v3175_v37, 64  ;;  %vm5603_vm12 = vcmp.eq.f32.partialorder %v4372_v34, %v4655_v53  ;;  %v4663_v44 = vcvt.s32.f32 %v1690_v63 }
 0x67f   :  { %v4666_v38 = vsel %vm5892_vm4, %v1632_v1, 2147483647  ;;  %v1640_v17 = vsel %vm5603_vm12, %v3175_v37, 64  ;;  %v4672_v2 = vcvt.s32.f32 %v1810_v24  ;;  %vm5914_vm12 = vcmask 523264  }
 0x680   :  { %v1720_v62 = vshra.s32 %v4666_v38, 16  ;;  %v4676_v59 = vsel %vm5913_vm5, %v1640_v17, 2147483647  ;;  %1693 = vmin.xlane.f32.xlu0 %v4663_v44  ;;  %v4679_v54 = vpop.xlane.xlu0 %1576  ;;  %vm5915_vm13 = vmmov %vm5914_vm12 }
 0x681   :  { %v1840_v63 = vshra.s32 %v4676_v59, 16  ;;  %vm5616_vm4 = vcmp.eq.f32.partialorder %v4392_v15, %v4679_v54  ;;  %1813 = vmin.xlane.f32.xlu1 %v4672_v2  ;;  %v4685_v1 = vpop.xlane.xlu1 %1600  ;;  %v1839_v40 = vand.u32 65535, %v4676_v59 }
 0x682   :  { %v1631_v24 = vsel %vm5616_vm4, %v3175_v37, 64  ;;  %vm5611_vm5 = vcmp.eq.f32.partialorder %v4409_v16, %v4685_v1  ;;  %v4693_v17 = vcvt.s32.f32 %v1720_v62 }
 0x683   :  { %v4696_v32 = vsel %vm5914_vm12, %v1631_v24, 2147483647  ;;  %v1639_v7 = vsel %vm5611_vm5, %v3175_v37, 64  ;;  %v4702_v10 = vcvt.s32.f32 %v1840_v63  ;;  %vm5918_vm5 = vcmask 523264  }
 0x684   :  { %v1705_v18 = vshra.s32 %v4696_v32, 16  ;;  %v4706_v23 = vsel %vm5915_vm13, %v1639_v7, 2147483647  ;;  %1723 = vmin.xlane.f32.xlu0 %v4693_v17  ;;  %v4709_v52 = vpop.xlane.xlu0 %1585  ;;  %vm5919_vm4 = vmmov %vm5918_vm5 }
 0x685   :  { %5916 = vst [vmem:[#allocation60_spill] sm:$0xff] %v4709_v52  ;;  %v1825_v62 = vshra.s32 %v4706_v23, 16  ;;  %vm5624_vm12 = vcmp.eq.f32.partialorder %v4431_v28, %v4709_v52  ;;  %1843 = vmin.xlane.f32.xlu1 %v4702_v10  ;;  %v4715_v24 = vpop.xlane.xlu1 %1609  ;;  %v1824_v59 = vand.u32 65535, %v4706_v23 }
 0x686   :  { %5917 = vst [vmem:[#allocation67_spill] sm:$0xff] %v4715_v24  ;;  %v1634_v63 = vsel %vm5624_vm12, %v3175_v37, 64  ;;  %vm5619_vm13 = vcmp.eq.f32.partialorder %v4448_v33, %v4715_v24  ;;  %v4723_v7 = vcvt.s32.f32 %v1705_v18 }
 0x687   :  { %v4726_v0 = vsel %vm5918_vm5, %v1634_v63, 2147483647  ;;  %v1642_v12 = vsel %vm5619_vm13, %v3175_v37, 64  ;;  %v4732_v39 = vcvt.s32.f32 %v1825_v62  ;;  %vm5922_vm13 = vcmask 523264  }
 0x688   :  { %v1750_v42 = vshra.s32 %v4726_v0, 16  ;;  %v4736_v61 = vsel %vm5919_vm4, %v1642_v12, 2147483647  ;;  %1708 = vmin.xlane.f32.xlu0 %v4723_v7  ;;  %vm5923_vm12 = vmmov %vm5922_vm13 }
 0x689   :  { %v4739_v47 = vpop.xlane.xlu0 %1582  ;;  %v1870_v18 = vshra.s32 %v4736_v61, 16  ;;  %1828 = vmin.xlane.f32.xlu1 %v4732_v39  ;;  %v1869_v23 = vand.u32 65535, %v4736_v61 }
 0x68a   :  { %5920 = vst [vmem:[#allocation68_spill] sm:$0xff] %v4739_v47  ;;  %vm5632_vm5 = vcmp.eq.f32.partialorder %v4468_v45, %v4739_v47  ;;  %v4753_v12 = vcvt.s32.f32 %v1750_v42 }
 0x68b   :  { %v4745_v63 = vpop.xlane.xlu1 %1606  ;;  %v1633_v62 = vsel %vm5632_vm5, %v3175_v37, 64  ;;  %v4762_v31 = vcvt.s32.f32 %v1870_v18 }
 0x68c   :  { %5921 = vst [vmem:[#allocation69_spill] sm:$0xff] %v4745_v63  ;;  %vm5627_vm4 = vcmp.eq.f32.partialorder %v4485_v50, %v4745_v63  ;;  %v4756_v19 = vsel %vm5922_vm13, %v1633_v62, 2147483647  ;;  %1753 = vmin.xlane.f32.xlu0 %v4753_v12 }
 0x68d   :  { %v1641_v55 = vsel %vm5627_vm4, %v3175_v37, 64  ;;  %v1735_v22 = vshra.s32 %v4756_v19, 16  ;;  %1873 = vmin.xlane.f32.xlu1 %v4762_v31  ;;  %vm5926_vm4 = vcmask 523264  }
 0x68e   :  { %v4766_v47 = vsel %vm5923_vm12, %v1641_v55, 2147483647  ;;  %v4769_v45 = vpop.xlane.xlu0 %1570  ;;  %vm5927_vm5 = vmmov %vm5926_vm4 }
 0x68f   :  { %5924 = vst [vmem:[#allocation70_spill] sm:$0xff] %v4769_v45  ;;  %v1855_v42 = vshra.s32 %v4766_v47, 16  ;;  %vm5640_vm13 = vcmp.eq.f32.partialorder %v4511_v60, %v4769_v45  ;;  %v4783_v55 = vcvt.s32.f32 %v1735_v22  ;;  %v1854_v61 = vand.u32 65535, %v4766_v47 }
 0x690   :  { %v4775_v62 = vpop.xlane.xlu1 %1594  ;;  %v1629_v18 = vsel %vm5640_vm13, %v3175_v37, 64 }
 0x691   :  { %5925 = vst [vmem:[#allocation71_spill] sm:$0xff] %v4775_v62  ;;  %vm5635_vm12 = vcmp.eq.f32.partialorder %v4528_v26, %v4775_v62  ;;  %v4786_v63 = vsel %vm5926_vm4, %v1629_v18, 2147483647  ;;  %v4792_v46 = vcvt.s32.f32 %v1855_v42  ;;  %1738 = vmin.xlane.f32.xlu0 %v4783_v55 }
 0x692   :  { %v1637_v50 = vsel %vm5635_vm12, %v3175_v37, 64  ;;  %v1675_v41 = vshra.s32 %v4786_v63, 16  ;;  %vm5930_vm12 = vcmask 523264  }
 0x693   :  { %v4796_v45 = vsel %vm5927_vm5, %v1637_v50, 2147483647  ;;  %1858 = vmin.xlane.f32.xlu1 %v4792_v46  ;;  %vm5931_vm13 = vmmov %vm5930_vm12 }
 0x694   :  { %v4799_v60 = vpop.xlane.xlu0 %1567  ;;  %v1795_v22 = vshra.s32 %v4796_v45, 16  ;;  %v4813_v50 = vcvt.s32.f32 %v1675_v41  ;;  %v1794_v47 = vand.u32 65535, %v4796_v45 }
 0x695   :  { %5928 = vst [vmem:[#allocation72_spill] sm:$0xff] %v4799_v60  ;;  %vm5648_vm4 = vcmp.eq.f32.partialorder %v4557_v11, %v4799_v60 }
 0x696   :  { %v4805_v18 = vpop.xlane.xlu1 %1591  ;;  %v1628_v42 = vsel %vm5648_vm4, %v3175_v37, 64  ;;  %v4822_v30 = vcvt.s32.f32 %v1795_v22  ;;  %1678 = vmin.xlane.f32.xlu0 %v4813_v50 }
 0x697   :  { %5929 = vst [vmem:[#allocation73_spill] sm:$0xff] %v4805_v18  ;;  %vm5643_vm5 = vcmp.eq.f32.partialorder %v4574_v4, %v4805_v18  ;;  %v4816_v62 = vsel %vm5930_vm12, %v1628_v42, 2147483647 }
 0x698   :  { %v1636_v26 = vsel %vm5643_vm5, %v3175_v37, 64  ;;  %v1660_v24 = vshra.s32 %v4816_v62, 16  ;;  %1798 = vmin.xlane.f32.xlu1 %v4822_v30  ;;  %vm5934_vm5 = vcmask 523264  }
 0x699   :  { %v4826_v60 = vsel %vm5931_vm13, %v1636_v26, 2147483647  ;;  %v4829_v11 = vpop.xlane.xlu0 %1564  ;;  %vm5935_vm4 = vmmov %vm5934_vm5 }
 0x69a   :  { %5932 = vst [vmem:[#allocation74_spill] sm:$0xff] %v4829_v11  ;;  %v1780_v41 = vshra.s32 %v4826_v60, 16  ;;  %vm5657_vm12 = vcmp.eq.f32.partialorder %v4603_v3, %v4829_v11  ;;  %v4843_v26 = vcvt.s32.f32 %v1660_v24  ;;  %v1779_v45 = vand.u32 65535, %v4826_v60 }
 0x69b   :  { %v1627_v22 = vsel %vm5657_vm12, %v3175_v37, 64 }
 0x69c   :  { %v4835_v42 = vpop.xlane.xlu1 %1588  ;;  %v4846_v18 = vsel %vm5934_vm5, %v1627_v22, 2147483647  ;;  %v4852_v33 = vcvt.s32.f32 %v1780_v41  ;;  %1663 = vmin.xlane.f32.xlu0 %v4843_v26  ;;  %v1689_v41 = vand.u32 65535, %v4640_v35 }
 0x69d   :  { %5933 = vst [vmem:[#allocation75_spill] sm:$0xff] %v4835_v42  ;;  %vm5656_vm13 = vcmp.eq.f32.partialorder %v4620_v56, %v4835_v42  ;;  %v1645_v52 = vshra.s32 %v4846_v18, 16  ;;  %v1809_v42 = vand.u32 65535, %v4648_v51  ;;  %v1704_v51 = vand.u32 65535, %v4696_v32 }
 0x69e   :  { %v1635_v4 = vsel %vm5656_vm13, %v3175_v37, 64  ;;  %1783 = vmin.xlane.f32.xlu1 %v4852_v33  ;;  %v1691_v28 = vcvt.s32.f32 %v1689_v41 }
 0x69f   :  { %v4856_v11 = vsel %vm5935_vm4, %v1635_v4, 2147483647  ;;  %v4861_v22 = vcvt.s32.f32 %v1645_v52  ;;  %v1719_v4 = vand.u32 65535, %v4666_v38 }
 0x6a0   :  { %v1765_v24 = vshra.s32 %v4856_v11, 16  ;;  %v1764_v60 = vand.u32 65535, %v4856_v11 }
 0x6a1   :  { %1648 = vmin.xlane.f32.xlu0 %v4861_v22  ;;  %v1721_v41 = vcvt.s32.f32 %v1719_v4  ;;  %v1706_v4 = vcvt.s32.f32 %v1704_v51 }
 0x6a2   :  { %v4863_v3 = vcvt.s32.f32 %v1765_v24  ;;  %v1811_v24 = vcvt.s32.f32 %v1809_v42  ;;  %v1841_v42 = vcvt.s32.f32 %v1839_v40  ;;  %v1826_v40 = vcvt.s32.f32 %v1824_v59 }
 0x6a4   :  { %1768 = vmin.xlane.f32.xlu1 %v4863_v3 }
 0x709   :  { %v4870_v56 = vpop.xlane.xlu0 %1693 }
 0x70a   :  { %vm1695_vm4 = vcmp.eq.f32.partialorder %v4663_v44, %v4870_v56  ;;  %v4875_v52 = vpop.xlane.xlu1 %1813 }
 0x70b   :  { %vm1815_vm5 = vcmp.eq.f32.partialorder %v4672_v2, %v4875_v52  ;;  %v1696_v43 = vsel %vm1695_vm4, %v1691_v28, inf  ;;  %v1749_v28 = vand.u32 65535, %v4726_v0  ;;  %v1734_v0 = vand.u32 65535, %v4756_v19 }
 0x70c   :  { %1697 = vmin.xlane.f32.xlu0 %v1696_v43  ;;  %v1816_v35 = vsel %vm1815_vm5, %v1811_v24, inf  ;;  %v1674_v19 = vand.u32 65535, %v4786_v63  ;;  %v1659_v63 = vand.u32 65535, %v4816_v62  ;;  %v1644_v62 = vand.u32 65535, %v4846_v18 }
 0x70d   :  { %1817 = vmin.xlane.f32.xlu1 %v1816_v35  ;;  %v4880_v38 = vpop.xlane.xlu0 %1723  ;;  %v1751_v51 = vcvt.s32.f32 %v1749_v28 }
 0x70e   :  { %vm1725_vm13 = vcmp.eq.f32.partialorder %v4693_v17, %v4880_v38  ;;  %v4885_v44 = vpop.xlane.xlu1 %1843 }
 0x70f   :  { %vm1845_vm12 = vcmp.eq.f32.partialorder %v4702_v10, %v4885_v44  ;;  %v1726_v2 = vsel %vm1725_vm13, %v1721_v41, inf  ;;  %v1871_v41 = vcvt.s32.f32 %v1869_v23  ;;  %v1676_v23 = vcvt.s32.f32 %v1674_v19 }
 0x710   :  { %1727 = vmin.xlane.f32.xlu0 %v1726_v2  ;;  %v1846_v43 = vsel %vm1845_vm12, %v1841_v42, inf  ;;  %v1736_v2 = vcvt.s32.f32 %v1734_v0  ;;  %v1661_v0 = vcvt.s32.f32 %v1659_v63  ;;  %v1820_v19 = vcvt.f32.s32 %v4875_v52 }
 0x711   :  { %1847 = vmin.xlane.f32.xlu1 %v1846_v43  ;;  %v4890_v32 = vpop.xlane.xlu0 %1708  ;;  %v1856_v43 = vcvt.s32.f32 %v1854_v61 }
 0x712   :  { %vm1710_vm4 = vcmp.eq.f32.partialorder %v4723_v7, %v4890_v32  ;;  %v4895_v17 = vpop.xlane.xlu1 %1828 }
 0x713   :  { %vm1830_vm5 = vcmp.eq.f32.partialorder %v4732_v39, %v4895_v17  ;;  %v1711_v10 = vsel %vm1710_vm4, %v1706_v4, inf }
 0x714   :  { %1712 = vmin.xlane.f32.xlu0 %v1711_v10  ;;  %v1831_v24 = vsel %vm1830_vm5, %v1826_v40, inf  ;;  %v1796_v40 = vcvt.s32.f32 %v1794_v47  ;;  %v1850_v47 = vcvt.f32.s32 %v4885_v44 }
 0x715   :  { %1832 = vmin.xlane.f32.xlu1 %v1831_v24  ;;  %v4900_v35 = vpop.xlane.xlu0 %1753 }
 0x716   :  { %vm1755_vm12 = vcmp.eq.f32.partialorder %v4753_v12, %v4900_v35  ;;  %v4905_v7 = vpop.xlane.xlu1 %1873 }
 0x717   :  { %vm1875_vm13 = vcmp.eq.f32.partialorder %v4762_v31, %v4905_v7  ;;  %v1756_v39 = vsel %vm1755_vm12, %v1751_v51, inf  ;;  %v1781_v51 = vcvt.s32.f32 %v1779_v45  ;;  %v1880_v63 = vcvt.f32.s32 %v4905_v7 }
 0x718   :  { %1757 = vmin.xlane.f32.xlu0 %v1756_v39  ;;  %v1876_v59 = vsel %vm1875_vm13, %v1871_v41, inf  ;;  %v1646_v41 = vcvt.s32.f32 %v1644_v62  ;;  %v1766_v39 = vcvt.s32.f32 %v1764_v60  ;;  %v1821_v45 = vshll.u32 %v1820_v19, 16 }
 0x719   :  { %1877 = vmin.xlane.f32.xlu1 %v1876_v59 }
 0x71a   :  { %v4910_v42 = vpop.xlane.xlu0 %1738 }
 0x71b   :  { %vm1740_vm4 = vcmp.eq.f32.partialorder %v4783_v55, %v4910_v42 }
 0x71c   :  { %v4915_v12 = vpop.xlane.xlu1 %1858  ;;  %v1741_v31 = vsel %vm1740_vm4, %v1736_v2, inf  ;;  %v1730_v2 = vcvt.f32.s32 %v4880_v38 }
 0x71d   :  { %vm1860_vm5 = vcmp.eq.f32.partialorder %v4792_v46, %v4915_v12  ;;  %1742 = vmin.xlane.f32.xlu0 %v1741_v31  ;;  %v1865_v38 = vcvt.f32.s32 %v4915_v12 }
 0x71e   :  { %v1861_v28 = vsel %vm1860_vm5, %v1856_v43, inf  ;;  %v5936_v43 = vlaneseq  ;;  %v1731_v52 = vshll.u32 %v1730_v2, 16 }
 0x71f   :  { %1862 = vmin.xlane.f32.xlu1 %v1861_v28  ;;  %v4920_v4 = vpop.xlane.xlu0 %1678  ;;  %v1835_v28 = vcvt.f32.s32 %v4895_v17 }
 0x720   :  { %vm1680_vm12 = vcmp.eq.f32.partialorder %v4813_v50, %v4920_v4  ;;  %v4953_v31 = vshrl.u32 %v5936_v43, 7 }
 0x721   :  { %v4925_v55 = vpop.xlane.xlu1 %1798  ;;  %v1681_v46 = vsel %vm1680_vm12, %v1676_v23, inf  ;;  %v1745_v23 = vcvt.f32.s32 %v4910_v42  ;;  %v1836_v62 = vshll.u32 %v1835_v28, 16  ;;  %v4965_v42 = vshll.u32 %v1880_v63, 16  ;;  %v5939_v63 = vld [vmem:[#allocation18_spill] sm:$0xff] }
 0x722   :  { %vm1800_vm13 = vcmp.eq.f32.partialorder %v4822_v30, %v4925_v55  ;;  %1682 = vmin.xlane.f32.xlu0 %v1681_v46  ;;  %v4970_v12 = vadd.s32 40, %v4953_v31  ;;  %v4983_v2 = vadd.s32 32, %v4953_v31 }
 0x723   :  { %v1801_v10 = vsel %vm1800_vm13, %v1796_v40, inf  ;;  %v1851_v40 = vshll.u32 %v1850_v47, 16  ;;  %v4967_v60 = vshll.u32 %v1745_v23, 16 }
 0x724   :  { %1802 = vmin.xlane.f32.xlu1 %v1801_v10  ;;  %v1969_v10 = vadd.s32 24, %v4953_v31 }
 0x725   :  { %v4930_v24 = vpop.xlane.xlu0 %1663 }
 0x726   :  { %vm1665_vm4 = vcmp.eq.f32.partialorder %v4843_v26, %v4930_v24 }
 0x727   :  { %v4935_v50 = vpop.xlane.xlu1 %1783  ;;  %v1666_v30 = vsel %vm1665_vm4, %v1661_v0, inf  ;;  %vm5946_vm4 = vcmask 523264  }
 0x728   :  { %vm1785_vm5 = vcmp.eq.f32.partialorder %v4852_v33, %v4935_v50  ;;  %1667 = vmin.xlane.f32.xlu0 %v1666_v30  ;;  %v1700_v33 = vcvt.f32.s32 %v4870_v56  ;;  %v4972_v30 = vshll.u32 %v1865_v38, 16 }
 0x729   :  { %v1786_v61 = vsel %vm1785_vm5, %v1781_v51, inf  ;;  %vm5937_vm5 = vcmp.eq.f32.partialorder %v4333_v9, %v4631_v21 }
 0x72a   :  { %1787 = vmin.xlane.f32.xlu1 %v1786_v61  ;;  %v4939_v18 = vpop.xlane.xlu0 %1648  ;;  %v1701_v56 = vshll.u32 %v1700_v33, 16  ;;  %v1790_v61 = vcvt.f32.s32 %v4935_v50 }
 0x72b   :  { %vm1650_vm12 = vcmp.eq.f32.partialorder %v4861_v22, %v4939_v18  ;;  %v1715_v22 = vcvt.f32.s32 %v4890_v32  ;;  %v1685_v32 = vcvt.f32.s32 %v4920_v4  ;;  %v1670_v4 = vcvt.f32.s32 %v4930_v24 }
 0x72c   :  { %v1651_v26 = vsel %vm1650_vm12, %v1646_v41, inf  ;;  %v1655_v24 = vcvt.f32.s32 %v4939_v18 }
 0x72d   :  { %v4943_v11 = vpop.xlane.xlu1 %1768  ;;  %1652 = vmin.xlane.f32.xlu0 %v1651_v26  ;;  %v1716_v44 = vshll.u32 %v1715_v22, 16  ;;  %v4992_v47 = vshll.u32 %v1670_v4, 16  ;;  %v4994_v22 = vshll.u32 %v1790_v61, 16 }
 0x72e   :  { %vm1770_vm13 = vcmp.eq.f32.partialorder %v4863_v3, %v4943_v11  ;;  %v1760_v3 = vcvt.f32.s32 %v4900_v35  ;;  %v1805_v35 = vcvt.f32.s32 %v4925_v55  ;;  %v1775_v18 = vcvt.f32.s32 %v4943_v11  ;;  %v6030_v11 = vld [vmem:[#allocation47_spill] sm:$0xff] }
 0x72f   :  { %v1771_v59 = vsel %vm1770_vm13, %v1766_v39, inf  ;;  %v4976_v39 = vshll.u32 %v1685_v32, 16  ;;  %v5013_v29 = vshll.u32 %v1655_v24, 16 }
 0x730   :  { %1772 = vmin.xlane.f32.xlu1 %v1771_v59  ;;  %v4962_v17 = vshll.u32 %v1760_v3, 16  ;;  %v4979_v59 = vshll.u32 %v1805_v35, 16  ;;  %v5952_v35 = vsel %vm4363_vm1, 1.0, %v4263_v36  ;;  %vm5955_vm1 = vcmp.eq.s32.totalorder %v4970_v12, %v3175_v37  ;;  %v5963_v12 = vld [vmem:[#allocation22_spill] sm:$0xff] }
 0x795   :  { %v1698_v46 = vpop.xlane.xlu0 %1697 }
 0x796   :  { %v1699_v7 = vcvt.f32.s32 %v1698_v46  ;;  %v1818_v0 = vpop.xlane.xlu1 %1817  ;;  %v5951_v46 = vld [vmem:[#allocation20_spill] sm:$0xff] }
 0x797   :  { %v1819_v51 = vcvt.f32.s32 %v1818_v0 }
 0x798   :  { %v1702_v41 = vadd.s32 %v1701_v56, %v1699_v7  ;;  %v5940_v56 = vsel %vm4324_vm9, 1.0, %v4253_v58  ;;  %vm5943_vm9 = vcmp.eq.s32.totalorder %v1969_v10, %v3175_v37 }
 0x799   :  { %v1822_v55 = vadd.s32 %v1821_v45, %v1819_v51  ;;  %v1728_v26 = vpop.xlane.xlu0 %1727 }
 0x79a   :  { %vm1886_vm12 = vcmp.eq.s32.totalorder %v3175_v37, %v1702_v41  ;;  %v1729_v33 = vcvt.f32.s32 %v1728_v26  ;;  %v1848_v19 = vpop.xlane.xlu1 %1847 }
 0x79b   :  { %vm1902_vm13 = vmand %vm1614_vm2, %vm1886_vm12  ;;  %vm1894_vm8 = vcmp.eq.s32.totalorder %v3175_v37, %v1822_v55  ;;  %v1849_v50 = vcvt.f32.s32 %v1848_v19 }
 0x79c   :  { %vm1910_vm0 = vmand %vm5937_vm5, %vm1894_vm8  ;;  %v1732_v43 = vadd.s32 %v1731_v52, %v1729_v33  ;;  %v1918_v14 = vsel %vm1902_vm13, 1.0, %v5938_v49  ;;  %v5941_v52 = vld [vmem:[#allocation19_spill] sm:$0xff]  ;;  %vm5942_vm8 = vcmp.eq.f32.partialorder %v4355_v25, %v4650_v20  ;;  %vm5945_vm13 = vcmp.eq.f32.partialorder %v4372_v34, %v4655_v53  ;;  %v5965_v33 = vld [vmem:[#allocation61_spill] sm:$0xff] }
 0x79d   :  { %v1852_v28 = vadd.s32 %v1851_v40, %v1849_v50  ;;  %v1713_v3 = vpop.xlane.xlu0 %1712  ;;  %v1934_v23 = vmul.f32 %v1918_v14, %v5939_v63  ;;  %v1926_v45 = vsel %vm1910_vm0, 1.0, %v5940_v56  ;;  %vm5944_vm0 = vcmask 506880   ;;  %v5967_v50 = vld [vmem:[#allocation23_spill] sm:$0xff]  ;;  %v5969_v49 = vld [vmem:[#allocation60_spill] sm:$0xff]  ;;  %v5973_v63 = vld [vmem:[#allocation42_spill] sm:$0xff] }
 0x79e   :  { %vm1888_vm2 = vcmp.eq.s32.totalorder %v3175_v37, %v1732_v43  ;;  %v1714_v9 = vcvt.f32.s32 %v1713_v3  ;;  %v1833_v21 = vpop.xlane.xlu1 %1832  ;;  %v1942_v8 = vmul.f32 %v1926_v45, %v5941_v52  ;;  %v5949_v40 = vsel %vm4347_vm14, 1.0, %v4258_v48  ;;  %v5953_v48 = vld [vmem:[#allocation21_spill] sm:$0xff]  ;;  %v5980_v52 = vld [vmem:[#allocation62_spill] sm:$0xff] }
 0x79f   :  { %vm1904_vm5 = vmand %vm5942_vm8, %vm1888_vm2  ;;  %vm1896_vm12 = vcmp.eq.s32.totalorder %v3175_v37, %v1852_v28  ;;  %v1834_v6 = vcvt.f32.s32 %v1833_v21  ;;  %v5021_v58 = vsel %vm5943_vm9, 1.0, %v1934_v23  ;;  %1951 = vst.msk [vmem:[%s5496_s6 + $0x18] sm:$0xff] %vm5944_vm0, %v1934_v23  ;;  %vm5954_vm14 = vcmp.eq.f32.partialorder %v4392_v15, %v4679_v54  ;;  %v5974_v23 = vld [vmem:[#allocation67_spill] sm:$0xff] }
 0x7a0   :  { %vm1912_vm7 = vmand %vm5945_vm13, %vm1896_vm12  ;;  %v1717_v38 = vadd.s32 %v1716_v44, %v1714_v9  ;;  %v2023_v25 = vsel %vm5946_vm4, %v5021_v58, 0.0  ;;  %v1920_v32 = vsel %vm1904_vm5, 1.0, %v5949_v40  ;;  %vm5957_vm13 = vcmp.eq.f32.partialorder %v4409_v16, %v4685_v1  ;;  %v6011_v21 = vld [vmem:[#allocation71_spill] sm:$0xff] }
 0x7a1   :  { %vm5947_vm2 = vmmov %vm5943_vm9  ;;  %v1837_v34 = vadd.s32 %v1836_v62, %v1834_v6  ;;  %2024 = vadd.xlane.f32.xlu0 %v2023_v25  ;;  %v1758_v53 = vpop.xlane.xlu0 %1757  ;;  %v1936_v10 = vmul.f32 %v1920_v32, %v5951_v46  ;;  %v1928_v7 = vsel %vm1912_vm7, 1.0, %v5952_v35  ;;  %v1973_v62 = vadd.s32 56, %v4953_v31  ;;  %v5987_v35 = vld [vmem:[#allocation25_spill] sm:$0xff] }
 0x7a2   :  { %v5034_v20 = vsel %vm5947_vm2, 1.0, %v1942_v8  ;;  %vm5948_vm8 = vmmov %vm5944_vm0  ;;  %v1759_v0 = vcvt.f32.s32 %v1758_v53  ;;  %v1878_v5 = vpop.xlane.xlu1 %1877  ;;  %v1944_v51 = vmul.f32 %v1928_v7, %v5953_v48  ;;  %v5961_v16 = vsel %vm4385_vm11, 1.0, %v4269_v57 }
 0x7a3   :  { %1960 = vst.msk [vmem:[%s5496_s6 + $0x58] sm:$0xff] %vm5948_vm8, %v1942_v8  ;;  %vm5950_vm12 = vmmov %vm5946_vm4  ;;  %vm1887_vm4 = vcmp.eq.s32.totalorder %v3175_v37, %v1717_v38  ;;  %vm1895_vm9 = vcmp.eq.s32.totalorder %v3175_v37, %v1837_v34  ;;  %v1879_v4 = vcvt.f32.s32 %v1878_v5  ;;  %v5061_v36 = vsel %vm5955_vm1, 1.0, %v1936_v10  ;;  %v5985_v34 = vld [vmem:[#allocation63_spill] sm:$0xff]  ;;  %v5989_v5 = vld [vmem:[#allocation68_spill] sm:$0xff] }
 0x7a4   :  { %v2047_v44 = vsel %vm5950_vm12, %v5034_v20, 0.0  ;;  %vm1903_vm5 = vmand %vm5954_vm14, %vm1887_vm4  ;;  %v1762_v13 = vadd.s32 %v4962_v17, %v1759_v0  ;;  %v5966_v19 = vsel %vm4400_vm10, 1.0, %v5965_v33  ;;  %vm1981_vm11 = vcmp.eq.s32.totalorder %v1973_v62, %v3175_v37  ;;  %v5988_v0 = vld [vmem:[#allocation43_spill] sm:$0xff]  ;;  %v6000_v62 = vld [vmem:[#allocation26_spill] sm:$0xff] }
 0x7a5   :  { %2048 = vadd.xlane.f32.xlu1 %v2047_v44  ;;  %vm5956_vm7 = vmmov %vm5944_vm0  ;;  %vm1955_vm0 = vcmask 504832   ;;  %v1919_v1 = vsel %vm1903_vm5, 1.0, %v5961_v16  ;;  %v1882_v17 = vadd.s32 %v4965_v42, %v1879_v4  ;;  %v5968_v42 = vld [vmem:[#allocation41_spill] sm:$0xff]  ;;  %vm5971_vm10 = vcmp.eq.s32.totalorder %v4983_v2, %v3175_v37  ;;  %v5983_v2 = vld [vmem:[#allocation24_spill] sm:$0xff] }
 0x7a6   :  { %1953 = vst.msk [vmem:[%s5496_s6 + $0x28] sm:$0xff] %vm5956_vm7, %v1936_v10  ;;  %vm1911_vm2 = vmand %vm5957_vm13, %vm1895_vm9  ;;  %v1743_v61 = vpop.xlane.xlu0 %1742  ;;  %v1935_v55 = vmul.f32 %v1919_v1, %v5963_v12  ;;  %vm1890_vm9 = vcmp.eq.s32.totalorder %v3175_v37, %v1762_v13  ;;  %vm5970_vm5 = vcmp.eq.f32.partialorder %v5968_v42, %v5969_v49  ;;  %v1972_v3 = vadd.s32 48, %v4953_v31  ;;  %v5991_v4 = vld [vmem:[#allocation44_spill] sm:$0xff]  ;;  %v5992_v13 = vld [vmem:[#allocation69_spill] sm:$0xff] }
 0x7a7   :  { %vm5958_vm8 = vmmov %vm5950_vm12  ;;  %v1927_v24 = vsel %vm1911_vm2, 1.0, %v5966_v19  ;;  %v1744_v27 = vcvt.f32.s32 %v1743_v61  ;;  %vm5975_vm2 = vcmp.eq.f32.partialorder %v5973_v63, %v5974_v23  ;;  %v5981_v8 = vsel %vm4423_vm15, 1.0, %v5980_v52  ;;  %v5997_v61 = vld [vmem:[#allocation64_spill] sm:$0xff]  ;;  %v6001_v19 = vld [vmem:[#allocation53_spill] sm:$0xff] }
 0x7a8   :  { %v2029_v15 = vsel %vm5958_vm8, %v5061_v36, 0.0  ;;  %vm5959_vm12 = vmmov %vm5955_vm1  ;;  %v1863_v57 = vpop.xlane.xlu1 %1862  ;;  %v1943_v43 = vmul.f32 %v1927_v24, %v5967_v50  ;;  %v5104_v28 = vsel %vm5971_vm10, 1.0, %v1935_v55  ;;  %v5986_v53 = vsel %vm4439_vm3, 1.0, %v5985_v34  ;;  %v6003_v24 = vld [vmem:[#allocation65_spill] sm:$0xff]  ;;  %v6005_v42 = vld [vmem:[#allocation27_spill] sm:$0xff] }
 0x7a9   :  { %v5076_v54 = vsel %vm5959_vm12, 1.0, %v1944_v51  ;;  %vm5960_vm4 = vmmov %vm5956_vm7  ;;  %2030 = vadd.xlane.f32.xlu0 %v2029_v15  ;;  %vm1898_vm7 = vcmp.eq.s32.totalorder %v3175_v37, %v1882_v17  ;;  %v1864_v14 = vcvt.f32.s32 %v1863_v57  ;;  %v1747_v56 = vadd.s32 %v4967_v60, %v1744_v27  ;;  %v5995_v17 = vld [vmem:[#allocation52_spill] sm:$0xff] }
 0x7aa   :  { %1962 = vst.msk [vmem:[%s5496_s6 + $0x68] sm:$0xff] %vm5960_vm4, %v1944_v51  ;;  %vm5962_vm14 = vmmov %vm5958_vm8  ;;  %vm5990_vm15 = vcmp.eq.f32.partialorder %v5988_v0, %v5989_v5  ;;  %vm1980_vm3 = vcmp.eq.s32.totalorder %v1972_v3, %v3175_v37  ;;  %v6020_v3 = vld [vmem:[#allocation28_spill] sm:$0xff]  ;;  %v6025_v0 = vld [vmem:[#allocation29_spill] sm:$0xff] }
 0x7ab   :  { %v2053_v41 = vsel %vm5962_vm14, %v5076_v54, 0.0  ;;  %vm1906_vm1 = vmand %vm5970_vm5, %vm1890_vm9  ;;  %v1867_v60 = vadd.s32 %v4972_v30, %v1864_v14  ;;  %v1683_v38 = vpop.xlane.xlu0 %1682  ;;  %vm1889_vm5 = vcmp.eq.s32.totalorder %v3175_v37, %v1747_v56  ;;  %v1968_v30 = vadd.s32 16, %v4953_v31  ;;  %v6007_v14 = vld [vmem:[#allocation70_spill] sm:$0xff] }
 0x7ac   :  { %2054 = vadd.xlane.f32.xlu1 %v2053_v41  ;;  %vm5972_vm13 = vmmov %vm5960_vm4  ;;  %v1922_v6 = vsel %vm1906_vm1, 1.0, %v5981_v8  ;;  %v1684_v46 = vcvt.f32.s32 %v1683_v38  ;;  %v1967_v56 = vadd.s32 8, %v4953_v31  ;;  %v6017_v38 = vld [vmem:[#allocation66_spill] sm:$0xff] }
 0x7ad   :  { %1952 = vst.msk [vmem:[%s5496_s6 + $0x20] sm:$0xff] %vm5972_vm13, %v1935_v55  ;;  %vm1914_vm8 = vmand %vm5975_vm2, %vm1898_vm7  ;;  %v1938_v40 = vmul.f32 %v1922_v6, %v5983_v2  ;;  %v1803_v10 = vpop.xlane.xlu1 %1802  ;;  %vm1897_vm7 = vcmp.eq.s32.totalorder %v3175_v37, %v1867_v60  ;;  %v6015_v60 = vld [vmem:[#allocation54_spill] sm:$0xff] }
 0x7ae   :  { %vm5976_vm12 = vmmov %vm5962_vm14  ;;  %v1930_v44 = vsel %vm1914_vm8, 1.0, %v5986_v53  ;;  %v1804_v48 = vcvt.f32.s32 %v1803_v10  ;;  %v1687_v15 = vadd.s32 %v4976_v39, %v1684_v46  ;;  %vm5996_vm8 = vnez %v5995_v17  ;;  %v6021_v53 = vld [vmem:[#allocation35_spill] sm:$0xff] }
 0x7af   :  { %v2026_v45 = vsel %vm5976_vm12, %v5104_v28, 0.0  ;;  %vm5977_vm4 = vmmov %vm5971_vm10  ;;  %v1946_v7 = vmul.f32 %v1930_v44, %v5987_v35  ;;  %v5147_v51 = vsel %vm1981_vm11, 1.0, %v1938_v40  ;;  %1956 = vst.msk [vmem:[%s5496_s6 + $0x38] sm:$0x3f] %vm1955_vm0, %v1938_v40  ;;  %vm5993_vm10 = vcmp.eq.f32.partialorder %v5991_v4, %v5992_v13  ;;  %v6023_v44 = vld [vmem:[#allocation34_spill] sm:$0xff]  ;;  %v6027_v4 = vld [vmem:[#allocation72_spill] sm:$0xff] }
 0x7b0   :  { %v5120_v9 = vsel %vm5977_vm4, 1.0, %v1943_v43  ;;  %vm5978_vm14 = vmmov %vm5972_vm13  ;;  %2027 = vadd.xlane.f32.xlu0 %v2026_v45  ;;  %v5998_v41 = vsel %vm5996_vm8, 1.0, %v5997_v61  ;;  %v1807_v55 = vadd.s32 %v4979_v59, %v1804_v48  ;;  %vm1976_vm4 = vcmp.eq.s32.totalorder %v1968_v30, %v3175_v37  ;;  %v6006_v59 = vld [vmem:[#allocation55_spill] sm:$0xff]  ;;  %v6010_v45 = vld [vmem:[#allocation45_spill] sm:$0xff] }
 0x7b1   :  { %1961 = vst.msk [vmem:[%s5496_s6 + $0x60] sm:$0xff] %vm5978_vm14, %v1943_v43  ;;  %vm5982_vm9 = vmmov %vm5976_vm12  ;;  %v5162_v1 = vsel %vm1981_vm11, 1.0, %v1946_v7  ;;  %v1668_v39 = vpop.xlane.xlu0 %1667  ;;  %vm6002_vm11 = vnez %v6001_v19  ;;  %vm6008_vm14 = vcmp.eq.f32.partialorder %v6006_v59, %v6007_v14  ;;  %v1776_v35 = vshll.u32 %v1775_v18, 16  ;;  %v6026_v48 = vld [vmem:[#allocation57_spill] sm:$0xff]  ;;  %v6042_v19 = vld [vmem:[#allocation46_spill] sm:$0xff] }
 0x7b2   :  { %v2050_v25 = vsel %vm5982_vm9, %v5120_v9, 0.0  ;;  %vm1905_vm1 = vmand %vm5990_vm15, %vm1889_vm5  ;;  %1964 = vst.msk [vmem:[%s5496_s6 + $0x78] sm:$0x3f] %vm1955_vm0, %v1946_v7  ;;  %v6004_v27 = vsel %vm6002_vm11, 1.0, %v6003_v24  ;;  %vm1885_vm0 = vcmp.eq.s32.totalorder %v3175_v37, %v1687_v15  ;;  %v1669_v50 = vcvt.f32.s32 %v1668_v39  ;;  %v6031_v18 = vld [vmem:[#allocation73_spill] sm:$0xff]  ;;  %v6050_v14 = vld [vmem:[#allocation75_spill] sm:$0xff] }
 0x7b3   :  { %2051 = vadd.xlane.f32.xlu1 %v2050_v25  ;;  %vm1913_vm13 = vmand %vm5993_vm10, %vm1897_vm7  ;;  %v1921_v12 = vsel %vm1905_vm1, 1.0, %v5998_v41  ;;  %v1788_v43 = vpop.xlane.xlu1 %1787  ;;  %vm1893_vm5 = vcmp.eq.s32.totalorder %v3175_v37, %v1807_v55  ;;  %vm6009_vm15 = vcmask 506880   ;;  %vm6012_vm1 = vcmp.eq.f32.partialorder %v6010_v45, %v6011_v21  ;;  %v6035_v41 = vld [vmem:[#allocation36_spill] sm:$0xff]  ;;  %v6049_v59 = vld [vmem:[#allocation49_spill] sm:$0xff] }
 0x7b4   :  { %vm5994_vm2 = vmmov %vm5982_vm9  ;;  %v1937_v33 = vmul.f32 %v1921_v12, %v6000_v62  ;;  %v1929_v57 = vsel %vm1913_vm13, 1.0, %v6004_v27  ;;  %v1789_v63 = vcvt.f32.s32 %v1788_v43  ;;  %v1672_v52 = vadd.s32 %v4992_v47, %v1669_v50  ;;  %v6037_v12 = vld [vmem:[#allocation56_spill] sm:$0xff]  ;;  %v6040_v62 = vld [vmem:[#allocation30_spill] sm:$0xff] }
 0x7b5   :  { %v2035_v16 = vsel %vm5994_vm2, %v5147_v51, 0.0  ;;  %vm5999_vm12 = vmmov %vm5994_vm2  ;;  %v1945_v49 = vmul.f32 %v1929_v57, %v6005_v42  ;;  %vm6028_vm11 = vcmp.eq.f32.partialorder %v6026_v48, %v6027_v4  ;;  %v6043_v24 = vsel %vm4565_vm6, 1.0, %v6042_v19  ;;  %v6044_v57 = vld [vmem:[#allocation31_spill] sm:$0xff]  ;;  %v6046_v42 = vld [vmem:[#allocation74_spill] sm:$0xff] }
 0x7b6   :  { %2036 = vadd.xlane.f32.xlu0 %v2035_v16  ;;  %v2059_v26 = vsel %vm5999_vm12, %v5162_v1, 0.0  ;;  %vm1901_vm9 = vmand %vm6008_vm14, %vm1885_vm0  ;;  %v5189_v23 = vsel %vm1980_vm3, 1.0, %v1937_v33  ;;  %1954 = vst.msk [vmem:[%s5496_s6 + $0x30] sm:$0xff] %vm6009_vm15, %v1937_v33  ;;  %v1792_v40 = vadd.s32 %v4994_v22, %v1789_v63  ;;  %v1653_v47 = vpop.xlane.xlu0 %1652  ;;  %vm1884_vm12 = vcmp.eq.s32.totalorder %v3175_v37, %v1672_v52  ;;  %v6045_v43 = vld [vmem:[#allocation59_spill] sm:$0xff]  ;;  %v6053_v21 = vld [vmem:[#allocation38_spill] sm:$0xff] }
 0x7b7   :  { %2060 = vadd.xlane.f32.xlu1 %v2059_v26  ;;  %vm1909_vm7 = vmand %vm6012_vm1, %vm1893_vm5  ;;  %v5204_v6 = vsel %vm1980_vm3, 1.0, %v1945_v49  ;;  %vm6022_vm3 = vnez %v6021_v53  ;;  %v1654_v7 = vcvt.f32.s32 %v1653_v47  ;;  %vm1975_vm5 = vcmp.eq.s32.totalorder %v1967_v56, %v3175_v37  ;;  %v6055_v52 = vld [vmem:[#allocation58_spill] sm:$0xff]  ;;  %v6058_v56 = vld [vmem:[#allocation32_spill] sm:$0xff] }
 0x7b8   :  { %vm6013_vm10 = vmmov %vm5994_vm2  ;;  %vm6016_vm2 = vnez %v6015_v60  ;;  %v6024_v46 = vsel %vm6022_vm3, 1.0, %v6023_v44  ;;  %vm1892_vm14 = vcmp.eq.s32.totalorder %v3175_v37, %v1792_v40  ;;  %vm6051_vm6 = vcmp.eq.f32.partialorder %v6049_v59, %v6050_v14  ;;  %v6061_v40 = vld [vmem:[#allocation48_spill] sm:$0xff] }
 0x7b9   :  { %v2032_v8 = vsel %vm6013_vm10, %v5189_v23, 0.0  ;;  %vm6014_vm13 = vmmov %vm6009_vm15  ;;  %v6018_v25 = vsel %vm6016_vm2, 1.0, %v6017_v38  ;;  %v1925_v10 = vsel %vm1909_vm7, 1.0, %v6024_v46  ;;  %v1773_v22 = vpop.xlane.xlu1 %1772  ;;  %vm6032_vm15 = vcmp.eq.f32.partialorder %v6030_v11, %v6031_v18 }
 0x7ba   :  { %1963 = vst.msk [vmem:[%s5496_s6 + $0x70] sm:$0xff] %vm6014_vm13, %v1945_v49  ;;  %v1917_v2 = vsel %vm1901_vm9, 1.0, %v6018_v25  ;;  %2033 = vadd.xlane.f32.xlu0 %v2032_v8  ;;  %vm6019_vm8 = vmmov %vm6013_vm10  ;;  %v1941_v5 = vmul.f32 %v1925_v10, %v6025_v0  ;;  %v1774_v13 = vcvt.f32.s32 %v1773_v22  ;;  %v1657_v16 = vadd.s32 %v5013_v29, %v1654_v7 }
 0x7bb   :  { %v2056_v32 = vsel %vm6019_vm8, %v5204_v6, 0.0  ;;  %v1933_v34 = vmul.f32 %v1917_v2, %v6020_v3  ;;  %vm1900_vm0 = vmand %vm6028_vm11, %vm1884_vm12  ;;  %v6059_v2 = vld [vmem:[#allocation39_spill] sm:$0xff]  ;;  %v6063_v3 = vld [vmem:[#allocation33_spill] sm:$0xff] }
 0x7bc   :  { %2057 = vadd.xlane.f32.xlu1 %v2056_v32  ;;  %vm6029_vm9 = vmmov %vm6014_vm13  ;;  %v5247_v61 = vsel %vm1976_vm4, 1.0, %v1941_v5  ;;  %vm6036_vm13 = vnez %v6035_v41  ;;  %v1777_v26 = vadd.s32 %v1776_v35, %v1774_v13 }
 0x7bd   :  { %v5232_v15 = vsel %vm1976_vm4, 1.0, %v1933_v34  ;;  %1950 = vst.msk [vmem:[%s5496_s6 + $0x10] sm:$0xff] %vm6029_vm9, %v1933_v34  ;;  %vm1908_vm1 = vmand %vm6032_vm15, %vm1892_vm14  ;;  %v6038_v55 = vsel %vm6036_vm13, 1.0, %v6037_v12  ;;  %vm1883_vm4 = vcmp.eq.s32.totalorder %v3175_v37, %v1657_v16  ;;  %vm6054_vm15 = vnez %v6053_v21  ;;  %v6070_v21 = vld [vmem:[#allocation8_spill] sm:$0xff] }
 0x7be   :  { %vm6033_vm7 = vmmov %vm6019_vm8  ;;  %v1916_v39 = vsel %vm1900_vm0, 1.0, %v6038_v55  ;;  %v1924_v27 = vsel %vm1908_vm1, 1.0, %v6043_v24  ;;  %vm6047_vm8 = vcmp.eq.f32.partialorder %v6045_v43, %v6046_v42  ;;  %vm1891_vm12 = vcmp.eq.s32.totalorder %v3175_v37, %v1777_v26 }
 0x7bf   :  { %v2020_v17 = vsel %vm6033_vm7, %v5232_v15, 0.0  ;;  %vm6034_vm10 = vmmov %vm6029_vm9  ;;  %v1932_v33 = vmul.f32 %v1916_v39, %v6040_v62  ;;  %v1940_v50 = vmul.f32 %v1924_v27, %v6044_v57  ;;  %v6056_v8 = vsel %vm6054_vm15, 1.0, %v6055_v52 }
 0x7c0   :  { %1959 = vst.msk [vmem:[%s5496_s6 + $0x50] sm:$0xff] %vm6034_vm10, %v1941_v5  ;;  %2021 = vadd.xlane.f32.xlu0 %v2020_v17  ;;  %vm6039_vm2 = vmmov %vm6033_vm7  ;;  %vm1974_vm1 = vcmp.eq.s32.totalorder %v4953_v31, %v3175_v37 }
 0x7c1   :  { %v2044_v29 = vsel %vm6039_vm2, %v5247_v61, 0.0  ;;  %vm1899_vm3 = vmand %vm6047_vm8, %vm1883_vm4  ;;  %v5272_v49 = vsel %vm1975_vm5, 1.0, %v1932_v33  ;;  %v5285_v45 = vsel %vm1975_vm5, 1.0, %v1940_v50  ;;  %1958 = vst.msk [vmem:[%s5496_s6 + $0x48] sm:$0xff] %vm6029_vm9, %v1940_v50  ;;  %vm6060_vm5 = vnez %v6059_v2 }
 0x7c2   :  { %2045 = vadd.xlane.f32.xlu1 %v2044_v29  ;;  %vm6048_vm11 = vmmov %vm6029_vm9  ;;  %v1915_v60 = vsel %vm1899_vm3, 1.0, %v6056_v8  ;;  %v6062_v47 = vsel %vm6060_vm5, 1.0, %v6061_v40 }
 0x7c3   :  { %1949 = vst.msk [vmem:[%s5496_s6 + $0x8] sm:$0xff] %vm6048_vm11, %v1932_v33  ;;  %vm1907_vm0 = vmand %vm6051_vm6, %vm1891_vm12  ;;  %v1931_v25 = vmul.f32 %v1915_v60, %v6058_v56 }
 0x7c4   :  { %vm6052_vm14 = vmmov %vm6039_vm2  ;;  %v1923_v32 = vsel %vm1907_vm0, 1.0, %v6062_v47  ;;  %v6072_v47 = vld [vmem:[#allocation9_spill] sm:$0xff] }
 0x7c5   :  { %v2017_v63 = vsel %vm6052_vm14, %v5272_v49, 0.0  ;;  %vm6057_vm7 = vmmov %vm6039_vm2  ;;  %v1939_v34 = vmul.f32 %v1923_v32, %v6063_v3  ;;  %v1998_v37 = vsel %vm1974_vm1, 1.0, %v1931_v25 }
 0x7c6   :  { %2018 = vadd.xlane.f32.xlu0 %v2017_v63  ;;  %v2041_v38 = vsel %vm6057_vm7, %v5285_v45, 0.0  ;;  %vm6064_vm10 = vmmov %vm6029_vm9 }
 0x7c7   :  { %2042 = vadd.xlane.f32.xlu1 %v2041_v38  ;;  %1948 = vst.msk [vmem:[%s5496_s6] sm:$0xff] %vm6064_vm10, %v1931_v25  ;;  %vm6065_vm13 = vmmov %vm6039_vm2  ;;  %v2006_v31 = vsel %vm1974_vm1, 1.0, %v1939_v34  ;;  %v6071_v38 = vld [vmem:[#allocation16_spill] sm:$0xff] }
 0x7c8   :  { %2759 = vmatprep.mubr.msk.f32.mxu0 %vm6065_vm13, %v1998_v37  ;;  %vm6066_vm2 = vmmov %vm6029_vm9 }
 0x7c9   :  { %1957 = vst.msk [vmem:[%s5496_s6 + $0x40] sm:$0xff] %vm6066_vm2, %v1939_v34  ;;  %vm6067_vm4 = vmmov %vm6057_vm7  ;;  %v6073_v34 = vld [vmem:[#allocation17_spill] sm:$0xff] }
 0x7ca   :  { %v2014_v53 = vsel %vm6067_vm4, %v1998_v37, 0.0  ;;  %vm6068_vm8 = vmmov %vm6067_vm4 }
 0x7cb   :  { %2787 = vmatprep.mubr.msk.f32.mxu1 %vm6068_vm8, %v2006_v31  ;;  %2015 = vadd.xlane.f32.xlu0 %v2014_v53  ;;  %vm6069_vm3 = vmmov %vm6067_vm4  ;;  %v6074_v53 = vld [vmem:[#allocation6_spill] sm:$0xff]  ;;  %vm2423_vm8 = vcmask 64512  }
 0x7cc   :  { %v2038_v44 = vsel %vm6069_vm3, %v2006_v31, 0.0  ;;  %vm6086_vm12 = vmmov %vm6069_vm3 }
 0x7cd   :  { %2039 = vadd.xlane.f32.xlu1 %v2038_v44  ;;  %vm6087_vm11 = vmmov %vm6069_vm3 }
 0x7ce   :  { %vm6088_vm6 = vmmov %vm6069_vm3 }
 0x7cf   :  { %vm6089_vm0 = vmmov %vm6069_vm3  ;;  %vm2431_vm3 = vcmask 62464  }
 0x7d0   :  { %vm6090_vm14 = vmmov %vm6089_vm0 }
 0x7d1   :  { %vm6091_vm9 = vmmov %vm6089_vm0 }
 0x7d2   :  { %vm6092_vm15 = vmmov %vm6089_vm0 }
 0x7d3   :  { %vm6093_vm1 = vmmov %vm6089_vm0 }
 0x7d4   :  { %vm6094_vm7 = vmmov %vm6089_vm0 }
 0x7d5   :  { %vm6095_vm5 = vmmov %vm6089_vm0 }
 0x7d6   :  { %vm6096_vm10 = vmmov %vm6089_vm0 }
 0x7d7   :  { %vm6097_vm13 = vmmov %vm6089_vm0 }
 0x7d8   :  { %vm6098_vm2 = vmmov %vm6089_vm0 }
 0x7d9   :  { %vm6099_vm4 = vmmov %vm6089_vm0 }
 0x82a   :  { %v2025_v46 = vpop.xlane.xlu0 %2024 }
 0x82b   :  { %v2065_v26 = vmax.f32 %v2025_v46, 1.0 }
 0x82e   :  { %v2049_v10 = vpop.xlane.xlu1 %2048 }
 0x82f   :  { %v2073_v29 = vmax.f32 %v2049_v10, 1.0  ;;  %v6075_v10 = vld [vmem:[#allocation14_spill] sm:$0xff] }
 0x832   :  { %v2031_v35 = vpop.xlane.xlu0 %2030 }
 0x833   :  { %v2067_v48 = vmax.f32 %v2031_v35, 1.0 }
 0x835   :  { %v2055_v7 = vpop.xlane.xlu1 %2054 }
 0x836   :  { %v2075_v11 = vmax.f32 %v2055_v7, 1.0 }
 0x839   :  { %v2028_v22 = vpop.xlane.xlu0 %2027 }
 0x83a   :  { %v2066_v17 = vmax.f32 %v2028_v22, 1.0  ;;  %v6076_v22 = vld [vmem:[#allocation7_spill] sm:$0xff] }
 0x83c   :  { %v2052_v0 = vpop.xlane.xlu1 %2051 }
 0x83d   :  { %v2074_v55 = vmax.f32 %v2052_v0, 1.0 }
 0x83f   :  { %v2037_v5 = vpop.xlane.xlu0 %2036 }
 0x840   :  { %v2069_v4 = vmax.f32 %v2037_v5, 1.0  ;;  %v2061_v13 = vpop.xlane.xlu1 %2060 }
 0x841   :  { %v2077_v18 = vmax.f32 %v2061_v13, 1.0 }
 0x842   :  { %2896 = vrsqrt.f32 %v2069_v4 }
 0x843   :  { %2898 = vrsqrt.f32 %v2077_v18  ;;  %v2034_v16 = vpop.xlane.xlu0 %2033 }
 0x844   :  { %2900 = vrsqrt.f32 %v2067_v48  ;;  %v2068_v41 = vmax.f32 %v2034_v16, 1.0  ;;  %v6077_v48 = vld [vmem:[#allocation15_spill] sm:$0xff] }
 0x845   :  { %v2058_v12 = vpop.xlane.xlu1 %2057  ;;  %2902 = vrsqrt.f32 %v2075_v11  ;;  %v6078_v11 = vld [vmem:[#allocation4_spill] sm:$0xff] }
 0x846   :  { %v2076_v39 = vmax.f32 %v2058_v12, 1.0  ;;  %2904 = vrsqrt.f32 %v2068_v41 }
 0x848   :  { %2906 = vrsqrt.f32 %v2076_v39 }
 0x849   :  { %v2022_v62 = vpop.xlane.xlu0 %2021  ;;  %2908 = vrsqrt.f32 %v2066_v17  ;;  %v6079_v17 = vld [vmem:[#allocation12_spill] sm:$0xff] }
 0x84a   :  { %v2064_v33 = vmax.f32 %v2022_v62, 1.0  ;;  %2910 = vrsqrt.f32 %v2074_v55  ;;  %v6080_v55 = vld [vmem:[#allocation5_spill] sm:$0xff]  ;;  %v6082_v62 = vld [vmem:[#allocation2_spill] sm:$0xff] }
 0x84b   :  { %v2046_v30 = vpop.xlane.xlu1 %2045  ;;  %2912 = vrsqrt.f32 %v2065_v26  ;;  %v6081_v26 = vld [vmem:[#allocation13_spill] sm:$0xff] }
 0x84c   :  { %v2072_v19 = vmax.f32 %v2046_v30, 1.0  ;;  %2914 = vrsqrt.f32 %v2073_v29 }
 0x84d   :  { %2916 = vrsqrt.f32 %v2064_v33 }
 0x84e   :  { %2918 = vrsqrt.f32 %v2072_v19  ;;  %v6083_v19 = vld [vmem:[#allocation10_spill] sm:$0xff] }
 0x84f   :  { %v2019_v24 = vpop.xlane.xlu0 %2018  ;;  %v5317_v43 = vpop.eup %2896 }
 0x850   :  { %v2063_v27 = vmax.f32 %v2019_v24, 1.0  ;;  %v2043_v57 = vpop.xlane.xlu1 %2042  ;;  %v5319_v59 = vpop.eup %2898  ;;  %v2101_v52 = vmul.f32 %v5317_v43, %v6070_v21 }
 0x851   :  { %v2071_v50 = vmax.f32 %v2043_v57, 1.0  ;;  %v5323_v8 = vpop.eup %2900  ;;  %v2109_v56 = vmul.f32 %v5319_v59, %v6071_v38  ;;  %v6084_v57 = vld [vmem:[#allocation3_spill] sm:$0xff] }
 0x852   :  { %2920 = vrsqrt.f32 %v2063_v27  ;;  %v5327_v25 = vpop.eup %2902  ;;  %2743 = vmatprep.subr.mxu0 %v2101_v52  ;;  %v2099_v44 = vmul.f32 %v5323_v8, %v6074_v53 }
 0x853   :  { %2922 = vrsqrt.f32 %v2071_v50  ;;  %v5329_v2 = vpop.eup %2904  ;;  %2771 = vmatprep.subr.mxu1 %v2109_v56  ;;  %2744 = vmatpush3.msra.mxu0 %v2101_v52  ;;  %v2107_v35 = vmul.f32 %v5327_v25, %v6075_v10 }
 0x854   :  { %v2016_v42 = vpop.xlane.xlu0 %2015  ;;  %2772 = vmatpush3.msra.mxu1 %v2109_v56  ;;  %v2100_v32 = vmul.f32 %v5329_v2, %v6072_v47 }
 0x855   :  { %v2062_v14 = vmax.f32 %v2016_v42, 1.0  ;;  %v5331_v40 = vpop.eup %2906  ;;  %v6085_v42 = vld [vmem:[#allocation11_spill] sm:$0xff] }
 0x856   :  { %v2040_v63 = vpop.xlane.xlu1 %2039  ;;  %v5335_v3 = vpop.eup %2908  ;;  %v2108_v37 = vmul.f32 %v5331_v40, %v6073_v34  ;;  %2745 = vmatprep.subr.mxu0 %v2100_v32 }
 0x857   :  { %v2070_v60 = vmax.f32 %v2040_v63, 1.0  ;;  %2924 = vrsqrt.f32 %v2062_v14  ;;  %v5339_v31 = vpop.eup %2910  ;;  %2746 = vmatpush3.msra.mxu0 %v2100_v32  ;;  %v2098_v0 = vmul.f32 %v5335_v3, %v6076_v22 }
 0x858   :  { %v5343_v46 = vpop.eup %2912  ;;  %2773 = vmatprep.subr.mxu1 %v2108_v37  ;;  %2747 = vmatprep.subr.mxu0 %v2099_v44  ;;  %v2106_v4 = vmul.f32 %v5339_v31, %v6077_v48 }
 0x859   :  { %2926 = vrsqrt.f32 %v2070_v60  ;;  %v5347_v7 = vpop.eup %2914  ;;  %2774 = vmatpush3.msra.mxu1 %v2108_v37  ;;  %2748 = vmatpush3.msra.mxu0 %v2099_v44  ;;  %v2097_v18 = vmul.f32 %v5343_v46, %v6078_v11 }
 0x85a   :  { %v5351_v5 = vpop.eup %2916  ;;  %2775 = vmatprep.subr.mxu1 %v2107_v35  ;;  %2749 = vmatprep.subr.mxu0 %v2098_v0  ;;  %v2105_v41 = vmul.f32 %v5347_v7, %v6079_v17 }
 0x85b   :  { %v5355_v13 = vpop.eup %2918  ;;  %2776 = vmatpush3.msra.mxu1 %v2107_v35  ;;  %2750 = vmatpush3.msra.mxu0 %v2098_v0  ;;  %v2096_v39 = vmul.f32 %v5351_v5, %v6080_v55 }
 0x85c   :  { %2777 = vmatprep.subr.mxu1 %v2106_v4  ;;  %2751 = vmatprep.subr.mxu0 %v2097_v18  ;;  %v2104_v29 = vmul.f32 %v5355_v13, %v6081_v26 }
 0x85d   :  { %2778 = vmatpush3.msra.mxu1 %v2106_v4  ;;  %2752 = vmatpush3.msra.mxu0 %v2097_v18 }
 0x85e   :  { %2779 = vmatprep.subr.mxu1 %v2105_v41  ;;  %2753 = vmatprep.subr.mxu0 %v2096_v39 }
 0x85f   :  { %v2921_v16 = vpop.eup %2920  ;;  %2780 = vmatpush3.msra.mxu1 %v2105_v41  ;;  %2754 = vmatpush3.msra.mxu0 %v2096_v39 }
 0x860   :  { %v2923_v12 = vpop.eup %2922  ;;  %v2095_v33 = vmul.f32 %v2921_v16, %v6082_v62  ;;  %2781 = vmatprep.subr.mxu1 %v2104_v29 }
 0x861   :  { %v2103_v24 = vmul.f32 %v2923_v12, %v6083_v19  ;;  %2782 = vmatpush3.msra.mxu1 %v2104_v29 }
 0x862   :  { %2755 = vmatprep.subr.mxu0 %v2095_v33 }
 0x863   :  { %2783 = vmatprep.subr.mxu1 %v2103_v24  ;;  %2756 = vmatpush3.msra.mxu0 %v2095_v33 }
 0x864   :  { %v2925_v30 = vpop.eup %2924  ;;  %2784 = vmatpush3.msra.mxu1 %v2103_v24 }
 0x865   :  { %v2094_v50 = vmul.f32 %v2925_v30, %v6084_v57 }
 0x866   :  { %v2927_v27 = vpop.eup %2926 }
 0x867   :  { %v2102_v14 = vmul.f32 %v2927_v27, %v6085_v42  ;;  %2757 = vmatprep.subr.mxu0 %v2094_v50 }
 0x868   :  { %2758 = vmatpush3.msra.mxu0 %v2094_v50 }
 0x869   :  { %2785 = vmatprep.subr.mxu1 %v2102_v14  ;;  %2760 = vmatmul.mubr.msk.f32.vlgmr.msra.gmra.mxu0 %vm6086_vm12, %v5272_v49 }
 0x86a   :  { %2786 = vmatpush3.msra.mxu1 %v2102_v14  ;;  %2762 = vmatprep.mubr.msk.f32.mxu0 %vm6088_vm6, %v5232_v15 }
 0x86b   :  { %2788 = vmatmul.mubr.msk.f32.vlgmr.msra.gmra.mxu1 %vm6087_vm11, %v5285_v45 }
 0x86c   :  { %2790 = vmatprep.mubr.msk.f32.mxu1 %vm6089_vm0, %v5247_v61 }
 0x86d   :  { %2763 = vmatmul.mubr.msk.f32.gmra.mxu0 %vm6090_vm14, %v5021_v58 }
 0x86e   :  { %2765 = vmatprep.mubr.msk.f32.mxu0 %vm6092_vm15, %v5104_v28 }
 0x86f   :  { %2791 = vmatmul.mubr.msk.f32.gmra.mxu1 %vm6091_vm9, %v5034_v20  ;;  %v5400_v20 = vld [vmem:[%s5497_s4] ss:$0 sm:$0xff] }
 0x870   :  { %2793 = vmatprep.mubr.msk.f32.mxu1 %vm6093_vm1, %v5120_v9 }
 0x871   :  { %2766 = vmatmul.mubr.msk.f32.gmra.mxu0 %vm6094_vm7, %v5061_v36 }
 0x872   :  { %2768 = vmatprep.mubr.msk.f32.mxu0 %vm6096_vm10, %v5189_v23 }
 0x873   :  { %2794 = vmatmul.mubr.msk.f32.gmra.mxu1 %vm6095_vm5, %v5076_v54 }
 0x874   :  { %2796 = vmatprep.mubr.msk.f32.mxu1 %vm6097_vm13, %v5204_v6 }
 0x875   :  { %2769 = vmatmul.mubr.msk.f32.gmra.mxu0 %vm6098_vm2, %v5147_v51 }
 0x877   :  { %2797 = vmatmul.mubr.msk.f32.gmra.mxu1 %vm6099_vm4, %v5162_v1 }
 0x929   :  { %v2761_v58 = vpop.f32.mrf.mxu0 }
 0x92a   :  { %v2369_v36 = vmul.f32 %v2921_v16, %v2761_v58 }
 0x92b   :  { %v2789_v54 = vpop.f32.mrf.mxu1  ;;  %v2200_v9 = vpop.f32.mrf.mxu0 }
 0x92c   :  { %v2377_v28 = vmul.f32 %v2923_v12, %v2789_v54  ;;  %v2392_v23 = vadd.f32 %v5400_v20, %v2369_v36  ;;  %v2368_v15 = vmul.f32 %v2925_v30, %v2200_v9 }
 0x92d   :  { %v2329_v6 = vpop.f32.mrf.mxu1  ;;  %v2764_v49 = vpop.f32.mrf.mxu0 }
 0x92e   :  { %v2400_v51 = vadd.f32 %v5400_v20, %v2377_v28  ;;  %v2376_v61 = vmul.f32 %v2927_v27, %v2329_v6  ;;  %v2408_v1 = vmax.f32 %v2392_v23, 0.0  ;;  %v2391_v45 = vadd.f32 %v5400_v20, %v2368_v15 }
 0x92f   :  { %v2371_v63 = vmul.f32 %v5343_v46, %v2764_v49  ;;  %v2792_v21 = vpop.f32.mrf.mxu1  ;;  %v2210_v56 = vpop.f32.mrf.mxu0 }
 0x930   :  { %v2416_v52 = vmax.f32 %v2400_v51, 0.0  ;;  %v2399_v60 = vadd.f32 %v5400_v20, %v2376_v61  ;;  %v2379_v38 = vmul.f32 %v5347_v7, %v2792_v21  ;;  %2425 = vst.msk [vmem:[%s5498_s5 + $0x8] sm:$0xff] %vm2423_vm8, %v2408_v1  ;;  %v2407_v47 = vmax.f32 %v2391_v45, 0.0 }
 0x931   :  { %v2394_v32 = vadd.f32 %v5400_v20, %v2371_v63  ;;  %v2370_v34 = vmul.f32 %v5351_v5, %v2210_v56  ;;  %v2339_v37 = vpop.f32.mrf.mxu1  ;;  %v2767_v10 = vpop.f32.mrf.mxu0 }
 0x932   :  { %2434 = vst.msk [vmem:[%s5498_s5 + $0x48] sm:$0xff] %vm2423_vm8, %v2416_v52  ;;  %v2415_v53 = vmax.f32 %v2399_v60, 0.0  ;;  %v2402_v44 = vadd.f32 %v5400_v20, %v2379_v38  ;;  %v2378_v46 = vmul.f32 %v5355_v13, %v2339_v37  ;;  %2424 = vst.msk [vmem:[%s5498_s5] sm:$0xff] %vm2423_vm8, %v2407_v47  ;;  %v2373_v22 = vmul.f32 %v5323_v8, %v2767_v10 }
 0x933   :  { %v2410_v35 = vmax.f32 %v2394_v32, 0.0  ;;  %v2393_v7 = vadd.f32 %v5400_v20, %v2370_v34  ;;  %v2795_v0 = vpop.f32.mrf.mxu1  ;;  %v2220_v13 = vpop.f32.mrf.mxu0 }
 0x934   :  { %2433 = vst.msk [vmem:[%s5498_s5 + $0x40] sm:$0xff] %vm2423_vm8, %v2415_v53  ;;  %v2418_v5 = vmax.f32 %v2402_v44, 0.0  ;;  %v2401_v48 = vadd.f32 %v5400_v20, %v2378_v46  ;;  %v2381_v4 = vmul.f32 %v5327_v25, %v2795_v0  ;;  %v2396_v8 = vadd.f32 %v5400_v20, %v2373_v22 }
 0x935   :  { %2427 = vst.msk [vmem:[%s5498_s5 + $0x18] sm:$0xff] %vm2423_vm8, %v2410_v35  ;;  %v2409_v11 = vmax.f32 %v2393_v7, 0.0  ;;  %v2372_v18 = vmul.f32 %v5335_v3, %v2220_v13  ;;  %v2349_v16 = vpop.f32.mrf.mxu1  ;;  %v2770_v12 = vpop.f32.mrf.mxu0 }
 0x936   :  { %2436 = vst.msk [vmem:[%s5498_s5 + $0x58] sm:$0xff] %vm2423_vm8, %v2418_v5  ;;  %v2417_v17 = vmax.f32 %v2401_v48, 0.0  ;;  %v2404_v25 = vadd.f32 %v5400_v20, %v2381_v4  ;;  %v2380_v41 = vmul.f32 %v5339_v31, %v2349_v16  ;;  %v2412_v55 = vmax.f32 %v2396_v8, 0.0 }
 0x937   :  { %2426 = vst.msk [vmem:[%s5498_s5 + $0x10] sm:$0xff] %vm2423_vm8, %v2409_v11  ;;  %v2395_v3 = vadd.f32 %v5400_v20, %v2372_v18  ;;  %v2375_v39 = vmul.f32 %v5317_v43, %v2770_v12  ;;  %v2798_v26 = vpop.f32.mrf.mxu1  ;;  %v2230_v33 = vpop.f32.mrf.mxu0 }
 0x938   :  { %2435 = vst.msk [vmem:[%s5498_s5 + $0x50] sm:$0xff] %vm2423_vm8, %v2417_v17  ;;  %v2420_v29 = vmax.f32 %v2404_v25, 0.0  ;;  %v2403_v31 = vadd.f32 %v5400_v20, %v2380_v41  ;;  %v2383_v62 = vmul.f32 %v5319_v59, %v2798_v26  ;;  %2429 = vst.msk [vmem:[%s5498_s5 + $0x28] sm:$0xff] %vm2423_vm8, %v2412_v55  ;;  %v2374_v19 = vmul.f32 %v5329_v2, %v2230_v33 }
 0x939   :  { %v2411_v30 = vmax.f32 %v2395_v3, 0.0  ;;  %v2398_v43 = vadd.f32 %v5400_v20, %v2375_v39  ;;  %v2359_v24 = vpop.f32.mrf.mxu1 }
 0x93a   :  { %2438 = vst.msk [vmem:[%s5498_s5 + $0x68] sm:$0xff] %vm2423_vm8, %v2420_v29  ;;  %v2419_v27 = vmax.f32 %v2403_v31, 0.0  ;;  %v2406_v59 = vadd.f32 %v5400_v20, %v2383_v62  ;;  %v2382_v57 = vmul.f32 %v5331_v40, %v2359_v24  ;;  %v2397_v2 = vadd.f32 %v5400_v20, %v2374_v19 }
 0x93b   :  { %2428 = vst.msk [vmem:[%s5498_s5 + $0x20] sm:$0xff] %vm2423_vm8, %v2411_v30  ;;  %v2414_v50 = vmax.f32 %v2398_v43, 0.0 }
 0x93c   :  { %2437 = vst.msk [vmem:[%s5498_s5 + $0x60] sm:$0xff] %vm2423_vm8, %v2419_v27  ;;  %v2422_v42 = vmax.f32 %v2406_v59, 0.0  ;;  %v2405_v14 = vadd.f32 %v5400_v20, %v2382_v57  ;;  %v2413_v40 = vmax.f32 %v2397_v2, 0.0 }
 0x93d   :  { %2432 = vst.msk [vmem:[%s5498_s5 + $0x38] sm:$0x3f] %vm2431_vm3, %v2414_v50 }
 0x93e   :  { %2440 = vst.msk [vmem:[%s5498_s5 + $0x78] sm:$0x3f] %vm2431_vm3, %v2422_v42  ;;  %v2421_v58 = vmax.f32 %v2405_v14, 0.0 }
 0x93f   :  { %2430 = vst.msk [vmem:[%s5498_s5 + $0x30] sm:$0xff] %vm2423_vm8, %v2413_v40 }
 0x940   :  { %2439 = vst.msk [vmem:[%s5498_s5 + $0x70] sm:$0xff] %vm2423_vm8, %v2421_v58 }

</bundles_post_ra>
